<compile_context>
chip_gen: v6e
topology: v6e:2x2x1
jax: 0.10.0
libtpu: 0.0.40
codegen_flags: <defaults>
</compile_context>

<pallas_src>
import jax
import jax.numpy as jnp
from jax.experimental import pallas as pl
from jax.experimental.pallas import tpu as pltpu


def _round_up(a, b):
    return (a + b - 1) // b * b


def nmu_kernel(x_ref, wt_ref, o_ref, acc_ref):
    # x_ref : (Bt, Tk)  batch-tile x n_in-block   (batch on sublanes)
    # wt_ref: (Tk, Tn)  n_in-block x n_out-tile   (n_out on lanes, pre-clamped)
    # o_ref : (Bt, Tn)  lane-dense output tile
    # acc_ref: (Bt, Tn) f32 scratch, persists across the k (n_in) grid axis
    k = pl.program_id(2)

    @pl.when(k == 0)
    def _init():
        acc_ref[...] = jnp.ones(acc_ref.shape, acc_ref.dtype)

    xm1 = x_ref[...].astype(jnp.float32) - 1.0      # (Bt, Tk): hoisted (x - 1)
    wt = wt_ref[...].astype(jnp.float32)            # (Tk, Tn): already clamped

    blk = acc_ref[...]                              # running product (Bt, Tn)
    tk = x_ref.shape[1]                             # static block width (128)
    for c in range(tk):                             # static unroll: pure VPU work
        xj = xm1[:, c:c + 1]                        # (Bt, 1) -> broadcast over lanes
        wj = wt[c:c + 1, :]                         # (1, Tn) -> broadcast over sublanes
        blk = blk * (xj * wj + 1.0)                 # acc *= Wc*(x-1) + 1
    acc_ref[...] = blk

    @pl.when(k == pl.num_programs(2) - 1)
    def _finalize():
        o_ref[...] = acc_ref[...].astype(o_ref.dtype)


def nmu_forward(x, W, *, batch_tile=128, out_tile=128):
    """x: (batch, n_in), W: (n_out, n_in) -> (batch, n_out)."""
    batch, n_in = x.shape
    n_out, n_in_w = W.shape
    assert n_in == n_in_w

    tk = 128                                                    # n_in block (one lane width)
    bt = min(_round_up(batch_tile, 8), _round_up(batch, 8))     # batch tile (mult of 8)
    tn = min(_round_up(out_tile, 128), _round_up(n_out, 128))   # n_out tile (mult of 128)

    b_pad = _round_up(batch, bt)
    n_pad = _round_up(n_out, tn)
    k_pad = _round_up(n_in, tk)

    # Hoist the clamp out of the grid (done once, not per grid step) and
    # transpose so n_out lies on lanes inside the kernel.
    wt = jnp.clip(W.astype(jnp.float32), 0.0, 1.0).T            # (n_in, n_out)
    # Zero padding: padded n_in rows give terms of exactly 1 (0*(x-1)+1 = 1);
    # padded n_out columns / batch rows are sliced off below.
    wt = jnp.pad(wt, ((0, k_pad - n_in), (0, n_pad - n_out)))
    xp = jnp.pad(x, ((0, b_pad - batch), (0, k_pad - n_in)))

    grid = (b_pad // bt, n_pad // tn, k_pad // tk)

    out = pl.pallas_call(
        nmu_kernel,
        out_shape=jax.ShapeDtypeStruct((b_pad, n_pad), x.dtype),
        grid_spec=pltpu.PrefetchScalarGridSpec(
            num_scalar_prefetch=0,
            grid=grid,
            in_specs=[
                pl.BlockSpec((bt, tk), lambda i, j, k: (i, k)),   # x tile
                pl.BlockSpec((tk, tn), lambda i, j, k: (k, j)),   # clamped W^T tile
            ],
            out_specs=pl.BlockSpec((bt, tn), lambda i, j, k: (i, j)),
            scratch_shapes=[pltpu.VMEM((bt, tn), jnp.float32)],
        ),
        compiler_params=pltpu.CompilerParams(
            dimension_semantics=("parallel", "parallel", "arbitrary"),
            vmem_limit_bytes=32 * 1024 * 1024,
        ),
    )(xp, wt)

    return out[:batch, :n_out]


def nmu_reference(x, W):
    Wc = jnp.clip(W.astype(jnp.float32), 0.0, 1.0)
    t = Wc[:, None, :] * x[None, :, :].astype(jnp.float32) + 1.0 - Wc[:, None, :]
    return jnp.prod(t, axis=2).T.astype(x.dtype)


if __name__ == "__main__":
    key = jax.random.PRNGKey(0)
    k1, k2, k3, k4 = jax.random.split(key, 4)

    # Test 1: toy shapes consistent with the module (batch=8, n_in=32, n_out=16).
    # reset_parameters(): uniform(0.5 - 0.25, 0.5 + 0.25) = uniform(0.25, 0.75).
    batch, n_in, n_out = 8, 32, 16
    W1 = jax.random.uniform(k1, (n_out, n_in), jnp.float32, 0.25, 0.75)
    x1 = jax.random.normal(k2, (batch, n_in), jnp.float32)
    out1 = jax.block_until_ready(nmu_forward(x1, W1))
    ref1 = nmu_reference(x1, W1)
    assert out1.shape == (batch, n_out)
    assert jnp.allclose(out1, ref1, rtol=1e-3, atol=1e-4), "mismatch vs reference (test 1)"

    # Test 2: ragged shapes exercising padding, n_out tiling, the multi-step
    # n_in reduction axis, and the clamp (W drawn outside [0, 1]).
    b2, ni2, no2 = 24, 150, 130
    W2 = jax.random.uniform(k3, (no2, ni2), jnp.float32, -0.2, 1.2)
    x2 = 1.0 + 0.1 * jax.random.normal(k4, (b2, ni2), jnp.float32)
    out2 = jax.block_until_ready(nmu_forward(x2, W2))
    ref2 = nmu_reference(x2, W2)
    assert out2.shape == (b2, no2)
    assert jnp.allclose(out2, ref2, rtol=1e-3, atol=1e-4), "mismatch vs reference (test 2)"

    print("KERNEL_OK")
</pallas_src>

<mosaic_0001>
module attributes {stable_mosaic.version = 11 : i64} {
  func.func @nmu_kernel(%arg0: i32, %arg1: i32, %arg2: i32, %arg3: memref<8x128xf32, #tpu.memory_space<vmem>>, %arg4: memref<128x128xf32, #tpu.memory_space<vmem>>, %arg5: memref<8x128xf32, #tpu.memory_space<vmem>>, %arg6: memref<8x128xf32, #tpu.memory_space<vmem>>) attributes {dimension_semantics = [#tpu.dimension_semantics<parallel>, #tpu.dimension_semantics<parallel>, #tpu.dimension_semantics<arbitrary>], iteration_bounds = array<i64: 1, 1, 1>, scalar_prefetch = 0 : i64, scratch_operands = 1 : i64, tpu.core_type = #tpu.core_type<tc>, window_params = [{transform_indices = @transform_0, window_bounds = array<i64: 8, 128>}, {transform_indices = @transform_1, window_bounds = array<i64: 128, 128>}, {transform_indices = @transform_2, window_bounds = array<i64: 8, 128>}]} {
    %c0_i32 = arith.constant 0 : i32
    %0 = arith.cmpi eq, %arg2, %c0_i32 : i32
    %1 = arith.extui %0 : i1 to i32
    %c0_i32_0 = arith.constant 0 : i32
    %2 = arith.cmpi ne, %1, %c0_i32_0 : i32
    scf.if %2 {
      %cst_138 = arith.constant 1.000000e+00 : f32
      %1036 = vector.broadcast %cst_138 : f32 to vector<8x128xf32>
      %c0_139 = arith.constant 0 : index
      %c0_140 = arith.constant 0 : index
      %1037 = vector.load %arg6[%c0_139, %c0_140] : memref<8x128xf32, #tpu.memory_space<vmem>>, vector<8x128xf32>
      tpu.vector_store %arg6[%c0_139, %c0_140], %1036 {strides = array<i32>} : memref<8x128xf32, #tpu.memory_space<vmem>>, vector<8x128xf32>,
    } else {
    }
    %c0 = arith.constant 0 : index
    %c0_1 = arith.constant 0 : index
    %3 = vector.load %arg3[%c0, %c0_1] : memref<8x128xf32, #tpu.memory_space<vmem>>, vector<8x128xf32>
    %cst = arith.constant 1.000000e+00 : f32
    %4 = vector.broadcast %cst : f32 to vector<8x128xf32>
    %5 = arith.subf %3, %4 : vector<8x128xf32>
    %c0_2 = arith.constant 0 : index
    %c0_3 = arith.constant 0 : index
    %6 = vector.load %arg4[%c0_2, %c0_3] : memref<128x128xf32, #tpu.memory_space<vmem>>, vector<128x128xf32>
    %c0_4 = arith.constant 0 : index
    %c0_5 = arith.constant 0 : index
    %7 = vector.load %arg6[%c0_4, %c0_5] : memref<8x128xf32, #tpu.memory_space<vmem>>, vector<8x128xf32>
    %8 = vector.extract_strided_slice %5 {offsets = [0, 0], sizes = [8, 1], strides = [1, 1]} : vector<8x128xf32> to vector<8x1xf32>
    %9 = vector.extract_strided_slice %6 {offsets = [0, 0], sizes = [1, 128], strides = [1, 1]} : vector<128x128xf32> to vector<1x128xf32>
    %10 = vector.broadcast %8 : vector<8x1xf32> to vector<8x128xf32>
    %11 = vector.broadcast %9 : vector<1x128xf32> to vector<8x128xf32>
    %12 = arith.mulf %10, %11 : vector<8x128xf32>
    %cst_6 = arith.constant 1.000000e+00 : f32
    %13 = vector.broadcast %cst_6 : f32 to vector<8x128xf32>
    %14 = arith.addf %12, %13 : vector<8x128xf32>
    %15 = arith.mulf %7, %14 : vector<8x128xf32>
    %16 = vector.extract_strided_slice %5 {offsets = [0, 1], sizes = [8, 1], strides = [1, 1]} : vector<8x128xf32> to vector<8x1xf32>
    %17 = vector.extract_strided_slice %6 {offsets = [1, 0], sizes = [1, 128], strides = [1, 1]} : vector<128x128xf32> to vector<1x128xf32>
    %18 = vector.broadcast %16 : vector<8x1xf32> to vector<8x128xf32>
    %19 = vector.broadcast %17 : vector<1x128xf32> to vector<8x128xf32>
    %20 = arith.mulf %18, %19 : vector<8x128xf32>
    %cst_7 = arith.constant 1.000000e+00 : f32
    %21 = vector.broadcast %cst_7 : f32 to vector<8x128xf32>
    %22 = arith.addf %20, %21 : vector<8x128xf32>
    %23 = arith.mulf %15, %22 : vector<8x128xf32>
    %24 = vector.extract_strided_slice %5 {offsets = [0, 2], sizes = [8, 1], strides = [1, 1]} : vector<8x128xf32> to vector<8x1xf32>
    %25 = vector.extract_strided_slice %6 {offsets = [2, 0], sizes = [1, 128], strides = [1, 1]} : vector<128x128xf32> to vector<1x128xf32>
    %26 = vector.broadcast %24 : vector<8x1xf32> to vector<8x128xf32>
    %27 = vector.broadcast %25 : vector<1x128xf32> to vector<8x128xf32>
    %28 = arith.mulf %26, %27 : vector<8x128xf32>
    %cst_8 = arith.constant 1.000000e+00 : f32
    %29 = vector.broadcast %cst_8 : f32 to vector<8x128xf32>
    %30 = arith.addf %28, %29 : vector<8x128xf32>
    %31 = arith.mulf %23, %30 : vector<8x128xf32>
    %32 = vector.extract_strided_slice %5 {offsets = [0, 3], sizes = [8, 1], strides = [1, 1]} : vector<8x128xf32> to vector<8x1xf32>
    %33 = vector.extract_strided_slice %6 {offsets = [3, 0], sizes = [1, 128], strides = [1, 1]} : vector<128x128xf32> to vector<1x128xf32>
    %34 = vector.broadcast %32 : vector<8x1xf32> to vector<8x128xf32>
    %35 = vector.broadcast %33 : vector<1x128xf32> to vector<8x128xf32>
    %36 = arith.mulf %34, %35 : vector<8x128xf32>
    %cst_9 = arith.constant 1.000000e+00 : f32
    %37 = vector.broadcast %cst_9 : f32 to vector<8x128xf32>
    %38 = arith.addf %36, %37 : vector<8x128xf32>
    %39 = arith.mulf %31, %38 : vector<8x128xf32>
    %40 = vector.extract_strided_slice %5 {offsets = [0, 4], sizes = [8, 1], strides = [1, 1]} : vector<8x128xf32> to vector<8x1xf32>
    %41 = vector.extract_strided_slice %6 {offsets = [4, 0], sizes = [1, 128], strides = [1, 1]} : vector<128x128xf32> to vector<1x128xf32>
    %42 = vector.broadcast %40 : vector<8x1xf32> to vector<8x128xf32>
    %43 = vector.broadcast %41 : vector<1x128xf32> to vector<8x128xf32>
    %44 = arith.mulf %42, %43 : vector<8x128xf32>
    %cst_10 = arith.constant 1.000000e+00 : f32
    %45 = vector.broadcast %cst_10 : f32 to vector<8x128xf32>
    %46 = arith.addf %44, %45 : vector<8x128xf32>
    %47 = arith.mulf %39, %46 : vector<8x128xf32>
    %48 = vector.extract_strided_slice %5 {offsets = [0, 5], sizes = [8, 1], strides = [1, 1]} : vector<8x128xf32> to vector<8x1xf32>
    %49 = vector.extract_strided_slice %6 {offsets = [5, 0], sizes = [1, 128], strides = [1, 1]} : vector<128x128xf32> to vector<1x128xf32>
    %50 = vector.broadcast %48 : vector<8x1xf32> to vector<8x128xf32>
    %51 = vector.broadcast %49 : vector<1x128xf32> to vector<8x128xf32>
    %52 = arith.mulf %50, %51 : vector<8x128xf32>
    %cst_11 = arith.constant 1.000000e+00 : f32
    %53 = vector.broadcast %cst_11 : f32 to vector<8x128xf32>
    %54 = arith.addf %52, %53 : vector<8x128xf32>
    %55 = arith.mulf %47, %54 : vector<8x128xf32>
    %56 = vector.extract_strided_slice %5 {offsets = [0, 6], sizes = [8, 1], strides = [1, 1]} : vector<8x128xf32> to vector<8x1xf32>
    %57 = vector.extract_strided_slice %6 {offsets = [6, 0], sizes = [1, 128], strides = [1, 1]} : vector<128x128xf32> to vector<1x128xf32>
    %58 = vector.broadcast %56 : vector<8x1xf32> to vector<8x128xf32>
    %59 = vector.broadcast %57 : vector<1x128xf32> to vector<8x128xf32>
    %60 = arith.mulf %58, %59 : vector<8x128xf32>
    %cst_12 = arith.constant 1.000000e+00 : f32
    %61 = vector.broadcast %cst_12 : f32 to vector<8x128xf32>
    %62 = arith.addf %60, %61 : vector<8x128xf32>
    %63 = arith.mulf %55, %62 : vector<8x128xf32>
    %64 = vector.extract_strided_slice %5 {offsets = [0, 7], sizes = [8, 1], strides = [1, 1]} : vector<8x128xf32> to vector<8x1xf32>
    %65 = vector.extract_strided_slice %6 {offsets = [7, 0], sizes = [1, 128], strides = [1, 1]} : vector<128x128xf32> to vector<1x128xf32>
    %66 = vector.broadcast %64 : vector<8x1xf32> to vector<8x128xf32>
    %67 = vector.broadcast %65 : vector<1x128xf32> to vector<8x128xf32>
    %68 = arith.mulf %66, %67 : vector<8x128xf32>
    %cst_13 = arith.constant 1.000000e+00 : f32
    %69 = vector.broadcast %cst_13 : f32 to vector<8x128xf32>
    %70 = arith.addf %68, %69 : vector<8x128xf32>
    %71 = arith.mulf %63, %70 : vector<8x128xf32>
    %72 = vector.extract_strided_slice %5 {offsets = [0, 8], sizes = [8, 1], strides = [1, 1]} : vector<8x128xf32> to vector<8x1xf32>
    %73 = vector.extract_strided_slice %6 {offsets = [8, 0], sizes = [1, 128], strides = [1, 1]} : vector<128x128xf32> to vector<1x128xf32>
    %74 = vector.broadcast %72 : vector<8x1xf32> to vector<8x128xf32>
    %75 = vector.broadcast %73 : vector<1x128xf32> to vector<8x128xf32>
    %76 = arith.mulf %74, %75 : vector<8x128xf32>
    %cst_14 = arith.constant 1.000000e+00 : f32
    %77 = vector.broadcast %cst_14 : f32 to vector<8x128xf32>
    %78 = arith.addf %76, %77 : vector<8x128xf32>
    %79 = arith.mulf %71, %78 : vector<8x128xf32>
    %80 = vector.extract_strided_slice %5 {offsets = [0, 9], sizes = [8, 1], strides = [1, 1]} : vector<8x128xf32> to vector<8x1xf32>
    %81 = vector.extract_strided_slice %6 {offsets = [9, 0], sizes = [1, 128], strides = [1, 1]} : vector<128x128xf32> to vector<1x128xf32>
    %82 = vector.broadcast %80 : vector<8x1xf32> to vector<8x128xf32>
    %83 = vector.broadcast %81 : vector<1x128xf32> to vector<8x128xf32>
    %84 = arith.mulf %82, %83 : vector<8x128xf32>
    %cst_15 = arith.constant 1.000000e+00 : f32
    %85 = vector.broadcast %cst_15 : f32 to vector<8x128xf32>
    %86 = arith.addf %84, %85 : vector<8x128xf32>
    %87 = arith.mulf %79, %86 : vector<8x128xf32>
    %88 = vector.extract_strided_slice %5 {offsets = [0, 10], sizes = [8, 1], strides = [1, 1]} : vector<8x128xf32> to vector<8x1xf32>
    %89 = vector.extract_strided_slice %6 {offsets = [10, 0], sizes = [1, 128], strides = [1, 1]} : vector<128x128xf32> to vector<1x128xf32>
    %90 = vector.broadcast %88 : vector<8x1xf32> to vector<8x128xf32>
    %91 = vector.broadcast %89 : vector<1x128xf32> to vector<8x128xf32>
    %92 = arith.mulf %90, %91 : vector<8x128xf32>
    %cst_16 = arith.constant 1.000000e+00 : f32
    %93 = vector.broadcast %cst_16 : f32 to vector<8x128xf32>
    %94 = arith.addf %92, %93 : vector<8x128xf32>
    %95 = arith.mulf %87, %94 : vector<8x128xf32>
    %96 = vector.extract_strided_slice %5 {offsets = [0, 11], sizes = [8, 1], strides = [1, 1]} : vector<8x128xf32> to vector<8x1xf32>
    %97 = vector.extract_strided_slice %6 {offsets = [11, 0], sizes = [1, 128], strides = [1, 1]} : vector<128x128xf32> to vector<1x128xf32>
    %98 = vector.broadcast %96 : vector<8x1xf32> to vector<8x128xf32>
    %99 = vector.broadcast %97 : vector<1x128xf32> to vector<8x128xf32>
    %100 = arith.mulf %98, %99 : vector<8x128xf32>
    %cst_17 = arith.constant 1.000000e+00 : f32
    %101 = vector.broadcast %cst_17 : f32 to vector<8x128xf32>
    %102 = arith.addf %100, %101 : vector<8x128xf32>
    %103 = arith.mulf %95, %102 : vector<8x128xf32>
    %104 = vector.extract_strided_slice %5 {offsets = [0, 12], sizes = [8, 1], strides = [1, 1]} : vector<8x128xf32> to vector<8x1xf32>
    %105 = vector.extract_strided_slice %6 {offsets = [12, 0], sizes = [1, 128], strides = [1, 1]} : vector<128x128xf32> to vector<1x128xf32>
    %106 = vector.broadcast %104 : vector<8x1xf32> to vector<8x128xf32>
    %107 = vector.broadcast %105 : vector<1x128xf32> to vector<8x128xf32>
    %108 = arith.mulf %106, %107 : vector<8x128xf32>
    %cst_18 = arith.constant 1.000000e+00 : f32
    %109 = vector.broadcast %cst_18 : f32 to vector<8x128xf32>
    %110 = arith.addf %108, %109 : vector<8x128xf32>
    %111 = arith.mulf %103, %110 : vector<8x128xf32>
    %112 = vector.extract_strided_slice %5 {offsets = [0, 13], sizes = [8, 1], strides = [1, 1]} : vector<8x128xf32> to vector<8x1xf32>
    %113 = vector.extract_strided_slice %6 {offsets = [13, 0], sizes = [1, 128], strides = [1, 1]} : vector<128x128xf32> to vector<1x128xf32>
    %114 = vector.broadcast %112 : vector<8x1xf32> to vector<8x128xf32>
    %115 = vector.broadcast %113 : vector<1x128xf32> to vector<8x128xf32>
    %116 = arith.mulf %114, %115 : vector<8x128xf32>
    %cst_19 = arith.constant 1.000000e+00 : f32
    %117 = vector.broadcast %cst_19 : f32 to vector<8x128xf32>
    %118 = arith.addf %116, %117 : vector<8x128xf32>
    %119 = arith.mulf %111, %118 : vector<8x128xf32>
    %120 = vector.extract_strided_slice %5 {offsets = [0, 14], sizes = [8, 1], strides = [1, 1]} : vector<8x128xf32> to vector<8x1xf32>
    %121 = vector.extract_strided_slice %6 {offsets = [14, 0], sizes = [1, 128], strides = [1, 1]} : vector<128x128xf32> to vector<1x128xf32>
    %122 = vector.broadcast %120 : vector<8x1xf32> to vector<8x128xf32>
    %123 = vector.broadcast %121 : vector<1x128xf32> to vector<8x128xf32>
    %124 = arith.mulf %122, %123 : vector<8x128xf32>
    %cst_20 = arith.constant 1.000000e+00 : f32
    %125 = vector.broadcast %cst_20 : f32 to vector<8x128xf32>
    %126 = arith.addf %124, %125 : vector<8x128xf32>
    %127 = arith.mulf %119, %126 : vector<8x128xf32>
    %128 = vector.extract_strided_slice %5 {offsets = [0, 15], sizes = [8, 1], strides = [1, 1]} : vector<8x128xf32> to vector<8x1xf32>
    %129 = vector.extract_strided_slice %6 {offsets = [15, 0], sizes = [1, 128], strides = [1, 1]} : vector<128x128xf32> to vector<1x128xf32>
    %130 = vector.broadcast %128 : vector<8x1xf32> to vector<8x128xf32>
    %131 = vector.broadcast %129 : vector<1x128xf32> to vector<8x128xf32>
    %132 = arith.mulf %130, %131 : vector<8x128xf32>
    %cst_21 = arith.constant 1.000000e+00 : f32
    %133 = vector.broadcast %cst_21 : f32 to vector<8x128xf32>
    %134 = arith.addf %132, %133 : vector<8x128xf32>
    %135 = arith.mulf %127, %134 : vector<8x128xf32>
    %136 = vector.extract_strided_slice %5 {offsets = [0, 16], sizes = [8, 1], strides = [1, 1]} : vector<8x128xf32> to vector<8x1xf32>
    %137 = vector.extract_strided_slice %6 {offsets = [16, 0], sizes = [1, 128], strides = [1, 1]} : vector<128x128xf32> to vector<1x128xf32>
    %138 = vector.broadcast %136 : vector<8x1xf32> to vector<8x128xf32>
    %139 = vector.broadcast %137 : vector<1x128xf32> to vector<8x128xf32>
    %140 = arith.mulf %138, %139 : vector<8x128xf32>
    %cst_22 = arith.constant 1.000000e+00 : f32
    %141 = vector.broadcast %cst_22 : f32 to vector<8x128xf32>
    %142 = arith.addf %140, %141 : vector<8x128xf32>
    %143 = arith.mulf %135, %142 : vector<8x128xf32>
    %144 = vector.extract_strided_slice %5 {offsets = [0, 17], sizes = [8, 1], strides = [1, 1]} : vector<8x128xf32> to vector<8x1xf32>
    %145 = vector.extract_strided_slice %6 {offsets = [17, 0], sizes = [1, 128], strides = [1, 1]} : vector<128x128xf32> to vector<1x128xf32>
    %146 = vector.broadcast %144 : vector<8x1xf32> to vector<8x128xf32>
    %147 = vector.broadcast %145 : vector<1x128xf32> to vector<8x128xf32>
    %148 = arith.mulf %146, %147 : vector<8x128xf32>
    %cst_23 = arith.constant 1.000000e+00 : f32
    %149 = vector.broadcast %cst_23 : f32 to vector<8x128xf32>
    %150 = arith.addf %148, %149 : vector<8x128xf32>
    %151 = arith.mulf %143, %150 : vector<8x128xf32>
    %152 = vector.extract_strided_slice %5 {offsets = [0, 18], sizes = [8, 1], strides = [1, 1]} : vector<8x128xf32> to vector<8x1xf32>
    %153 = vector.extract_strided_slice %6 {offsets = [18, 0], sizes = [1, 128], strides = [1, 1]} : vector<128x128xf32> to vector<1x128xf32>
    %154 = vector.broadcast %152 : vector<8x1xf32> to vector<8x128xf32>
    %155 = vector.broadcast %153 : vector<1x128xf32> to vector<8x128xf32>
    %156 = arith.mulf %154, %155 : vector<8x128xf32>
    %cst_24 = arith.constant 1.000000e+00 : f32
    %157 = vector.broadcast %cst_24 : f32 to vector<8x128xf32>
    %158 = arith.addf %156, %157 : vector<8x128xf32>
    %159 = arith.mulf %151, %158 : vector<8x128xf32>
    %160 = vector.extract_strided_slice %5 {offsets = [0, 19], sizes = [8, 1], strides = [1, 1]} : vector<8x128xf32> to vector<8x1xf32>
    %161 = vector.extract_strided_slice %6 {offsets = [19, 0], sizes = [1, 128], strides = [1, 1]} : vector<128x128xf32> to vector<1x128xf32>
    %162 = vector.broadcast %160 : vector<8x1xf32> to vector<8x128xf32>
    %163 = vector.broadcast %161 : vector<1x128xf32> to vector<8x128xf32>
    %164 = arith.mulf %162, %163 : vector<8x128xf32>
    %cst_25 = arith.constant 1.000000e+00 : f32
    %165 = vector.broadcast %cst_25 : f32 to vector<8x128xf32>
    %166 = arith.addf %164, %165 : vector<8x128xf32>
    %167 = arith.mulf %159, %166 : vector<8x128xf32>
    %168 = vector.extract_strided_slice %5 {offsets = [0, 20], sizes = [8, 1], strides = [1, 1]} : vector<8x128xf32> to vector<8x1xf32>
    %169 = vector.extract_strided_slice %6 {offsets = [20, 0], sizes = [1, 128], strides = [1, 1]} : vector<128x128xf32> to vector<1x128xf32>
    %170 = vector.broadcast %168 : vector<8x1xf32> to vector<8x128xf32>
    %171 = vector.broadcast %169 : vector<1x128xf32> to vector<8x128xf32>
    %172 = arith.mulf %170, %171 : vector<8x128xf32>
    %cst_26 = arith.constant 1.000000e+00 : f32
    %173 = vector.broadcast %cst_26 : f32 to vector<8x128xf32>
    %174 = arith.addf %172, %173 : vector<8x128xf32>
    %175 = arith.mulf %167, %174 : vector<8x128xf32>
    %176 = vector.extract_strided_slice %5 {offsets = [0, 21], sizes = [8, 1], strides = [1, 1]} : vector<8x128xf32> to vector<8x1xf32>
    %177 = vector.extract_strided_slice %6 {offsets = [21, 0], sizes = [1, 128], strides = [1, 1]} : vector<128x128xf32> to vector<1x128xf32>
    %178 = vector.broadcast %176 : vector<8x1xf32> to vector<8x128xf32>
    %179 = vector.broadcast %177 : vector<1x128xf32> to vector<8x128xf32>
    %180 = arith.mulf %178, %179 : vector<8x128xf32>
    %cst_27 = arith.constant 1.000000e+00 : f32
    %181 = vector.broadcast %cst_27 : f32 to vector<8x128xf32>
    %182 = arith.addf %180, %181 : vector<8x128xf32>
    %183 = arith.mulf %175, %182 : vector<8x128xf32>
    %184 = vector.extract_strided_slice %5 {offsets = [0, 22], sizes = [8, 1], strides = [1, 1]} : vector<8x128xf32> to vector<8x1xf32>
    %185 = vector.extract_strided_slice %6 {offsets = [22, 0], sizes = [1, 128], strides = [1, 1]} : vector<128x128xf32> to vector<1x128xf32>
    %186 = vector.broadcast %184 : vector<8x1xf32> to vector<8x128xf32>
    %187 = vector.broadcast %185 : vector<1x128xf32> to vector<8x128xf32>
    %188 = arith.mulf %186, %187 : vector<8x128xf32>
    %cst_28 = arith.constant 1.000000e+00 : f32
    %189 = vector.broadcast %cst_28 : f32 to vector<8x128xf32>
    %190 = arith.addf %188, %189 : vector<8x128xf32>
    %191 = arith.mulf %183, %190 : vector<8x128xf32>
    %192 = vector.extract_strided_slice %5 {offsets = [0, 23], sizes = [8, 1], strides = [1, 1]} : vector<8x128xf32> to vector<8x1xf32>
    %193 = vector.extract_strided_slice %6 {offsets = [23, 0], sizes = [1, 128], strides = [1, 1]} : vector<128x128xf32> to vector<1x128xf32>
    %194 = vector.broadcast %192 : vector<8x1xf32> to vector<8x128xf32>
    %195 = vector.broadcast %193 : vector<1x128xf32> to vector<8x128xf32>
    %196 = arith.mulf %194, %195 : vector<8x128xf32>
    %cst_29 = arith.constant 1.000000e+00 : f32
    %197 = vector.broadcast %cst_29 : f32 to vector<8x128xf32>
    %198 = arith.addf %196, %197 : vector<8x128xf32>
    %199 = arith.mulf %191, %198 : vector<8x128xf32>
    %200 = vector.extract_strided_slice %5 {offsets = [0, 24], sizes = [8, 1], strides = [1, 1]} : vector<8x128xf32> to vector<8x1xf32>
    %201 = vector.extract_strided_slice %6 {offsets = [24, 0], sizes = [1, 128], strides = [1, 1]} : vector<128x128xf32> to vector<1x128xf32>
    %202 = vector.broadcast %200 : vector<8x1xf32> to vector<8x128xf32>
    %203 = vector.broadcast %201 : vector<1x128xf32> to vector<8x128xf32>
    %204 = arith.mulf %202, %203 : vector<8x128xf32>
    %cst_30 = arith.constant 1.000000e+00 : f32
    %205 = vector.broadcast %cst_30 : f32 to vector<8x128xf32>
    %206 = arith.addf %204, %205 : vector<8x128xf32>
    %207 = arith.mulf %199, %206 : vector<8x128xf32>
    %208 = vector.extract_strided_slice %5 {offsets = [0, 25], sizes = [8, 1], strides = [1, 1]} : vector<8x128xf32> to vector<8x1xf32>
    %209 = vector.extract_strided_slice %6 {offsets = [25, 0], sizes = [1, 128], strides = [1, 1]} : vector<128x128xf32> to vector<1x128xf32>
    %210 = vector.broadcast %208 : vector<8x1xf32> to vector<8x128xf32>
    %211 = vector.broadcast %209 : vector<1x128xf32> to vector<8x128xf32>
    %212 = arith.mulf %210, %211 : vector<8x128xf32>
    %cst_31 = arith.constant 1.000000e+00 : f32
    %213 = vector.broadcast %cst_31 : f32 to vector<8x128xf32>
    %214 = arith.addf %212, %213 : vector<8x128xf32>
    %215 = arith.mulf %207, %214 : vector<8x128xf32>
    %216 = vector.extract_strided_slice %5 {offsets = [0, 26], sizes = [8, 1], strides = [1, 1]} : vector<8x128xf32> to vector<8x1xf32>
    %217 = vector.extract_strided_slice %6 {offsets = [26, 0], sizes = [1, 128], strides = [1, 1]} : vector<128x128xf32> to vector<1x128xf32>
    %218 = vector.broadcast %216 : vector<8x1xf32> to vector<8x128xf32>
    %219 = vector.broadcast %217 : vector<1x128xf32> to vector<8x128xf32>
    %220 = arith.mulf %218, %219 : vector<8x128xf32>
    %cst_32 = arith.constant 1.000000e+00 : f32
    %221 = vector.broadcast %cst_32 : f32 to vector<8x128xf32>
    %222 = arith.addf %220, %221 : vector<8x128xf32>
    %223 = arith.mulf %215, %222 : vector<8x128xf32>
    %224 = vector.extract_strided_slice %5 {offsets = [0, 27], sizes = [8, 1], strides = [1, 1]} : vector<8x128xf32> to vector<8x1xf32>
    %225 = vector.extract_strided_slice %6 {offsets = [27, 0], sizes = [1, 128], strides = [1, 1]} : vector<128x128xf32> to vector<1x128xf32>
    %226 = vector.broadcast %224 : vector<8x1xf32> to vector<8x128xf32>
    %227 = vector.broadcast %225 : vector<1x128xf32> to vector<8x128xf32>
    %228 = arith.mulf %226, %227 : vector<8x128xf32>
    %cst_33 = arith.constant 1.000000e+00 : f32
    %229 = vector.broadcast %cst_33 : f32 to vector<8x128xf32>
    %230 = arith.addf %228, %229 : vector<8x128xf32>
    %231 = arith.mulf %223, %230 : vector<8x128xf32>
    %232 = vector.extract_strided_slice %5 {offsets = [0, 28], sizes = [8, 1], strides = [1, 1]} : vector<8x128xf32> to vector<8x1xf32>
    %233 = vector.extract_strided_slice %6 {offsets = [28, 0], sizes = [1, 128], strides = [1, 1]} : vector<128x128xf32> to vector<1x128xf32>
    %234 = vector.broadcast %232 : vector<8x1xf32> to vector<8x128xf32>
    %235 = vector.broadcast %233 : vector<1x128xf32> to vector<8x128xf32>
    %236 = arith.mulf %234, %235 : vector<8x128xf32>
    %cst_34 = arith.constant 1.000000e+00 : f32
    %237 = vector.broadcast %cst_34 : f32 to vector<8x128xf32>
    %238 = arith.addf %236, %237 : vector<8x128xf32>
    %239 = arith.mulf %231, %238 : vector<8x128xf32>
    %240 = vector.extract_strided_slice %5 {offsets = [0, 29], sizes = [8, 1], strides = [1, 1]} : vector<8x128xf32> to vector<8x1xf32>
    %241 = vector.extract_strided_slice %6 {offsets = [29, 0], sizes = [1, 128], strides = [1, 1]} : vector<128x128xf32> to vector<1x128xf32>
    %242 = vector.broadcast %240 : vector<8x1xf32> to vector<8x128xf32>
    %243 = vector.broadcast %241 : vector<1x128xf32> to vector<8x128xf32>
    %244 = arith.mulf %242, %243 : vector<8x128xf32>
    %cst_35 = arith.constant 1.000000e+00 : f32
    %245 = vector.broadcast %cst_35 : f32 to vector<8x128xf32>
    %246 = arith.addf %244, %245 : vector<8x128xf32>
    %247 = arith.mulf %239, %246 : vector<8x128xf32>
    %248 = vector.extract_strided_slice %5 {offsets = [0, 30], sizes = [8, 1], strides = [1, 1]} : vector<8x128xf32> to vector<8x1xf32>
    %249 = vector.extract_strided_slice %6 {offsets = [30, 0], sizes = [1, 128], strides = [1, 1]} : vector<128x128xf32> to vector<1x128xf32>
    %250 = vector.broadcast %248 : vector<8x1xf32> to vector<8x128xf32>
    %251 = vector.broadcast %249 : vector<1x128xf32> to vector<8x128xf32>
    %252 = arith.mulf %250, %251 : vector<8x128xf32>
    %cst_36 = arith.constant 1.000000e+00 : f32
    %253 = vector.broadcast %cst_36 : f32 to vector<8x128xf32>
    %254 = arith.addf %252, %253 : vector<8x128xf32>
    %255 = arith.mulf %247, %254 : vector<8x128xf32>
    %256 = vector.extract_strided_slice %5 {offsets = [0, 31], sizes = [8, 1], strides = [1, 1]} : vector<8x128xf32> to vector<8x1xf32>
    %257 = vector.extract_strided_slice %6 {offsets = [31, 0], sizes = [1, 128], strides = [1, 1]} : vector<128x128xf32> to vector<1x128xf32>
    %258 = vector.broadcast %256 : vector<8x1xf32> to vector<8x128xf32>
    %259 = vector.broadcast %257 : vector<1x128xf32> to vector<8x128xf32>
    %260 = arith.mulf %258, %259 : vector<8x128xf32>
    %cst_37 = arith.constant 1.000000e+00 : f32
    %261 = vector.broadcast %cst_37 : f32 to vector<8x128xf32>
    %262 = arith.addf %260, %261 : vector<8x128xf32>
    %263 = arith.mulf %255, %262 : vector<8x128xf32>
    %264 = vector.extract_strided_slice %5 {offsets = [0, 32], sizes = [8, 1], strides = [1, 1]} : vector<8x128xf32> to vector<8x1xf32>
    %265 = vector.extract_strided_slice %6 {offsets = [32, 0], sizes = [1, 128], strides = [1, 1]} : vector<128x128xf32> to vector<1x128xf32>
    %266 = vector.broadcast %264 : vector<8x1xf32> to vector<8x128xf32>
    %267 = vector.broadcast %265 : vector<1x128xf32> to vector<8x128xf32>
    %268 = arith.mulf %266, %267 : vector<8x128xf32>
    %cst_38 = arith.constant 1.000000e+00 : f32
    %269 = vector.broadcast %cst_38 : f32 to vector<8x128xf32>
    %270 = arith.addf %268, %269 : vector<8x128xf32>
    %271 = arith.mulf %263, %270 : vector<8x128xf32>
    %272 = vector.extract_strided_slice %5 {offsets = [0, 33], sizes = [8, 1], strides = [1, 1]} : vector<8x128xf32> to vector<8x1xf32>
    %273 = vector.extract_strided_slice %6 {offsets = [33, 0], sizes = [1, 128], strides = [1, 1]} : vector<128x128xf32> to vector<1x128xf32>
    %274 = vector.broadcast %272 : vector<8x1xf32> to vector<8x128xf32>
    %275 = vector.broadcast %273 : vector<1x128xf32> to vector<8x128xf32>
    %276 = arith.mulf %274, %275 : vector<8x128xf32>
    %cst_39 = arith.constant 1.000000e+00 : f32
    %277 = vector.broadcast %cst_39 : f32 to vector<8x128xf32>
    %278 = arith.addf %276, %277 : vector<8x128xf32>
    %279 = arith.mulf %271, %278 : vector<8x128xf32>
    %280 = vector.extract_strided_slice %5 {offsets = [0, 34], sizes = [8, 1], strides = [1, 1]} : vector<8x128xf32> to vector<8x1xf32>
    %281 = vector.extract_strided_slice %6 {offsets = [34, 0], sizes = [1, 128], strides = [1, 1]} : vector<128x128xf32> to vector<1x128xf32>
    %282 = vector.broadcast %280 : vector<8x1xf32> to vector<8x128xf32>
    %283 = vector.broadcast %281 : vector<1x128xf32> to vector<8x128xf32>
    %284 = arith.mulf %282, %283 : vector<8x128xf32>
    %cst_40 = arith.constant 1.000000e+00 : f32
    %285 = vector.broadcast %cst_40 : f32 to vector<8x128xf32>
    %286 = arith.addf %284, %285 : vector<8x128xf32>
    %287 = arith.mulf %279, %286 : vector<8x128xf32>
    %288 = vector.extract_strided_slice %5 {offsets = [0, 35], sizes = [8, 1], strides = [1, 1]} : vector<8x128xf32> to vector<8x1xf32>
    %289 = vector.extract_strided_slice %6 {offsets = [35, 0], sizes = [1, 128], strides = [1, 1]} : vector<128x128xf32> to vector<1x128xf32>
    %290 = vector.broadcast %288 : vector<8x1xf32> to vector<8x128xf32>
    %291 = vector.broadcast %289 : vector<1x128xf32> to vector<8x128xf32>
    %292 = arith.mulf %290, %291 : vector<8x128xf32>
    %cst_41 = arith.constant 1.000000e+00 : f32
    %293 = vector.broadcast %cst_41 : f32 to vector<8x128xf32>
    %294 = arith.addf %292, %293 : vector<8x128xf32>
    %295 = arith.mulf %287, %294 : vector<8x128xf32>
    %296 = vector.extract_strided_slice %5 {offsets = [0, 36], sizes = [8, 1], strides = [1, 1]} : vector<8x128xf32> to vector<8x1xf32>
    %297 = vector.extract_strided_slice %6 {offsets = [36, 0], sizes = [1, 128], strides = [1, 1]} : vector<128x128xf32> to vector<1x128xf32>
    %298 = vector.broadcast %296 : vector<8x1xf32> to vector<8x128xf32>
    %299 = vector.broadcast %297 : vector<1x128xf32> to vector<8x128xf32>
    %300 = arith.mulf %298, %299 : vector<8x128xf32>
    %cst_42 = arith.constant 1.000000e+00 : f32
    %301 = vector.broadcast %cst_42 : f32 to vector<8x128xf32>
    %302 = arith.addf %300, %301 : vector<8x128xf32>
    %303 = arith.mulf %295, %302 : vector<8x128xf32>
    %304 = vector.extract_strided_slice %5 {offsets = [0, 37], sizes = [8, 1], strides = [1, 1]} : vector<8x128xf32> to vector<8x1xf32>
    %305 = vector.extract_strided_slice %6 {offsets = [37, 0], sizes = [1, 128], strides = [1, 1]} : vector<128x128xf32> to vector<1x128xf32>
    %306 = vector.broadcast %304 : vector<8x1xf32> to vector<8x128xf32>
    %307 = vector.broadcast %305 : vector<1x128xf32> to vector<8x128xf32>
    %308 = arith.mulf %306, %307 : vector<8x128xf32>
    %cst_43 = arith.constant 1.000000e+00 : f32
    %309 = vector.broadcast %cst_43 : f32 to vector<8x128xf32>
    %310 = arith.addf %308, %309 : vector<8x128xf32>
    %311 = arith.mulf %303, %310 : vector<8x128xf32>
    %312 = vector.extract_strided_slice %5 {offsets = [0, 38], sizes = [8, 1], strides = [1, 1]} : vector<8x128xf32> to vector<8x1xf32>
    %313 = vector.extract_strided_slice %6 {offsets = [38, 0], sizes = [1, 128], strides = [1, 1]} : vector<128x128xf32> to vector<1x128xf32>
    %314 = vector.broadcast %312 : vector<8x1xf32> to vector<8x128xf32>
    %315 = vector.broadcast %313 : vector<1x128xf32> to vector<8x128xf32>
    %316 = arith.mulf %314, %315 : vector<8x128xf32>
    %cst_44 = arith.constant 1.000000e+00 : f32
    %317 = vector.broadcast %cst_44 : f32 to vector<8x128xf32>
    %318 = arith.addf %316, %317 : vector<8x128xf32>
    %319 = arith.mulf %311, %318 : vector<8x128xf32>
    %320 = vector.extract_strided_slice %5 {offsets = [0, 39], sizes = [8, 1], strides = [1, 1]} : vector<8x128xf32> to vector<8x1xf32>
    %321 = vector.extract_strided_slice %6 {offsets = [39, 0], sizes = [1, 128], strides = [1, 1]} : vector<128x128xf32> to vector<1x128xf32>
    %322 = vector.broadcast %320 : vector<8x1xf32> to vector<8x128xf32>
    %323 = vector.broadcast %321 : vector<1x128xf32> to vector<8x128xf32>
    %324 = arith.mulf %322, %323 : vector<8x128xf32>
    %cst_45 = arith.constant 1.000000e+00 : f32
    %325 = vector.broadcast %cst_45 : f32 to vector<8x128xf32>
    %326 = arith.addf %324, %325 : vector<8x128xf32>
    %327 = arith.mulf %319, %326 : vector<8x128xf32>
    %328 = vector.extract_strided_slice %5 {offsets = [0, 40], sizes = [8, 1], strides = [1, 1]} : vector<8x128xf32> to vector<8x1xf32>
    %329 = vector.extract_strided_slice %6 {offsets = [40, 0], sizes = [1, 128], strides = [1, 1]} : vector<128x128xf32> to vector<1x128xf32>
    %330 = vector.broadcast %328 : vector<8x1xf32> to vector<8x128xf32>
    %331 = vector.broadcast %329 : vector<1x128xf32> to vector<8x128xf32>
    %332 = arith.mulf %330, %331 : vector<8x128xf32>
    %cst_46 = arith.constant 1.000000e+00 : f32
    %333 = vector.broadcast %cst_46 : f32 to vector<8x128xf32>
    %334 = arith.addf %332, %333 : vector<8x128xf32>
    %335 = arith.mulf %327, %334 : vector<8x128xf32>
    %336 = vector.extract_strided_slice %5 {offsets = [0, 41], sizes = [8, 1], strides = [1, 1]} : vector<8x128xf32> to vector<8x1xf32>
    %337 = vector.extract_strided_slice %6 {offsets = [41, 0], sizes = [1, 128], strides = [1, 1]} : vector<128x128xf32> to vector<1x128xf32>
    %338 = vector.broadcast %336 : vector<8x1xf32> to vector<8x128xf32>
    %339 = vector.broadcast %337 : vector<1x128xf32> to vector<8x128xf32>
    %340 = arith.mulf %338, %339 : vector<8x128xf32>
    %cst_47 = arith.constant 1.000000e+00 : f32
    %341 = vector.broadcast %cst_47 : f32 to vector<8x128xf32>
    %342 = arith.addf %340, %341 : vector<8x128xf32>
    %343 = arith.mulf %335, %342 : vector<8x128xf32>
    %344 = vector.extract_strided_slice %5 {offsets = [0, 42], sizes = [8, 1], strides = [1, 1]} : vector<8x128xf32> to vector<8x1xf32>
    %345 = vector.extract_strided_slice %6 {offsets = [42, 0], sizes = [1, 128], strides = [1, 1]} : vector<128x128xf32> to vector<1x128xf32>
    %346 = vector.broadcast %344 : vector<8x1xf32> to vector<8x128xf32>
    %347 = vector.broadcast %345 : vector<1x128xf32> to vector<8x128xf32>
    %348 = arith.mulf %346, %347 : vector<8x128xf32>
    %cst_48 = arith.constant 1.000000e+00 : f32
    %349 = vector.broadcast %cst_48 : f32 to vector<8x128xf32>
    %350 = arith.addf %348, %349 : vector<8x128xf32>
    %351 = arith.mulf %343, %350 : vector<8x128xf32>
    %352 = vector.extract_strided_slice %5 {offsets = [0, 43], sizes = [8, 1], strides = [1, 1]} : vector<8x128xf32> to vector<8x1xf32>
    %353 = vector.extract_strided_slice %6 {offsets = [43, 0], sizes = [1, 128], strides = [1, 1]} : vector<128x128xf32> to vector<1x128xf32>
    %354 = vector.broadcast %352 : vector<8x1xf32> to vector<8x128xf32>
    %355 = vector.broadcast %353 : vector<1x128xf32> to vector<8x128xf32>
    %356 = arith.mulf %354, %355 : vector<8x128xf32>
    %cst_49 = arith.constant 1.000000e+00 : f32
    %357 = vector.broadcast %cst_49 : f32 to vector<8x128xf32>
    %358 = arith.addf %356, %357 : vector<8x128xf32>
    %359 = arith.mulf %351, %358 : vector<8x128xf32>
    %360 = vector.extract_strided_slice %5 {offsets = [0, 44], sizes = [8, 1], strides = [1, 1]} : vector<8x128xf32> to vector<8x1xf32>
    %361 = vector.extract_strided_slice %6 {offsets = [44, 0], sizes = [1, 128], strides = [1, 1]} : vector<128x128xf32> to vector<1x128xf32>
    %362 = vector.broadcast %360 : vector<8x1xf32> to vector<8x128xf32>
    %363 = vector.broadcast %361 : vector<1x128xf32> to vector<8x128xf32>
    %364 = arith.mulf %362, %363 : vector<8x128xf32>
    %cst_50 = arith.constant 1.000000e+00 : f32
    %365 = vector.broadcast %cst_50 : f32 to vector<8x128xf32>
    %366 = arith.addf %364, %365 : vector<8x128xf32>
    %367 = arith.mulf %359, %366 : vector<8x128xf32>
    %368 = vector.extract_strided_slice %5 {offsets = [0, 45], sizes = [8, 1], strides = [1, 1]} : vector<8x128xf32> to vector<8x1xf32>
    %369 = vector.extract_strided_slice %6 {offsets = [45, 0], sizes = [1, 128], strides = [1, 1]} : vector<128x128xf32> to vector<1x128xf32>
    %370 = vector.broadcast %368 : vector<8x1xf32> to vector<8x128xf32>
    %371 = vector.broadcast %369 : vector<1x128xf32> to vector<8x128xf32>
    %372 = arith.mulf %370, %371 : vector<8x128xf32>
    %cst_51 = arith.constant 1.000000e+00 : f32
    %373 = vector.broadcast %cst_51 : f32 to vector<8x128xf32>
    %374 = arith.addf %372, %373 : vector<8x128xf32>
    %375 = arith.mulf %367, %374 : vector<8x128xf32>
    %376 = vector.extract_strided_slice %5 {offsets = [0, 46], sizes = [8, 1], strides = [1, 1]} : vector<8x128xf32> to vector<8x1xf32>
    %377 = vector.extract_strided_slice %6 {offsets = [46, 0], sizes = [1, 128], strides = [1, 1]} : vector<128x128xf32> to vector<1x128xf32>
    %378 = vector.broadcast %376 : vector<8x1xf32> to vector<8x128xf32>
    %379 = vector.broadcast %377 : vector<1x128xf32> to vector<8x128xf32>
    %380 = arith.mulf %378, %379 : vector<8x128xf32>
    %cst_52 = arith.constant 1.000000e+00 : f32
    %381 = vector.broadcast %cst_52 : f32 to vector<8x128xf32>
    %382 = arith.addf %380, %381 : vector<8x128xf32>
    %383 = arith.mulf %375, %382 : vector<8x128xf32>
    %384 = vector.extract_strided_slice %5 {offsets = [0, 47], sizes = [8, 1], strides = [1, 1]} : vector<8x128xf32> to vector<8x1xf32>
    %385 = vector.extract_strided_slice %6 {offsets = [47, 0], sizes = [1, 128], strides = [1, 1]} : vector<128x128xf32> to vector<1x128xf32>
    %386 = vector.broadcast %384 : vector<8x1xf32> to vector<8x128xf32>
    %387 = vector.broadcast %385 : vector<1x128xf32> to vector<8x128xf32>
    %388 = arith.mulf %386, %387 : vector<8x128xf32>
    %cst_53 = arith.constant 1.000000e+00 : f32
    %389 = vector.broadcast %cst_53 : f32 to vector<8x128xf32>
    %390 = arith.addf %388, %389 : vector<8x128xf32>
    %391 = arith.mulf %383, %390 : vector<8x128xf32>
    %392 = vector.extract_strided_slice %5 {offsets = [0, 48], sizes = [8, 1], strides = [1, 1]} : vector<8x128xf32> to vector<8x1xf32>
    %393 = vector.extract_strided_slice %6 {offsets = [48, 0], sizes = [1, 128], strides = [1, 1]} : vector<128x128xf32> to vector<1x128xf32>
    %394 = vector.broadcast %392 : vector<8x1xf32> to vector<8x128xf32>
    %395 = vector.broadcast %393 : vector<1x128xf32> to vector<8x128xf32>
    %396 = arith.mulf %394, %395 : vector<8x128xf32>
    %cst_54 = arith.constant 1.000000e+00 : f32
    %397 = vector.broadcast %cst_54 : f32 to vector<8x128xf32>
    %398 = arith.addf %396, %397 : vector<8x128xf32>
    %399 = arith.mulf %391, %398 : vector<8x128xf32>
    %400 = vector.extract_strided_slice %5 {offsets = [0, 49], sizes = [8, 1], strides = [1, 1]} : vector<8x128xf32> to vector<8x1xf32>
    %401 = vector.extract_strided_slice %6 {offsets = [49, 0], sizes = [1, 128], strides = [1, 1]} : vector<128x128xf32> to vector<1x128xf32>
    %402 = vector.broadcast %400 : vector<8x1xf32> to vector<8x128xf32>
    %403 = vector.broadcast %401 : vector<1x128xf32> to vector<8x128xf32>
    %404 = arith.mulf %402, %403 : vector<8x128xf32>
    %cst_55 = arith.constant 1.000000e+00 : f32
    %405 = vector.broadcast %cst_55 : f32 to vector<8x128xf32>
    %406 = arith.addf %404, %405 : vector<8x128xf32>
    %407 = arith.mulf %399, %406 : vector<8x128xf32>
    %408 = vector.extract_strided_slice %5 {offsets = [0, 50], sizes = [8, 1], strides = [1, 1]} : vector<8x128xf32> to vector<8x1xf32>
    %409 = vector.extract_strided_slice %6 {offsets = [50, 0], sizes = [1, 128], strides = [1, 1]} : vector<128x128xf32> to vector<1x128xf32>
    %410 = vector.broadcast %408 : vector<8x1xf32> to vector<8x128xf32>
    %411 = vector.broadcast %409 : vector<1x128xf32> to vector<8x128xf32>
    %412 = arith.mulf %410, %411 : vector<8x128xf32>
    %cst_56 = arith.constant 1.000000e+00 : f32
    %413 = vector.broadcast %cst_56 : f32 to vector<8x128xf32>
    %414 = arith.addf %412, %413 : vector<8x128xf32>
    %415 = arith.mulf %407, %414 : vector<8x128xf32>
    %416 = vector.extract_strided_slice %5 {offsets = [0, 51], sizes = [8, 1], strides = [1, 1]} : vector<8x128xf32> to vector<8x1xf32>
    %417 = vector.extract_strided_slice %6 {offsets = [51, 0], sizes = [1, 128], strides = [1, 1]} : vector<128x128xf32> to vector<1x128xf32>
    %418 = vector.broadcast %416 : vector<8x1xf32> to vector<8x128xf32>
    %419 = vector.broadcast %417 : vector<1x128xf32> to vector<8x128xf32>
    %420 = arith.mulf %418, %419 : vector<8x128xf32>
    %cst_57 = arith.constant 1.000000e+00 : f32
    %421 = vector.broadcast %cst_57 : f32 to vector<8x128xf32>
    %422 = arith.addf %420, %421 : vector<8x128xf32>
    %423 = arith.mulf %415, %422 : vector<8x128xf32>
    %424 = vector.extract_strided_slice %5 {offsets = [0, 52], sizes = [8, 1], strides = [1, 1]} : vector<8x128xf32> to vector<8x1xf32>
    %425 = vector.extract_strided_slice %6 {offsets = [52, 0], sizes = [1, 128], strides = [1, 1]} : vector<128x128xf32> to vector<1x128xf32>
    %426 = vector.broadcast %424 : vector<8x1xf32> to vector<8x128xf32>
    %427 = vector.broadcast %425 : vector<1x128xf32> to vector<8x128xf32>
    %428 = arith.mulf %426, %427 : vector<8x128xf32>
    %cst_58 = arith.constant 1.000000e+00 : f32
    %429 = vector.broadcast %cst_58 : f32 to vector<8x128xf32>
    %430 = arith.addf %428, %429 : vector<8x128xf32>
    %431 = arith.mulf %423, %430 : vector<8x128xf32>
    %432 = vector.extract_strided_slice %5 {offsets = [0, 53], sizes = [8, 1], strides = [1, 1]} : vector<8x128xf32> to vector<8x1xf32>
    %433 = vector.extract_strided_slice %6 {offsets = [53, 0], sizes = [1, 128], strides = [1, 1]} : vector<128x128xf32> to vector<1x128xf32>
    %434 = vector.broadcast %432 : vector<8x1xf32> to vector<8x128xf32>
    %435 = vector.broadcast %433 : vector<1x128xf32> to vector<8x128xf32>
    %436 = arith.mulf %434, %435 : vector<8x128xf32>
    %cst_59 = arith.constant 1.000000e+00 : f32
    %437 = vector.broadcast %cst_59 : f32 to vector<8x128xf32>
    %438 = arith.addf %436, %437 : vector<8x128xf32>
    %439 = arith.mulf %431, %438 : vector<8x128xf32>
    %440 = vector.extract_strided_slice %5 {offsets = [0, 54], sizes = [8, 1], strides = [1, 1]} : vector<8x128xf32> to vector<8x1xf32>
    %441 = vector.extract_strided_slice %6 {offsets = [54, 0], sizes = [1, 128], strides = [1, 1]} : vector<128x128xf32> to vector<1x128xf32>
    %442 = vector.broadcast %440 : vector<8x1xf32> to vector<8x128xf32>
    %443 = vector.broadcast %441 : vector<1x128xf32> to vector<8x128xf32>
    %444 = arith.mulf %442, %443 : vector<8x128xf32>
    %cst_60 = arith.constant 1.000000e+00 : f32
    %445 = vector.broadcast %cst_60 : f32 to vector<8x128xf32>
    %446 = arith.addf %444, %445 : vector<8x128xf32>
    %447 = arith.mulf %439, %446 : vector<8x128xf32>
    %448 = vector.extract_strided_slice %5 {offsets = [0, 55], sizes = [8, 1], strides = [1, 1]} : vector<8x128xf32> to vector<8x1xf32>
    %449 = vector.extract_strided_slice %6 {offsets = [55, 0], sizes = [1, 128], strides = [1, 1]} : vector<128x128xf32> to vector<1x128xf32>
    %450 = vector.broadcast %448 : vector<8x1xf32> to vector<8x128xf32>
    %451 = vector.broadcast %449 : vector<1x128xf32> to vector<8x128xf32>
    %452 = arith.mulf %450, %451 : vector<8x128xf32>
    %cst_61 = arith.constant 1.000000e+00 : f32
    %453 = vector.broadcast %cst_61 : f32 to vector<8x128xf32>
    %454 = arith.addf %452, %453 : vector<8x128xf32>
    %455 = arith.mulf %447, %454 : vector<8x128xf32>
    %456 = vector.extract_strided_slice %5 {offsets = [0, 56], sizes = [8, 1], strides = [1, 1]} : vector<8x128xf32> to vector<8x1xf32>
    %457 = vector.extract_strided_slice %6 {offsets = [56, 0], sizes = [1, 128], strides = [1, 1]} : vector<128x128xf32> to vector<1x128xf32>
    %458 = vector.broadcast %456 : vector<8x1xf32> to vector<8x128xf32>
    %459 = vector.broadcast %457 : vector<1x128xf32> to vector<8x128xf32>
    %460 = arith.mulf %458, %459 : vector<8x128xf32>
    %cst_62 = arith.constant 1.000000e+00 : f32
    %461 = vector.broadcast %cst_62 : f32 to vector<8x128xf32>
    %462 = arith.addf %460, %461 : vector<8x128xf32>
    %463 = arith.mulf %455, %462 : vector<8x128xf32>
    %464 = vector.extract_strided_slice %5 {offsets = [0, 57], sizes = [8, 1], strides = [1, 1]} : vector<8x128xf32> to vector<8x1xf32>
    %465 = vector.extract_strided_slice %6 {offsets = [57, 0], sizes = [1, 128], strides = [1, 1]} : vector<128x128xf32> to vector<1x128xf32>
    %466 = vector.broadcast %464 : vector<8x1xf32> to vector<8x128xf32>
    %467 = vector.broadcast %465 : vector<1x128xf32> to vector<8x128xf32>
    %468 = arith.mulf %466, %467 : vector<8x128xf32>
    %cst_63 = arith.constant 1.000000e+00 : f32
    %469 = vector.broadcast %cst_63 : f32 to vector<8x128xf32>
    %470 = arith.addf %468, %469 : vector<8x128xf32>
    %471 = arith.mulf %463, %470 : vector<8x128xf32>
    %472 = vector.extract_strided_slice %5 {offsets = [0, 58], sizes = [8, 1], strides = [1, 1]} : vector<8x128xf32> to vector<8x1xf32>
    %473 = vector.extract_strided_slice %6 {offsets = [58, 0], sizes = [1, 128], strides = [1, 1]} : vector<128x128xf32> to vector<1x128xf32>
    %474 = vector.broadcast %472 : vector<8x1xf32> to vector<8x128xf32>
    %475 = vector.broadcast %473 : vector<1x128xf32> to vector<8x128xf32>
    %476 = arith.mulf %474, %475 : vector<8x128xf32>
    %cst_64 = arith.constant 1.000000e+00 : f32
    %477 = vector.broadcast %cst_64 : f32 to vector<8x128xf32>
    %478 = arith.addf %476, %477 : vector<8x128xf32>
    %479 = arith.mulf %471, %478 : vector<8x128xf32>
    %480 = vector.extract_strided_slice %5 {offsets = [0, 59], sizes = [8, 1], strides = [1, 1]} : vector<8x128xf32> to vector<8x1xf32>
    %481 = vector.extract_strided_slice %6 {offsets = [59, 0], sizes = [1, 128], strides = [1, 1]} : vector<128x128xf32> to vector<1x128xf32>
    %482 = vector.broadcast %480 : vector<8x1xf32> to vector<8x128xf32>
    %483 = vector.broadcast %481 : vector<1x128xf32> to vector<8x128xf32>
    %484 = arith.mulf %482, %483 : vector<8x128xf32>
    %cst_65 = arith.constant 1.000000e+00 : f32
    %485 = vector.broadcast %cst_65 : f32 to vector<8x128xf32>
    %486 = arith.addf %484, %485 : vector<8x128xf32>
    %487 = arith.mulf %479, %486 : vector<8x128xf32>
    %488 = vector.extract_strided_slice %5 {offsets = [0, 60], sizes = [8, 1], strides = [1, 1]} : vector<8x128xf32> to vector<8x1xf32>
    %489 = vector.extract_strided_slice %6 {offsets = [60, 0], sizes = [1, 128], strides = [1, 1]} : vector<128x128xf32> to vector<1x128xf32>
    %490 = vector.broadcast %488 : vector<8x1xf32> to vector<8x128xf32>
    %491 = vector.broadcast %489 : vector<1x128xf32> to vector<8x128xf32>
    %492 = arith.mulf %490, %491 : vector<8x128xf32>
    %cst_66 = arith.constant 1.000000e+00 : f32
    %493 = vector.broadcast %cst_66 : f32 to vector<8x128xf32>
    %494 = arith.addf %492, %493 : vector<8x128xf32>
    %495 = arith.mulf %487, %494 : vector<8x128xf32>
    %496 = vector.extract_strided_slice %5 {offsets = [0, 61], sizes = [8, 1], strides = [1, 1]} : vector<8x128xf32> to vector<8x1xf32>
    %497 = vector.extract_strided_slice %6 {offsets = [61, 0], sizes = [1, 128], strides = [1, 1]} : vector<128x128xf32> to vector<1x128xf32>
    %498 = vector.broadcast %496 : vector<8x1xf32> to vector<8x128xf32>
    %499 = vector.broadcast %497 : vector<1x128xf32> to vector<8x128xf32>
    %500 = arith.mulf %498, %499 : vector<8x128xf32>
    %cst_67 = arith.constant 1.000000e+00 : f32
    %501 = vector.broadcast %cst_67 : f32 to vector<8x128xf32>
    %502 = arith.addf %500, %501 : vector<8x128xf32>
    %503 = arith.mulf %495, %502 : vector<8x128xf32>
    %504 = vector.extract_strided_slice %5 {offsets = [0, 62], sizes = [8, 1], strides = [1, 1]} : vector<8x128xf32> to vector<8x1xf32>
    %505 = vector.extract_strided_slice %6 {offsets = [62, 0], sizes = [1, 128], strides = [1, 1]} : vector<128x128xf32> to vector<1x128xf32>
    %506 = vector.broadcast %504 : vector<8x1xf32> to vector<8x128xf32>
    %507 = vector.broadcast %505 : vector<1x128xf32> to vector<8x128xf32>
    %508 = arith.mulf %506, %507 : vector<8x128xf32>
    %cst_68 = arith.constant 1.000000e+00 : f32
    %509 = vector.broadcast %cst_68 : f32 to vector<8x128xf32>
    %510 = arith.addf %508, %509 : vector<8x128xf32>
    %511 = arith.mulf %503, %510 : vector<8x128xf32>
    %512 = vector.extract_strided_slice %5 {offsets = [0, 63], sizes = [8, 1], strides = [1, 1]} : vector<8x128xf32> to vector<8x1xf32>
    %513 = vector.extract_strided_slice %6 {offsets = [63, 0], sizes = [1, 128], strides = [1, 1]} : vector<128x128xf32> to vector<1x128xf32>
    %514 = vector.broadcast %512 : vector<8x1xf32> to vector<8x128xf32>
    %515 = vector.broadcast %513 : vector<1x128xf32> to vector<8x128xf32>
    %516 = arith.mulf %514, %515 : vector<8x128xf32>
    %cst_69 = arith.constant 1.000000e+00 : f32
    %517 = vector.broadcast %cst_69 : f32 to vector<8x128xf32>
    %518 = arith.addf %516, %517 : vector<8x128xf32>
    %519 = arith.mulf %511, %518 : vector<8x128xf32>
    %520 = vector.extract_strided_slice %5 {offsets = [0, 64], sizes = [8, 1], strides = [1, 1]} : vector<8x128xf32> to vector<8x1xf32>
    %521 = vector.extract_strided_slice %6 {offsets = [64, 0], sizes = [1, 128], strides = [1, 1]} : vector<128x128xf32> to vector<1x128xf32>
    %522 = vector.broadcast %520 : vector<8x1xf32> to vector<8x128xf32>
    %523 = vector.broadcast %521 : vector<1x128xf32> to vector<8x128xf32>
    %524 = arith.mulf %522, %523 : vector<8x128xf32>
    %cst_70 = arith.constant 1.000000e+00 : f32
    %525 = vector.broadcast %cst_70 : f32 to vector<8x128xf32>
    %526 = arith.addf %524, %525 : vector<8x128xf32>
    %527 = arith.mulf %519, %526 : vector<8x128xf32>
    %528 = vector.extract_strided_slice %5 {offsets = [0, 65], sizes = [8, 1], strides = [1, 1]} : vector<8x128xf32> to vector<8x1xf32>
    %529 = vector.extract_strided_slice %6 {offsets = [65, 0], sizes = [1, 128], strides = [1, 1]} : vector<128x128xf32> to vector<1x128xf32>
    %530 = vector.broadcast %528 : vector<8x1xf32> to vector<8x128xf32>
    %531 = vector.broadcast %529 : vector<1x128xf32> to vector<8x128xf32>
    %532 = arith.mulf %530, %531 : vector<8x128xf32>
    %cst_71 = arith.constant 1.000000e+00 : f32
    %533 = vector.broadcast %cst_71 : f32 to vector<8x128xf32>
    %534 = arith.addf %532, %533 : vector<8x128xf32>
    %535 = arith.mulf %527, %534 : vector<8x128xf32>
    %536 = vector.extract_strided_slice %5 {offsets = [0, 66], sizes = [8, 1], strides = [1, 1]} : vector<8x128xf32> to vector<8x1xf32>
    %537 = vector.extract_strided_slice %6 {offsets = [66, 0], sizes = [1, 128], strides = [1, 1]} : vector<128x128xf32> to vector<1x128xf32>
    %538 = vector.broadcast %536 : vector<8x1xf32> to vector<8x128xf32>
    %539 = vector.broadcast %537 : vector<1x128xf32> to vector<8x128xf32>
    %540 = arith.mulf %538, %539 : vector<8x128xf32>
    %cst_72 = arith.constant 1.000000e+00 : f32
    %541 = vector.broadcast %cst_72 : f32 to vector<8x128xf32>
    %542 = arith.addf %540, %541 : vector<8x128xf32>
    %543 = arith.mulf %535, %542 : vector<8x128xf32>
    %544 = vector.extract_strided_slice %5 {offsets = [0, 67], sizes = [8, 1], strides = [1, 1]} : vector<8x128xf32> to vector<8x1xf32>
    %545 = vector.extract_strided_slice %6 {offsets = [67, 0], sizes = [1, 128], strides = [1, 1]} : vector<128x128xf32> to vector<1x128xf32>
    %546 = vector.broadcast %544 : vector<8x1xf32> to vector<8x128xf32>
    %547 = vector.broadcast %545 : vector<1x128xf32> to vector<8x128xf32>
    %548 = arith.mulf %546, %547 : vector<8x128xf32>
    %cst_73 = arith.constant 1.000000e+00 : f32
    %549 = vector.broadcast %cst_73 : f32 to vector<8x128xf32>
    %550 = arith.addf %548, %549 : vector<8x128xf32>
    %551 = arith.mulf %543, %550 : vector<8x128xf32>
    %552 = vector.extract_strided_slice %5 {offsets = [0, 68], sizes = [8, 1], strides = [1, 1]} : vector<8x128xf32> to vector<8x1xf32>
    %553 = vector.extract_strided_slice %6 {offsets = [68, 0], sizes = [1, 128], strides = [1, 1]} : vector<128x128xf32> to vector<1x128xf32>
    %554 = vector.broadcast %552 : vector<8x1xf32> to vector<8x128xf32>
    %555 = vector.broadcast %553 : vector<1x128xf32> to vector<8x128xf32>
    %556 = arith.mulf %554, %555 : vector<8x128xf32>
    %cst_74 = arith.constant 1.000000e+00 : f32
    %557 = vector.broadcast %cst_74 : f32 to vector<8x128xf32>
    %558 = arith.addf %556, %557 : vector<8x128xf32>
    %559 = arith.mulf %551, %558 : vector<8x128xf32>
    %560 = vector.extract_strided_slice %5 {offsets = [0, 69], sizes = [8, 1], strides = [1, 1]} : vector<8x128xf32> to vector<8x1xf32>
    %561 = vector.extract_strided_slice %6 {offsets = [69, 0], sizes = [1, 128], strides = [1, 1]} : vector<128x128xf32> to vector<1x128xf32>
    %562 = vector.broadcast %560 : vector<8x1xf32> to vector<8x128xf32>
    %563 = vector.broadcast %561 : vector<1x128xf32> to vector<8x128xf32>
    %564 = arith.mulf %562, %563 : vector<8x128xf32>
    %cst_75 = arith.constant 1.000000e+00 : f32
    %565 = vector.broadcast %cst_75 : f32 to vector<8x128xf32>
    %566 = arith.addf %564, %565 : vector<8x128xf32>
    %567 = arith.mulf %559, %566 : vector<8x128xf32>
    %568 = vector.extract_strided_slice %5 {offsets = [0, 70], sizes = [8, 1], strides = [1, 1]} : vector<8x128xf32> to vector<8x1xf32>
    %569 = vector.extract_strided_slice %6 {offsets = [70, 0], sizes = [1, 128], strides = [1, 1]} : vector<128x128xf32> to vector<1x128xf32>
    %570 = vector.broadcast %568 : vector<8x1xf32> to vector<8x128xf32>
    %571 = vector.broadcast %569 : vector<1x128xf32> to vector<8x128xf32>
    %572 = arith.mulf %570, %571 : vector<8x128xf32>
    %cst_76 = arith.constant 1.000000e+00 : f32
    %573 = vector.broadcast %cst_76 : f32 to vector<8x128xf32>
    %574 = arith.addf %572, %573 : vector<8x128xf32>
    %575 = arith.mulf %567, %574 : vector<8x128xf32>
    %576 = vector.extract_strided_slice %5 {offsets = [0, 71], sizes = [8, 1], strides = [1, 1]} : vector<8x128xf32> to vector<8x1xf32>
    %577 = vector.extract_strided_slice %6 {offsets = [71, 0], sizes = [1, 128], strides = [1, 1]} : vector<128x128xf32> to vector<1x128xf32>
    %578 = vector.broadcast %576 : vector<8x1xf32> to vector<8x128xf32>
    %579 = vector.broadcast %577 : vector<1x128xf32> to vector<8x128xf32>
    %580 = arith.mulf %578, %579 : vector<8x128xf32>
    %cst_77 = arith.constant 1.000000e+00 : f32
    %581 = vector.broadcast %cst_77 : f32 to vector<8x128xf32>
    %582 = arith.addf %580, %581 : vector<8x128xf32>
    %583 = arith.mulf %575, %582 : vector<8x128xf32>
    %584 = vector.extract_strided_slice %5 {offsets = [0, 72], sizes = [8, 1], strides = [1, 1]} : vector<8x128xf32> to vector<8x1xf32>
    %585 = vector.extract_strided_slice %6 {offsets = [72, 0], sizes = [1, 128], strides = [1, 1]} : vector<128x128xf32> to vector<1x128xf32>
    %586 = vector.broadcast %584 : vector<8x1xf32> to vector<8x128xf32>
    %587 = vector.broadcast %585 : vector<1x128xf32> to vector<8x128xf32>
    %588 = arith.mulf %586, %587 : vector<8x128xf32>
    %cst_78 = arith.constant 1.000000e+00 : f32
    %589 = vector.broadcast %cst_78 : f32 to vector<8x128xf32>
    %590 = arith.addf %588, %589 : vector<8x128xf32>
    %591 = arith.mulf %583, %590 : vector<8x128xf32>
    %592 = vector.extract_strided_slice %5 {offsets = [0, 73], sizes = [8, 1], strides = [1, 1]} : vector<8x128xf32> to vector<8x1xf32>
    %593 = vector.extract_strided_slice %6 {offsets = [73, 0], sizes = [1, 128], strides = [1, 1]} : vector<128x128xf32> to vector<1x128xf32>
    %594 = vector.broadcast %592 : vector<8x1xf32> to vector<8x128xf32>
    %595 = vector.broadcast %593 : vector<1x128xf32> to vector<8x128xf32>
    %596 = arith.mulf %594, %595 : vector<8x128xf32>
    %cst_79 = arith.constant 1.000000e+00 : f32
    %597 = vector.broadcast %cst_79 : f32 to vector<8x128xf32>
    %598 = arith.addf %596, %597 : vector<8x128xf32>
    %599 = arith.mulf %591, %598 : vector<8x128xf32>
    %600 = vector.extract_strided_slice %5 {offsets = [0, 74], sizes = [8, 1], strides = [1, 1]} : vector<8x128xf32> to vector<8x1xf32>
    %601 = vector.extract_strided_slice %6 {offsets = [74, 0], sizes = [1, 128], strides = [1, 1]} : vector<128x128xf32> to vector<1x128xf32>
    %602 = vector.broadcast %600 : vector<8x1xf32> to vector<8x128xf32>
    %603 = vector.broadcast %601 : vector<1x128xf32> to vector<8x128xf32>
    %604 = arith.mulf %602, %603 : vector<8x128xf32>
    %cst_80 = arith.constant 1.000000e+00 : f32
    %605 = vector.broadcast %cst_80 : f32 to vector<8x128xf32>
    %606 = arith.addf %604, %605 : vector<8x128xf32>
    %607 = arith.mulf %599, %606 : vector<8x128xf32>
    %608 = vector.extract_strided_slice %5 {offsets = [0, 75], sizes = [8, 1], strides = [1, 1]} : vector<8x128xf32> to vector<8x1xf32>
    %609 = vector.extract_strided_slice %6 {offsets = [75, 0], sizes = [1, 128], strides = [1, 1]} : vector<128x128xf32> to vector<1x128xf32>
    %610 = vector.broadcast %608 : vector<8x1xf32> to vector<8x128xf32>
    %611 = vector.broadcast %609 : vector<1x128xf32> to vector<8x128xf32>
    %612 = arith.mulf %610, %611 : vector<8x128xf32>
    %cst_81 = arith.constant 1.000000e+00 : f32
    %613 = vector.broadcast %cst_81 : f32 to vector<8x128xf32>
    %614 = arith.addf %612, %613 : vector<8x128xf32>
    %615 = arith.mulf %607, %614 : vector<8x128xf32>
    %616 = vector.extract_strided_slice %5 {offsets = [0, 76], sizes = [8, 1], strides = [1, 1]} : vector<8x128xf32> to vector<8x1xf32>
    %617 = vector.extract_strided_slice %6 {offsets = [76, 0], sizes = [1, 128], strides = [1, 1]} : vector<128x128xf32> to vector<1x128xf32>
    %618 = vector.broadcast %616 : vector<8x1xf32> to vector<8x128xf32>
    %619 = vector.broadcast %617 : vector<1x128xf32> to vector<8x128xf32>
    %620 = arith.mulf %618, %619 : vector<8x128xf32>
    %cst_82 = arith.constant 1.000000e+00 : f32
    %621 = vector.broadcast %cst_82 : f32 to vector<8x128xf32>
    %622 = arith.addf %620, %621 : vector<8x128xf32>
    %623 = arith.mulf %615, %622 : vector<8x128xf32>
    %624 = vector.extract_strided_slice %5 {offsets = [0, 77], sizes = [8, 1], strides = [1, 1]} : vector<8x128xf32> to vector<8x1xf32>
    %625 = vector.extract_strided_slice %6 {offsets = [77, 0], sizes = [1, 128], strides = [1, 1]} : vector<128x128xf32> to vector<1x128xf32>
    %626 = vector.broadcast %624 : vector<8x1xf32> to vector<8x128xf32>
    %627 = vector.broadcast %625 : vector<1x128xf32> to vector<8x128xf32>
    %628 = arith.mulf %626, %627 : vector<8x128xf32>
    %cst_83 = arith.constant 1.000000e+00 : f32
    %629 = vector.broadcast %cst_83 : f32 to vector<8x128xf32>
    %630 = arith.addf %628, %629 : vector<8x128xf32>
    %631 = arith.mulf %623, %630 : vector<8x128xf32>
    %632 = vector.extract_strided_slice %5 {offsets = [0, 78], sizes = [8, 1], strides = [1, 1]} : vector<8x128xf32> to vector<8x1xf32>
    %633 = vector.extract_strided_slice %6 {offsets = [78, 0], sizes = [1, 128], strides = [1, 1]} : vector<128x128xf32> to vector<1x128xf32>
    %634 = vector.broadcast %632 : vector<8x1xf32> to vector<8x128xf32>
    %635 = vector.broadcast %633 : vector<1x128xf32> to vector<8x128xf32>
    %636 = arith.mulf %634, %635 : vector<8x128xf32>
    %cst_84 = arith.constant 1.000000e+00 : f32
    %637 = vector.broadcast %cst_84 : f32 to vector<8x128xf32>
    %638 = arith.addf %636, %637 : vector<8x128xf32>
    %639 = arith.mulf %631, %638 : vector<8x128xf32>
    %640 = vector.extract_strided_slice %5 {offsets = [0, 79], sizes = [8, 1], strides = [1, 1]} : vector<8x128xf32> to vector<8x1xf32>
    %641 = vector.extract_strided_slice %6 {offsets = [79, 0], sizes = [1, 128], strides = [1, 1]} : vector<128x128xf32> to vector<1x128xf32>
    %642 = vector.broadcast %640 : vector<8x1xf32> to vector<8x128xf32>
    %643 = vector.broadcast %641 : vector<1x128xf32> to vector<8x128xf32>
    %644 = arith.mulf %642, %643 : vector<8x128xf32>
    %cst_85 = arith.constant 1.000000e+00 : f32
    %645 = vector.broadcast %cst_85 : f32 to vector<8x128xf32>
    %646 = arith.addf %644, %645 : vector<8x128xf32>
    %647 = arith.mulf %639, %646 : vector<8x128xf32>
    %648 = vector.extract_strided_slice %5 {offsets = [0, 80], sizes = [8, 1], strides = [1, 1]} : vector<8x128xf32> to vector<8x1xf32>
    %649 = vector.extract_strided_slice %6 {offsets = [80, 0], sizes = [1, 128], strides = [1, 1]} : vector<128x128xf32> to vector<1x128xf32>
    %650 = vector.broadcast %648 : vector<8x1xf32> to vector<8x128xf32>
    %651 = vector.broadcast %649 : vector<1x128xf32> to vector<8x128xf32>
    %652 = arith.mulf %650, %651 : vector<8x128xf32>
    %cst_86 = arith.constant 1.000000e+00 : f32
    %653 = vector.broadcast %cst_86 : f32 to vector<8x128xf32>
    %654 = arith.addf %652, %653 : vector<8x128xf32>
    %655 = arith.mulf %647, %654 : vector<8x128xf32>
    %656 = vector.extract_strided_slice %5 {offsets = [0, 81], sizes = [8, 1], strides = [1, 1]} : vector<8x128xf32> to vector<8x1xf32>
    %657 = vector.extract_strided_slice %6 {offsets = [81, 0], sizes = [1, 128], strides = [1, 1]} : vector<128x128xf32> to vector<1x128xf32>
    %658 = vector.broadcast %656 : vector<8x1xf32> to vector<8x128xf32>
    %659 = vector.broadcast %657 : vector<1x128xf32> to vector<8x128xf32>
    %660 = arith.mulf %658, %659 : vector<8x128xf32>
    %cst_87 = arith.constant 1.000000e+00 : f32
    %661 = vector.broadcast %cst_87 : f32 to vector<8x128xf32>
    %662 = arith.addf %660, %661 : vector<8x128xf32>
    %663 = arith.mulf %655, %662 : vector<8x128xf32>
    %664 = vector.extract_strided_slice %5 {offsets = [0, 82], sizes = [8, 1], strides = [1, 1]} : vector<8x128xf32> to vector<8x1xf32>
    %665 = vector.extract_strided_slice %6 {offsets = [82, 0], sizes = [1, 128], strides = [1, 1]} : vector<128x128xf32> to vector<1x128xf32>
    %666 = vector.broadcast %664 : vector<8x1xf32> to vector<8x128xf32>
    %667 = vector.broadcast %665 : vector<1x128xf32> to vector<8x128xf32>
    %668 = arith.mulf %666, %667 : vector<8x128xf32>
    %cst_88 = arith.constant 1.000000e+00 : f32
    %669 = vector.broadcast %cst_88 : f32 to vector<8x128xf32>
    %670 = arith.addf %668, %669 : vector<8x128xf32>
    %671 = arith.mulf %663, %670 : vector<8x128xf32>
    %672 = vector.extract_strided_slice %5 {offsets = [0, 83], sizes = [8, 1], strides = [1, 1]} : vector<8x128xf32> to vector<8x1xf32>
    %673 = vector.extract_strided_slice %6 {offsets = [83, 0], sizes = [1, 128], strides = [1, 1]} : vector<128x128xf32> to vector<1x128xf32>
    %674 = vector.broadcast %672 : vector<8x1xf32> to vector<8x128xf32>
    %675 = vector.broadcast %673 : vector<1x128xf32> to vector<8x128xf32>
    %676 = arith.mulf %674, %675 : vector<8x128xf32>
    %cst_89 = arith.constant 1.000000e+00 : f32
    %677 = vector.broadcast %cst_89 : f32 to vector<8x128xf32>
    %678 = arith.addf %676, %677 : vector<8x128xf32>
    %679 = arith.mulf %671, %678 : vector<8x128xf32>
    %680 = vector.extract_strided_slice %5 {offsets = [0, 84], sizes = [8, 1], strides = [1, 1]} : vector<8x128xf32> to vector<8x1xf32>
    %681 = vector.extract_strided_slice %6 {offsets = [84, 0], sizes = [1, 128], strides = [1, 1]} : vector<128x128xf32> to vector<1x128xf32>
    %682 = vector.broadcast %680 : vector<8x1xf32> to vector<8x128xf32>
    %683 = vector.broadcast %681 : vector<1x128xf32> to vector<8x128xf32>
    %684 = arith.mulf %682, %683 : vector<8x128xf32>
    %cst_90 = arith.constant 1.000000e+00 : f32
    %685 = vector.broadcast %cst_90 : f32 to vector<8x128xf32>
    %686 = arith.addf %684, %685 : vector<8x128xf32>
    %687 = arith.mulf %679, %686 : vector<8x128xf32>
    %688 = vector.extract_strided_slice %5 {offsets = [0, 85], sizes = [8, 1], strides = [1, 1]} : vector<8x128xf32> to vector<8x1xf32>
    %689 = vector.extract_strided_slice %6 {offsets = [85, 0], sizes = [1, 128], strides = [1, 1]} : vector<128x128xf32> to vector<1x128xf32>
    %690 = vector.broadcast %688 : vector<8x1xf32> to vector<8x128xf32>
    %691 = vector.broadcast %689 : vector<1x128xf32> to vector<8x128xf32>
    %692 = arith.mulf %690, %691 : vector<8x128xf32>
    %cst_91 = arith.constant 1.000000e+00 : f32
    %693 = vector.broadcast %cst_91 : f32 to vector<8x128xf32>
    %694 = arith.addf %692, %693 : vector<8x128xf32>
    %695 = arith.mulf %687, %694 : vector<8x128xf32>
    %696 = vector.extract_strided_slice %5 {offsets = [0, 86], sizes = [8, 1], strides = [1, 1]} : vector<8x128xf32> to vector<8x1xf32>
    %697 = vector.extract_strided_slice %6 {offsets = [86, 0], sizes = [1, 128], strides = [1, 1]} : vector<128x128xf32> to vector<1x128xf32>
    %698 = vector.broadcast %696 : vector<8x1xf32> to vector<8x128xf32>
    %699 = vector.broadcast %697 : vector<1x128xf32> to vector<8x128xf32>
    %700 = arith.mulf %698, %699 : vector<8x128xf32>
    %cst_92 = arith.constant 1.000000e+00 : f32
    %701 = vector.broadcast %cst_92 : f32 to vector<8x128xf32>
    %702 = arith.addf %700, %701 : vector<8x128xf32>
    %703 = arith.mulf %695, %702 : vector<8x128xf32>
    %704 = vector.extract_strided_slice %5 {offsets = [0, 87], sizes = [8, 1], strides = [1, 1]} : vector<8x128xf32> to vector<8x1xf32>
    %705 = vector.extract_strided_slice %6 {offsets = [87, 0], sizes = [1, 128], strides = [1, 1]} : vector<128x128xf32> to vector<1x128xf32>
    %706 = vector.broadcast %704 : vector<8x1xf32> to vector<8x128xf32>
    %707 = vector.broadcast %705 : vector<1x128xf32> to vector<8x128xf32>
    %708 = arith.mulf %706, %707 : vector<8x128xf32>
    %cst_93 = arith.constant 1.000000e+00 : f32
    %709 = vector.broadcast %cst_93 : f32 to vector<8x128xf32>
    %710 = arith.addf %708, %709 : vector<8x128xf32>
    %711 = arith.mulf %703, %710 : vector<8x128xf32>
    %712 = vector.extract_strided_slice %5 {offsets = [0, 88], sizes = [8, 1], strides = [1, 1]} : vector<8x128xf32> to vector<8x1xf32>
    %713 = vector.extract_strided_slice %6 {offsets = [88, 0], sizes = [1, 128], strides = [1, 1]} : vector<128x128xf32> to vector<1x128xf32>
    %714 = vector.broadcast %712 : vector<8x1xf32> to vector<8x128xf32>
    %715 = vector.broadcast %713 : vector<1x128xf32> to vector<8x128xf32>
    %716 = arith.mulf %714, %715 : vector<8x128xf32>
    %cst_94 = arith.constant 1.000000e+00 : f32
    %717 = vector.broadcast %cst_94 : f32 to vector<8x128xf32>
    %718 = arith.addf %716, %717 : vector<8x128xf32>
    %719 = arith.mulf %711, %718 : vector<8x128xf32>
    %720 = vector.extract_strided_slice %5 {offsets = [0, 89], sizes = [8, 1], strides = [1, 1]} : vector<8x128xf32> to vector<8x1xf32>
    %721 = vector.extract_strided_slice %6 {offsets = [89, 0], sizes = [1, 128], strides = [1, 1]} : vector<128x128xf32> to vector<1x128xf32>
    %722 = vector.broadcast %720 : vector<8x1xf32> to vector<8x128xf32>
    %723 = vector.broadcast %721 : vector<1x128xf32> to vector<8x128xf32>
    %724 = arith.mulf %722, %723 : vector<8x128xf32>
    %cst_95 = arith.constant 1.000000e+00 : f32
    %725 = vector.broadcast %cst_95 : f32 to vector<8x128xf32>
    %726 = arith.addf %724, %725 : vector<8x128xf32>
    %727 = arith.mulf %719, %726 : vector<8x128xf32>
    %728 = vector.extract_strided_slice %5 {offsets = [0, 90], sizes = [8, 1], strides = [1, 1]} : vector<8x128xf32> to vector<8x1xf32>
    %729 = vector.extract_strided_slice %6 {offsets = [90, 0], sizes = [1, 128], strides = [1, 1]} : vector<128x128xf32> to vector<1x128xf32>
    %730 = vector.broadcast %728 : vector<8x1xf32> to vector<8x128xf32>
    %731 = vector.broadcast %729 : vector<1x128xf32> to vector<8x128xf32>
    %732 = arith.mulf %730, %731 : vector<8x128xf32>
    %cst_96 = arith.constant 1.000000e+00 : f32
    %733 = vector.broadcast %cst_96 : f32 to vector<8x128xf32>
    %734 = arith.addf %732, %733 : vector<8x128xf32>
    %735 = arith.mulf %727, %734 : vector<8x128xf32>
    %736 = vector.extract_strided_slice %5 {offsets = [0, 91], sizes = [8, 1], strides = [1, 1]} : vector<8x128xf32> to vector<8x1xf32>
    %737 = vector.extract_strided_slice %6 {offsets = [91, 0], sizes = [1, 128], strides = [1, 1]} : vector<128x128xf32> to vector<1x128xf32>
    %738 = vector.broadcast %736 : vector<8x1xf32> to vector<8x128xf32>
    %739 = vector.broadcast %737 : vector<1x128xf32> to vector<8x128xf32>
    %740 = arith.mulf %738, %739 : vector<8x128xf32>
    %cst_97 = arith.constant 1.000000e+00 : f32
    %741 = vector.broadcast %cst_97 : f32 to vector<8x128xf32>
    %742 = arith.addf %740, %741 : vector<8x128xf32>
    %743 = arith.mulf %735, %742 : vector<8x128xf32>
    %744 = vector.extract_strided_slice %5 {offsets = [0, 92], sizes = [8, 1], strides = [1, 1]} : vector<8x128xf32> to vector<8x1xf32>
    %745 = vector.extract_strided_slice %6 {offsets = [92, 0], sizes = [1, 128], strides = [1, 1]} : vector<128x128xf32> to vector<1x128xf32>
    %746 = vector.broadcast %744 : vector<8x1xf32> to vector<8x128xf32>
    %747 = vector.broadcast %745 : vector<1x128xf32> to vector<8x128xf32>
    %748 = arith.mulf %746, %747 : vector<8x128xf32>
    %cst_98 = arith.constant 1.000000e+00 : f32
    %749 = vector.broadcast %cst_98 : f32 to vector<8x128xf32>
    %750 = arith.addf %748, %749 : vector<8x128xf32>
    %751 = arith.mulf %743, %750 : vector<8x128xf32>
    %752 = vector.extract_strided_slice %5 {offsets = [0, 93], sizes = [8, 1], strides = [1, 1]} : vector<8x128xf32> to vector<8x1xf32>
    %753 = vector.extract_strided_slice %6 {offsets = [93, 0], sizes = [1, 128], strides = [1, 1]} : vector<128x128xf32> to vector<1x128xf32>
    %754 = vector.broadcast %752 : vector<8x1xf32> to vector<8x128xf32>
    %755 = vector.broadcast %753 : vector<1x128xf32> to vector<8x128xf32>
    %756 = arith.mulf %754, %755 : vector<8x128xf32>
    %cst_99 = arith.constant 1.000000e+00 : f32
    %757 = vector.broadcast %cst_99 : f32 to vector<8x128xf32>
    %758 = arith.addf %756, %757 : vector<8x128xf32>
    %759 = arith.mulf %751, %758 : vector<8x128xf32>
    %760 = vector.extract_strided_slice %5 {offsets = [0, 94], sizes = [8, 1], strides = [1, 1]} : vector<8x128xf32> to vector<8x1xf32>
    %761 = vector.extract_strided_slice %6 {offsets = [94, 0], sizes = [1, 128], strides = [1, 1]} : vector<128x128xf32> to vector<1x128xf32>
    %762 = vector.broadcast %760 : vector<8x1xf32> to vector<8x128xf32>
    %763 = vector.broadcast %761 : vector<1x128xf32> to vector<8x128xf32>
    %764 = arith.mulf %762, %763 : vector<8x128xf32>
    %cst_100 = arith.constant 1.000000e+00 : f32
    %765 = vector.broadcast %cst_100 : f32 to vector<8x128xf32>
    %766 = arith.addf %764, %765 : vector<8x128xf32>
    %767 = arith.mulf %759, %766 : vector<8x128xf32>
    %768 = vector.extract_strided_slice %5 {offsets = [0, 95], sizes = [8, 1], strides = [1, 1]} : vector<8x128xf32> to vector<8x1xf32>
    %769 = vector.extract_strided_slice %6 {offsets = [95, 0], sizes = [1, 128], strides = [1, 1]} : vector<128x128xf32> to vector<1x128xf32>
    %770 = vector.broadcast %768 : vector<8x1xf32> to vector<8x128xf32>
    %771 = vector.broadcast %769 : vector<1x128xf32> to vector<8x128xf32>
    %772 = arith.mulf %770, %771 : vector<8x128xf32>
    %cst_101 = arith.constant 1.000000e+00 : f32
    %773 = vector.broadcast %cst_101 : f32 to vector<8x128xf32>
    %774 = arith.addf %772, %773 : vector<8x128xf32>
    %775 = arith.mulf %767, %774 : vector<8x128xf32>
    %776 = vector.extract_strided_slice %5 {offsets = [0, 96], sizes = [8, 1], strides = [1, 1]} : vector<8x128xf32> to vector<8x1xf32>
    %777 = vector.extract_strided_slice %6 {offsets = [96, 0], sizes = [1, 128], strides = [1, 1]} : vector<128x128xf32> to vector<1x128xf32>
    %778 = vector.broadcast %776 : vector<8x1xf32> to vector<8x128xf32>
    %779 = vector.broadcast %777 : vector<1x128xf32> to vector<8x128xf32>
    %780 = arith.mulf %778, %779 : vector<8x128xf32>
    %cst_102 = arith.constant 1.000000e+00 : f32
    %781 = vector.broadcast %cst_102 : f32 to vector<8x128xf32>
    %782 = arith.addf %780, %781 : vector<8x128xf32>
    %783 = arith.mulf %775, %782 : vector<8x128xf32>
    %784 = vector.extract_strided_slice %5 {offsets = [0, 97], sizes = [8, 1], strides = [1, 1]} : vector<8x128xf32> to vector<8x1xf32>
    %785 = vector.extract_strided_slice %6 {offsets = [97, 0], sizes = [1, 128], strides = [1, 1]} : vector<128x128xf32> to vector<1x128xf32>
    %786 = vector.broadcast %784 : vector<8x1xf32> to vector<8x128xf32>
    %787 = vector.broadcast %785 : vector<1x128xf32> to vector<8x128xf32>
    %788 = arith.mulf %786, %787 : vector<8x128xf32>
    %cst_103 = arith.constant 1.000000e+00 : f32
    %789 = vector.broadcast %cst_103 : f32 to vector<8x128xf32>
    %790 = arith.addf %788, %789 : vector<8x128xf32>
    %791 = arith.mulf %783, %790 : vector<8x128xf32>
    %792 = vector.extract_strided_slice %5 {offsets = [0, 98], sizes = [8, 1], strides = [1, 1]} : vector<8x128xf32> to vector<8x1xf32>
    %793 = vector.extract_strided_slice %6 {offsets = [98, 0], sizes = [1, 128], strides = [1, 1]} : vector<128x128xf32> to vector<1x128xf32>
    %794 = vector.broadcast %792 : vector<8x1xf32> to vector<8x128xf32>
    %795 = vector.broadcast %793 : vector<1x128xf32> to vector<8x128xf32>
    %796 = arith.mulf %794, %795 : vector<8x128xf32>
    %cst_104 = arith.constant 1.000000e+00 : f32
    %797 = vector.broadcast %cst_104 : f32 to vector<8x128xf32>
    %798 = arith.addf %796, %797 : vector<8x128xf32>
    %799 = arith.mulf %791, %798 : vector<8x128xf32>
    %800 = vector.extract_strided_slice %5 {offsets = [0, 99], sizes = [8, 1], strides = [1, 1]} : vector<8x128xf32> to vector<8x1xf32>
    %801 = vector.extract_strided_slice %6 {offsets = [99, 0], sizes = [1, 128], strides = [1, 1]} : vector<128x128xf32> to vector<1x128xf32>
    %802 = vector.broadcast %800 : vector<8x1xf32> to vector<8x128xf32>
    %803 = vector.broadcast %801 : vector<1x128xf32> to vector<8x128xf32>
    %804 = arith.mulf %802, %803 : vector<8x128xf32>
    %cst_105 = arith.constant 1.000000e+00 : f32
    %805 = vector.broadcast %cst_105 : f32 to vector<8x128xf32>
    %806 = arith.addf %804, %805 : vector<8x128xf32>
    %807 = arith.mulf %799, %806 : vector<8x128xf32>
    %808 = vector.extract_strided_slice %5 {offsets = [0, 100], sizes = [8, 1], strides = [1, 1]} : vector<8x128xf32> to vector<8x1xf32>
    %809 = vector.extract_strided_slice %6 {offsets = [100, 0], sizes = [1, 128], strides = [1, 1]} : vector<128x128xf32> to vector<1x128xf32>
    %810 = vector.broadcast %808 : vector<8x1xf32> to vector<8x128xf32>
    %811 = vector.broadcast %809 : vector<1x128xf32> to vector<8x128xf32>
    %812 = arith.mulf %810, %811 : vector<8x128xf32>
    %cst_106 = arith.constant 1.000000e+00 : f32
    %813 = vector.broadcast %cst_106 : f32 to vector<8x128xf32>
    %814 = arith.addf %812, %813 : vector<8x128xf32>
    %815 = arith.mulf %807, %814 : vector<8x128xf32>
    %816 = vector.extract_strided_slice %5 {offsets = [0, 101], sizes = [8, 1], strides = [1, 1]} : vector<8x128xf32> to vector<8x1xf32>
    %817 = vector.extract_strided_slice %6 {offsets = [101, 0], sizes = [1, 128], strides = [1, 1]} : vector<128x128xf32> to vector<1x128xf32>
    %818 = vector.broadcast %816 : vector<8x1xf32> to vector<8x128xf32>
    %819 = vector.broadcast %817 : vector<1x128xf32> to vector<8x128xf32>
    %820 = arith.mulf %818, %819 : vector<8x128xf32>
    %cst_107 = arith.constant 1.000000e+00 : f32
    %821 = vector.broadcast %cst_107 : f32 to vector<8x128xf32>
    %822 = arith.addf %820, %821 : vector<8x128xf32>
    %823 = arith.mulf %815, %822 : vector<8x128xf32>
    %824 = vector.extract_strided_slice %5 {offsets = [0, 102], sizes = [8, 1], strides = [1, 1]} : vector<8x128xf32> to vector<8x1xf32>
    %825 = vector.extract_strided_slice %6 {offsets = [102, 0], sizes = [1, 128], strides = [1, 1]} : vector<128x128xf32> to vector<1x128xf32>
    %826 = vector.broadcast %824 : vector<8x1xf32> to vector<8x128xf32>
    %827 = vector.broadcast %825 : vector<1x128xf32> to vector<8x128xf32>
    %828 = arith.mulf %826, %827 : vector<8x128xf32>
    %cst_108 = arith.constant 1.000000e+00 : f32
    %829 = vector.broadcast %cst_108 : f32 to vector<8x128xf32>
    %830 = arith.addf %828, %829 : vector<8x128xf32>
    %831 = arith.mulf %823, %830 : vector<8x128xf32>
    %832 = vector.extract_strided_slice %5 {offsets = [0, 103], sizes = [8, 1], strides = [1, 1]} : vector<8x128xf32> to vector<8x1xf32>
    %833 = vector.extract_strided_slice %6 {offsets = [103, 0], sizes = [1, 128], strides = [1, 1]} : vector<128x128xf32> to vector<1x128xf32>
    %834 = vector.broadcast %832 : vector<8x1xf32> to vector<8x128xf32>
    %835 = vector.broadcast %833 : vector<1x128xf32> to vector<8x128xf32>
    %836 = arith.mulf %834, %835 : vector<8x128xf32>
    %cst_109 = arith.constant 1.000000e+00 : f32
    %837 = vector.broadcast %cst_109 : f32 to vector<8x128xf32>
    %838 = arith.addf %836, %837 : vector<8x128xf32>
    %839 = arith.mulf %831, %838 : vector<8x128xf32>
    %840 = vector.extract_strided_slice %5 {offsets = [0, 104], sizes = [8, 1], strides = [1, 1]} : vector<8x128xf32> to vector<8x1xf32>
    %841 = vector.extract_strided_slice %6 {offsets = [104, 0], sizes = [1, 128], strides = [1, 1]} : vector<128x128xf32> to vector<1x128xf32>
    %842 = vector.broadcast %840 : vector<8x1xf32> to vector<8x128xf32>
    %843 = vector.broadcast %841 : vector<1x128xf32> to vector<8x128xf32>
    %844 = arith.mulf %842, %843 : vector<8x128xf32>
    %cst_110 = arith.constant 1.000000e+00 : f32
    %845 = vector.broadcast %cst_110 : f32 to vector<8x128xf32>
    %846 = arith.addf %844, %845 : vector<8x128xf32>
    %847 = arith.mulf %839, %846 : vector<8x128xf32>
    %848 = vector.extract_strided_slice %5 {offsets = [0, 105], sizes = [8, 1], strides = [1, 1]} : vector<8x128xf32> to vector<8x1xf32>
    %849 = vector.extract_strided_slice %6 {offsets = [105, 0], sizes = [1, 128], strides = [1, 1]} : vector<128x128xf32> to vector<1x128xf32>
    %850 = vector.broadcast %848 : vector<8x1xf32> to vector<8x128xf32>
    %851 = vector.broadcast %849 : vector<1x128xf32> to vector<8x128xf32>
    %852 = arith.mulf %850, %851 : vector<8x128xf32>
    %cst_111 = arith.constant 1.000000e+00 : f32
    %853 = vector.broadcast %cst_111 : f32 to vector<8x128xf32>
    %854 = arith.addf %852, %853 : vector<8x128xf32>
    %855 = arith.mulf %847, %854 : vector<8x128xf32>
    %856 = vector.extract_strided_slice %5 {offsets = [0, 106], sizes = [8, 1], strides = [1, 1]} : vector<8x128xf32> to vector<8x1xf32>
    %857 = vector.extract_strided_slice %6 {offsets = [106, 0], sizes = [1, 128], strides = [1, 1]} : vector<128x128xf32> to vector<1x128xf32>
    %858 = vector.broadcast %856 : vector<8x1xf32> to vector<8x128xf32>
    %859 = vector.broadcast %857 : vector<1x128xf32> to vector<8x128xf32>
    %860 = arith.mulf %858, %859 : vector<8x128xf32>
    %cst_112 = arith.constant 1.000000e+00 : f32
    %861 = vector.broadcast %cst_112 : f32 to vector<8x128xf32>
    %862 = arith.addf %860, %861 : vector<8x128xf32>
    %863 = arith.mulf %855, %862 : vector<8x128xf32>
    %864 = vector.extract_strided_slice %5 {offsets = [0, 107], sizes = [8, 1], strides = [1, 1]} : vector<8x128xf32> to vector<8x1xf32>
    %865 = vector.extract_strided_slice %6 {offsets = [107, 0], sizes = [1, 128], strides = [1, 1]} : vector<128x128xf32> to vector<1x128xf32>
    %866 = vector.broadcast %864 : vector<8x1xf32> to vector<8x128xf32>
    %867 = vector.broadcast %865 : vector<1x128xf32> to vector<8x128xf32>
    %868 = arith.mulf %866, %867 : vector<8x128xf32>
    %cst_113 = arith.constant 1.000000e+00 : f32
    %869 = vector.broadcast %cst_113 : f32 to vector<8x128xf32>
    %870 = arith.addf %868, %869 : vector<8x128xf32>
    %871 = arith.mulf %863, %870 : vector<8x128xf32>
    %872 = vector.extract_strided_slice %5 {offsets = [0, 108], sizes = [8, 1], strides = [1, 1]} : vector<8x128xf32> to vector<8x1xf32>
    %873 = vector.extract_strided_slice %6 {offsets = [108, 0], sizes = [1, 128], strides = [1, 1]} : vector<128x128xf32> to vector<1x128xf32>
    %874 = vector.broadcast %872 : vector<8x1xf32> to vector<8x128xf32>
    %875 = vector.broadcast %873 : vector<1x128xf32> to vector<8x128xf32>
    %876 = arith.mulf %874, %875 : vector<8x128xf32>
    %cst_114 = arith.constant 1.000000e+00 : f32
    %877 = vector.broadcast %cst_114 : f32 to vector<8x128xf32>
    %878 = arith.addf %876, %877 : vector<8x128xf32>
    %879 = arith.mulf %871, %878 : vector<8x128xf32>
    %880 = vector.extract_strided_slice %5 {offsets = [0, 109], sizes = [8, 1], strides = [1, 1]} : vector<8x128xf32> to vector<8x1xf32>
    %881 = vector.extract_strided_slice %6 {offsets = [109, 0], sizes = [1, 128], strides = [1, 1]} : vector<128x128xf32> to vector<1x128xf32>
    %882 = vector.broadcast %880 : vector<8x1xf32> to vector<8x128xf32>
    %883 = vector.broadcast %881 : vector<1x128xf32> to vector<8x128xf32>
    %884 = arith.mulf %882, %883 : vector<8x128xf32>
    %cst_115 = arith.constant 1.000000e+00 : f32
    %885 = vector.broadcast %cst_115 : f32 to vector<8x128xf32>
    %886 = arith.addf %884, %885 : vector<8x128xf32>
    %887 = arith.mulf %879, %886 : vector<8x128xf32>
    %888 = vector.extract_strided_slice %5 {offsets = [0, 110], sizes = [8, 1], strides = [1, 1]} : vector<8x128xf32> to vector<8x1xf32>
    %889 = vector.extract_strided_slice %6 {offsets = [110, 0], sizes = [1, 128], strides = [1, 1]} : vector<128x128xf32> to vector<1x128xf32>
    %890 = vector.broadcast %888 : vector<8x1xf32> to vector<8x128xf32>
    %891 = vector.broadcast %889 : vector<1x128xf32> to vector<8x128xf32>
    %892 = arith.mulf %890, %891 : vector<8x128xf32>
    %cst_116 = arith.constant 1.000000e+00 : f32
    %893 = vector.broadcast %cst_116 : f32 to vector<8x128xf32>
    %894 = arith.addf %892, %893 : vector<8x128xf32>
    %895 = arith.mulf %887, %894 : vector<8x128xf32>
    %896 = vector.extract_strided_slice %5 {offsets = [0, 111], sizes = [8, 1], strides = [1, 1]} : vector<8x128xf32> to vector<8x1xf32>
    %897 = vector.extract_strided_slice %6 {offsets = [111, 0], sizes = [1, 128], strides = [1, 1]} : vector<128x128xf32> to vector<1x128xf32>
    %898 = vector.broadcast %896 : vector<8x1xf32> to vector<8x128xf32>
    %899 = vector.broadcast %897 : vector<1x128xf32> to vector<8x128xf32>
    %900 = arith.mulf %898, %899 : vector<8x128xf32>
    %cst_117 = arith.constant 1.000000e+00 : f32
    %901 = vector.broadcast %cst_117 : f32 to vector<8x128xf32>
    %902 = arith.addf %900, %901 : vector<8x128xf32>
    %903 = arith.mulf %895, %902 : vector<8x128xf32>
    %904 = vector.extract_strided_slice %5 {offsets = [0, 112], sizes = [8, 1], strides = [1, 1]} : vector<8x128xf32> to vector<8x1xf32>
    %905 = vector.extract_strided_slice %6 {offsets = [112, 0], sizes = [1, 128], strides = [1, 1]} : vector<128x128xf32> to vector<1x128xf32>
    %906 = vector.broadcast %904 : vector<8x1xf32> to vector<8x128xf32>
    %907 = vector.broadcast %905 : vector<1x128xf32> to vector<8x128xf32>
    %908 = arith.mulf %906, %907 : vector<8x128xf32>
    %cst_118 = arith.constant 1.000000e+00 : f32
    %909 = vector.broadcast %cst_118 : f32 to vector<8x128xf32>
    %910 = arith.addf %908, %909 : vector<8x128xf32>
    %911 = arith.mulf %903, %910 : vector<8x128xf32>
    %912 = vector.extract_strided_slice %5 {offsets = [0, 113], sizes = [8, 1], strides = [1, 1]} : vector<8x128xf32> to vector<8x1xf32>
    %913 = vector.extract_strided_slice %6 {offsets = [113, 0], sizes = [1, 128], strides = [1, 1]} : vector<128x128xf32> to vector<1x128xf32>
    %914 = vector.broadcast %912 : vector<8x1xf32> to vector<8x128xf32>
    %915 = vector.broadcast %913 : vector<1x128xf32> to vector<8x128xf32>
    %916 = arith.mulf %914, %915 : vector<8x128xf32>
    %cst_119 = arith.constant 1.000000e+00 : f32
    %917 = vector.broadcast %cst_119 : f32 to vector<8x128xf32>
    %918 = arith.addf %916, %917 : vector<8x128xf32>
    %919 = arith.mulf %911, %918 : vector<8x128xf32>
    %920 = vector.extract_strided_slice %5 {offsets = [0, 114], sizes = [8, 1], strides = [1, 1]} : vector<8x128xf32> to vector<8x1xf32>
    %921 = vector.extract_strided_slice %6 {offsets = [114, 0], sizes = [1, 128], strides = [1, 1]} : vector<128x128xf32> to vector<1x128xf32>
    %922 = vector.broadcast %920 : vector<8x1xf32> to vector<8x128xf32>
    %923 = vector.broadcast %921 : vector<1x128xf32> to vector<8x128xf32>
    %924 = arith.mulf %922, %923 : vector<8x128xf32>
    %cst_120 = arith.constant 1.000000e+00 : f32
    %925 = vector.broadcast %cst_120 : f32 to vector<8x128xf32>
    %926 = arith.addf %924, %925 : vector<8x128xf32>
    %927 = arith.mulf %919, %926 : vector<8x128xf32>
    %928 = vector.extract_strided_slice %5 {offsets = [0, 115], sizes = [8, 1], strides = [1, 1]} : vector<8x128xf32> to vector<8x1xf32>
    %929 = vector.extract_strided_slice %6 {offsets = [115, 0], sizes = [1, 128], strides = [1, 1]} : vector<128x128xf32> to vector<1x128xf32>
    %930 = vector.broadcast %928 : vector<8x1xf32> to vector<8x128xf32>
    %931 = vector.broadcast %929 : vector<1x128xf32> to vector<8x128xf32>
    %932 = arith.mulf %930, %931 : vector<8x128xf32>
    %cst_121 = arith.constant 1.000000e+00 : f32
    %933 = vector.broadcast %cst_121 : f32 to vector<8x128xf32>
    %934 = arith.addf %932, %933 : vector<8x128xf32>
    %935 = arith.mulf %927, %934 : vector<8x128xf32>
    %936 = vector.extract_strided_slice %5 {offsets = [0, 116], sizes = [8, 1], strides = [1, 1]} : vector<8x128xf32> to vector<8x1xf32>
    %937 = vector.extract_strided_slice %6 {offsets = [116, 0], sizes = [1, 128], strides = [1, 1]} : vector<128x128xf32> to vector<1x128xf32>
    %938 = vector.broadcast %936 : vector<8x1xf32> to vector<8x128xf32>
    %939 = vector.broadcast %937 : vector<1x128xf32> to vector<8x128xf32>
    %940 = arith.mulf %938, %939 : vector<8x128xf32>
    %cst_122 = arith.constant 1.000000e+00 : f32
    %941 = vector.broadcast %cst_122 : f32 to vector<8x128xf32>
    %942 = arith.addf %940, %941 : vector<8x128xf32>
    %943 = arith.mulf %935, %942 : vector<8x128xf32>
    %944 = vector.extract_strided_slice %5 {offsets = [0, 117], sizes = [8, 1], strides = [1, 1]} : vector<8x128xf32> to vector<8x1xf32>
    %945 = vector.extract_strided_slice %6 {offsets = [117, 0], sizes = [1, 128], strides = [1, 1]} : vector<128x128xf32> to vector<1x128xf32>
    %946 = vector.broadcast %944 : vector<8x1xf32> to vector<8x128xf32>
    %947 = vector.broadcast %945 : vector<1x128xf32> to vector<8x128xf32>
    %948 = arith.mulf %946, %947 : vector<8x128xf32>
    %cst_123 = arith.constant 1.000000e+00 : f32
    %949 = vector.broadcast %cst_123 : f32 to vector<8x128xf32>
    %950 = arith.addf %948, %949 : vector<8x128xf32>
    %951 = arith.mulf %943, %950 : vector<8x128xf32>
    %952 = vector.extract_strided_slice %5 {offsets = [0, 118], sizes = [8, 1], strides = [1, 1]} : vector<8x128xf32> to vector<8x1xf32>
    %953 = vector.extract_strided_slice %6 {offsets = [118, 0], sizes = [1, 128], strides = [1, 1]} : vector<128x128xf32> to vector<1x128xf32>
    %954 = vector.broadcast %952 : vector<8x1xf32> to vector<8x128xf32>
    %955 = vector.broadcast %953 : vector<1x128xf32> to vector<8x128xf32>
    %956 = arith.mulf %954, %955 : vector<8x128xf32>
    %cst_124 = arith.constant 1.000000e+00 : f32
    %957 = vector.broadcast %cst_124 : f32 to vector<8x128xf32>
    %958 = arith.addf %956, %957 : vector<8x128xf32>
    %959 = arith.mulf %951, %958 : vector<8x128xf32>
    %960 = vector.extract_strided_slice %5 {offsets = [0, 119], sizes = [8, 1], strides = [1, 1]} : vector<8x128xf32> to vector<8x1xf32>
    %961 = vector.extract_strided_slice %6 {offsets = [119, 0], sizes = [1, 128], strides = [1, 1]} : vector<128x128xf32> to vector<1x128xf32>
    %962 = vector.broadcast %960 : vector<8x1xf32> to vector<8x128xf32>
    %963 = vector.broadcast %961 : vector<1x128xf32> to vector<8x128xf32>
    %964 = arith.mulf %962, %963 : vector<8x128xf32>
    %cst_125 = arith.constant 1.000000e+00 : f32
    %965 = vector.broadcast %cst_125 : f32 to vector<8x128xf32>
    %966 = arith.addf %964, %965 : vector<8x128xf32>
    %967 = arith.mulf %959, %966 : vector<8x128xf32>
    %968 = vector.extract_strided_slice %5 {offsets = [0, 120], sizes = [8, 1], strides = [1, 1]} : vector<8x128xf32> to vector<8x1xf32>
    %969 = vector.extract_strided_slice %6 {offsets = [120, 0], sizes = [1, 128], strides = [1, 1]} : vector<128x128xf32> to vector<1x128xf32>
    %970 = vector.broadcast %968 : vector<8x1xf32> to vector<8x128xf32>
    %971 = vector.broadcast %969 : vector<1x128xf32> to vector<8x128xf32>
    %972 = arith.mulf %970, %971 : vector<8x128xf32>
    %cst_126 = arith.constant 1.000000e+00 : f32
    %973 = vector.broadcast %cst_126 : f32 to vector<8x128xf32>
    %974 = arith.addf %972, %973 : vector<8x128xf32>
    %975 = arith.mulf %967, %974 : vector<8x128xf32>
    %976 = vector.extract_strided_slice %5 {offsets = [0, 121], sizes = [8, 1], strides = [1, 1]} : vector<8x128xf32> to vector<8x1xf32>
    %977 = vector.extract_strided_slice %6 {offsets = [121, 0], sizes = [1, 128], strides = [1, 1]} : vector<128x128xf32> to vector<1x128xf32>
    %978 = vector.broadcast %976 : vector<8x1xf32> to vector<8x128xf32>
    %979 = vector.broadcast %977 : vector<1x128xf32> to vector<8x128xf32>
    %980 = arith.mulf %978, %979 : vector<8x128xf32>
    %cst_127 = arith.constant 1.000000e+00 : f32
    %981 = vector.broadcast %cst_127 : f32 to vector<8x128xf32>
    %982 = arith.addf %980, %981 : vector<8x128xf32>
    %983 = arith.mulf %975, %982 : vector<8x128xf32>
    %984 = vector.extract_strided_slice %5 {offsets = [0, 122], sizes = [8, 1], strides = [1, 1]} : vector<8x128xf32> to vector<8x1xf32>
    %985 = vector.extract_strided_slice %6 {offsets = [122, 0], sizes = [1, 128], strides = [1, 1]} : vector<128x128xf32> to vector<1x128xf32>
    %986 = vector.broadcast %984 : vector<8x1xf32> to vector<8x128xf32>
    %987 = vector.broadcast %985 : vector<1x128xf32> to vector<8x128xf32>
    %988 = arith.mulf %986, %987 : vector<8x128xf32>
    %cst_128 = arith.constant 1.000000e+00 : f32
    %989 = vector.broadcast %cst_128 : f32 to vector<8x128xf32>
    %990 = arith.addf %988, %989 : vector<8x128xf32>
    %991 = arith.mulf %983, %990 : vector<8x128xf32>
    %992 = vector.extract_strided_slice %5 {offsets = [0, 123], sizes = [8, 1], strides = [1, 1]} : vector<8x128xf32> to vector<8x1xf32>
    %993 = vector.extract_strided_slice %6 {offsets = [123, 0], sizes = [1, 128], strides = [1, 1]} : vector<128x128xf32> to vector<1x128xf32>
    %994 = vector.broadcast %992 : vector<8x1xf32> to vector<8x128xf32>
    %995 = vector.broadcast %993 : vector<1x128xf32> to vector<8x128xf32>
    %996 = arith.mulf %994, %995 : vector<8x128xf32>
    %cst_129 = arith.constant 1.000000e+00 : f32
    %997 = vector.broadcast %cst_129 : f32 to vector<8x128xf32>
    %998 = arith.addf %996, %997 : vector<8x128xf32>
    %999 = arith.mulf %991, %998 : vector<8x128xf32>
    %1000 = vector.extract_strided_slice %5 {offsets = [0, 124], sizes = [8, 1], strides = [1, 1]} : vector<8x128xf32> to vector<8x1xf32>
    %1001 = vector.extract_strided_slice %6 {offsets = [124, 0], sizes = [1, 128], strides = [1, 1]} : vector<128x128xf32> to vector<1x128xf32>
    %1002 = vector.broadcast %1000 : vector<8x1xf32> to vector<8x128xf32>
    %1003 = vector.broadcast %1001 : vector<1x128xf32> to vector<8x128xf32>
    %1004 = arith.mulf %1002, %1003 : vector<8x128xf32>
    %cst_130 = arith.constant 1.000000e+00 : f32
    %1005 = vector.broadcast %cst_130 : f32 to vector<8x128xf32>
    %1006 = arith.addf %1004, %1005 : vector<8x128xf32>
    %1007 = arith.mulf %999, %1006 : vector<8x128xf32>
    %1008 = vector.extract_strided_slice %5 {offsets = [0, 125], sizes = [8, 1], strides = [1, 1]} : vector<8x128xf32> to vector<8x1xf32>
    %1009 = vector.extract_strided_slice %6 {offsets = [125, 0], sizes = [1, 128], strides = [1, 1]} : vector<128x128xf32> to vector<1x128xf32>
    %1010 = vector.broadcast %1008 : vector<8x1xf32> to vector<8x128xf32>
    %1011 = vector.broadcast %1009 : vector<1x128xf32> to vector<8x128xf32>
    %1012 = arith.mulf %1010, %1011 : vector<8x128xf32>
    %cst_131 = arith.constant 1.000000e+00 : f32
    %1013 = vector.broadcast %cst_131 : f32 to vector<8x128xf32>
    %1014 = arith.addf %1012, %1013 : vector<8x128xf32>
    %1015 = arith.mulf %1007, %1014 : vector<8x128xf32>
    %1016 = vector.extract_strided_slice %5 {offsets = [0, 126], sizes = [8, 1], strides = [1, 1]} : vector<8x128xf32> to vector<8x1xf32>
    %1017 = vector.extract_strided_slice %6 {offsets = [126, 0], sizes = [1, 128], strides = [1, 1]} : vector<128x128xf32> to vector<1x128xf32>
    %1018 = vector.broadcast %1016 : vector<8x1xf32> to vector<8x128xf32>
    %1019 = vector.broadcast %1017 : vector<1x128xf32> to vector<8x128xf32>
    %1020 = arith.mulf %1018, %1019 : vector<8x128xf32>
    %cst_132 = arith.constant 1.000000e+00 : f32
    %1021 = vector.broadcast %cst_132 : f32 to vector<8x128xf32>
    %1022 = arith.addf %1020, %1021 : vector<8x128xf32>
    %1023 = arith.mulf %1015, %1022 : vector<8x128xf32>
    %1024 = vector.extract_strided_slice %5 {offsets = [0, 127], sizes = [8, 1], strides = [1, 1]} : vector<8x128xf32> to vector<8x1xf32>
    %1025 = vector.extract_strided_slice %6 {offsets = [127, 0], sizes = [1, 128], strides = [1, 1]} : vector<128x128xf32> to vector<1x128xf32>
    %1026 = vector.broadcast %1024 : vector<8x1xf32> to vector<8x128xf32>
    %1027 = vector.broadcast %1025 : vector<1x128xf32> to vector<8x128xf32>
    %1028 = arith.mulf %1026, %1027 : vector<8x128xf32>
    %cst_133 = arith.constant 1.000000e+00 : f32
    %1029 = vector.broadcast %cst_133 : f32 to vector<8x128xf32>
    %1030 = arith.addf %1028, %1029 : vector<8x128xf32>
    %1031 = arith.mulf %1023, %1030 : vector<8x128xf32>
    %c0_134 = arith.constant 0 : index
    %c0_135 = arith.constant 0 : index
    %1032 = vector.load %arg6[%c0_134, %c0_135] : memref<8x128xf32, #tpu.memory_space<vmem>>, vector<8x128xf32>
    tpu.vector_store %arg6[%c0_134, %c0_135], %1031 {strides = array<i32>} : memref<8x128xf32, #tpu.memory_space<vmem>>, vector<8x128xf32>,
    %c0_i32_136 = arith.constant 0 : i32
    %1033 = arith.cmpi eq, %arg2, %c0_i32_136 : i32
    %1034 = arith.extui %1033 : i1 to i32
    %c0_i32_137 = arith.constant 0 : i32
    %1035 = arith.cmpi ne, %1034, %c0_i32_137 : i32
    scf.if %1035 {
      %c0_138 = arith.constant 0 : index
      %c0_139 = arith.constant 0 : index
      %1036 = vector.load %arg6[%c0_138, %c0_139] : memref<8x128xf32, #tpu.memory_space<vmem>>, vector<8x128xf32>
      %c0_140 = arith.constant 0 : index
      %c0_141 = arith.constant 0 : index
      %1037 = vector.load %arg5[%c0_140, %c0_141] : memref<8x128xf32, #tpu.memory_space<vmem>>, vector<8x128xf32>
      tpu.vector_store %arg5[%c0_140, %c0_141], %1036 {strides = array<i32>} : memref<8x128xf32, #tpu.memory_space<vmem>>, vector<8x128xf32>,
    } else {
    }
    return
  }
  func.func @transform_0(%arg0: i32, %arg1: i32, %arg2: i32) -> (i32, i32) {
    %c0_i32 = arith.constant 0 : i32
    return %arg0, %arg2 : i32, i32
  }
  func.func @transform_1(%arg0: i32, %arg1: i32, %arg2: i32) -> (i32, i32) {
    %c0_i32 = arith.constant 0 : i32
    return %arg2, %arg1 : i32, i32
  }
  func.func @transform_2(%arg0: i32, %arg1: i32, %arg2: i32) -> (i32, i32) {
    %c0_i32 = arith.constant 0 : i32
    return %arg0, %arg1 : i32, i32
  }
}

</mosaic_0001>

<bundles_post_ra>
// kernel: tpu_custom_call.1
= control target key start
LH: loop header
LB: loop body
LE: loop exit
PB: predicated region body
PF: predicated region fallthrough
CT: control target
= control target key end

     0   :  { %7 = vsyncpa [#allocation4], 0  ;;  %s2355_s0 = inlined_call_operand.hbm [shape: f32[8,128], index: 0, kind: input, shape index: {}]   ;;  %s2356_s1 = inlined_call_operand.hbm [shape: f32[128,128], index: 1, kind: input, shape index: {}]   ;;  %s2357_s2 = inlined_call_operand.hbm [shape: f32[8,128], index: 2, kind: output, shape index: {}]  }
   0x1   :  { %8 = vsyncpa [#allocation7], 0 }
   0x2   :  { %9 = vsyncpa [#allocation5], 0  ;;  %s1822_s9 = smov [#allocation3]   ;;  %s1823_s11 = smov [#allocation6]  }
   0x3   :  { %s16_s10 = sshll.u32 %s1822_s9, 4  ;;  %s25_s12 = sshll.u32 %s1823_s11, 4  ;;  %s17_s10 = int_to_ptr.vmem [resolvable:$true] %s16_s10  ;;  %s26_s12 = int_to_ptr.vmem [resolvable:$true] %s25_s12 }
   0x4   :  { %s1764_s13 = scalar_lea.vmem %s17_s10, 128  ;;  %p1769_p1 = scmp.lt.s32.totalorder %s17_s10, %s17_s10 }
   0x5   :  { %p1765_p0 = scmp.ne.s32.totalorder %s17_s10, %s1764_s13  ;;  %p1770_p2 = scmp.lt.s32.totalorder %s1764_s13, %s1764_s13 }
   0x7   :  { %p1771_p3 = por %p1770_p2, %p1769_p1 }
   0x9   :  { %p1772_p4 = pnand %p1771_p3, %p1765_p0 }
   0xb   :  { %1775 = shalt.err (!%p1772_p4)
}
   0xc   :  { %19 = dma.hbm_to_vmem [thread:$0]  %s2355_s0, 128, %s17_s10, [#allocation4]  }
   0xd   :  { %s1784_s16 = scalar_lea.vmem %s26_s12, 2048  ;;  %p1789_p6 = scmp.lt.s32.totalorder %s26_s12, %s26_s12 }
   0xe   :  { %p1785_p5 = scmp.ne.s32.totalorder %s26_s12, %s1784_s16  ;;  %p1790_p7 = scmp.lt.s32.totalorder %s1784_s16, %s1784_s16 }
  0x10   :  { %p1791_p8 = por %p1790_p7, %p1789_p6 }
  0x12   :  { %p1792_p9 = pnand %p1791_p8, %p1785_p5 }
  0x14   :  { %1795 = shalt.err (!%p1792_p9)
}
  0x15   :  { %s1824_s17 = smov 128   ;;  %s1825_s18 = smov 8  }
  0x16   :  { %31 = dma.hbm_to_vmem [thread:$0]  %s2356_s1, 2048, %s26_s12, [#allocation7], %s1824_s17, %s1824_s17, %s1825_s18  }
  0x17   :  { %1816 = dma.done.wait [#allocation4], 128  }
  0x18   :  { %1817 = vsyncadd [#allocation4], 4294967168 }
  0x19   :  { %1818 = dma.done.wait [#allocation7], 2048  }
  0x1a   :  { %1819 = vsyncadd [#allocation7], 4294965248  ;;  %v1826_v0 = vmov 2   ;;  %v1827_v1 = vmov 0   ;;  %v43_v2 = vld [vmem:[#allocation3] sm:$0xff]  ;;  %v1828_v4 = vmov 3   ;;  %v67_v48 = vlaneseq }
  0x1b   :  { %1629 = vset.pattern.permute.xlu1 %v1826_v0  ;;  %1627 = vset.pattern.permute.xlu0 %v1827_v1  ;;  %v1976_v3 = vadd.f32 -1.0, %v43_v2  ;;  %v1829_v5 = vmov 1   ;;  %v1830_v6 = vmov 4   ;;  %v1831_v7 = vmov 5   ;;  %v2029_v55 = vld [vmem:[#allocation6] sm:$0xff]  ;;  %s1954_s0 = smov [#allocation8]  }
  0x1c   :  { %v1832_v8 = vmov 6   ;;  %v1833_v9 = vmov 8   ;;  %v1834_v10 = vmov 7   ;;  %v1835_v11 = vmov 11   ;;  %s1483_s1 = sshll.u32 %s1954_s0, 4  ;;  %s1484_s1 = int_to_ptr.vmem [resolvable:$true] %s1483_s1 }
  0x1d   :  { %86 = vperm.xlu1 %1629, %v1976_v3   ;;  %64 = vperm.xlu0 %1627, %v1976_v3   ;;  %v1836_v12 = vmov 9   ;;  %v1837_v13 = vmov 14   ;;  %v1838_v14 = vmov 10   ;;  %v1839_v15 = vmov 17   ;;  %s1796_s21 = scalar_lea.vmem %s1484_s1, 128  ;;  %p1801_p11 = scmp.lt.s32.totalorder %s1484_s1, %s1484_s1 }
  0x1e   :  { %v1840_v16 = vmov 12   ;;  %v1841_v17 = vmov 20   ;;  %v1842_v18 = vmov 13   ;;  %v1843_v19 = vmov 23   ;;  %p1797_p10 = scmp.ne.s32.totalorder %s1484_s1, %s1796_s21  ;;  %p1802_p12 = scmp.lt.s32.totalorder %s1796_s21, %s1796_s21 }
  0x1f   :  { %v1844_v20 = vmov 15   ;;  %v1845_v21 = vmov 26   ;;  %v1846_v22 = vmov 16   ;;  %v1847_v23 = vmov 29  }
  0x20   :  { %v1848_v24 = vmov 18   ;;  %v1849_v25 = vmov 32   ;;  %v1850_v26 = vmov 19   ;;  %v1851_v27 = vmov 35   ;;  %p1803_p13 = por %p1802_p12, %p1801_p11 }
  0x21   :  { %1630 = vset.pattern.permute.xlu1 %v1828_v4  ;;  %1628 = vset.pattern.permute.xlu0 %v1829_v5  ;;  %v1852_v28 = vmov 21   ;;  %v1853_v29 = vmov 38   ;;  %v1854_v30 = vmov 22   ;;  %v1855_v31 = vmov 41  }
  0x22   :  { %97 = vperm.xlu1 %1630, %v1976_v3   ;;  %75 = vperm.xlu0 %1628, %v1976_v3   ;;  %v1856_v32 = vmov 24   ;;  %v1857_v33 = vmov 44   ;;  %v1858_v34 = vmov 25   ;;  %v1859_v35 = vmov 47   ;;  %p1804_p0 = pnand %p1803_p13, %p1797_p10 }
  0x23   :  { %v1860_v36 = vmov 27   ;;  %v1861_v37 = vmov 50   ;;  %v1862_v38 = vmov 28   ;;  %v1863_v39 = vmov 53  }
  0x24   :  { %v1864_v40 = vmov 30   ;;  %v1865_v41 = vmov 56   ;;  %v1866_v42 = vmov 31   ;;  %v1867_v43 = vmov 59  }
  0x25   :  { %v1868_v44 = vmov 33   ;;  %v1869_v45 = vmov 62   ;;  %v1870_v46 = vmov 34   ;;  %v1871_v47 = vmov 65  }
  0x26   :  { %1631 = vset.pattern.permute.xlu1 %v1830_v6  ;;  %1632 = vset.pattern.permute.xlu0 %v1831_v7  ;;  %v1872_v49 = vmov 36   ;;  %v1873_v50 = vmov 68   ;;  %v68_v51 = vshrl.u32 %v67_v48, 7  ;;  %v1874_v53 = vmov 37  }
  0x27   :  { %108 = vperm.xlu1 %1631, %v1976_v3   ;;  %119 = vperm.xlu0 %1632, %v1976_v3   ;;  %v1875_v54 = vmov 71   ;;  %v1876_v62 = vmov 39   ;;  %v1877_v63 = vmov 74  }
  0x28   :  { %v2026_v52 = vsub.s32 0, %v68_v51  ;;  %v2032_v56 = vsub.s32 2, %v68_v51  ;;  %v2036_v58 = vsub.s32 1, %v68_v51  ;;  %v2038_v61 = vsub.s32 3, %v68_v51 }
  0x29   :  { %v2046_v4 = vsub.s32 4, %v68_v51  ;;  %v2048_v5 = vsub.s32 5, %v68_v51 }
  0x2a   :  { %v70_v57 = vrot.slane %v2029_v55, %v2026_v52  ;;  %v92_v0 = vrot.slane %v2029_v55, %v2032_v56  ;;  %v81_v2 = vrot.slane %v2029_v55, %v2036_v58  ;;  %v103_v6 = vrot.slane %v2029_v55, %v2038_v61 }
  0x2b   :  { %1633 = vset.pattern.permute.xlu1 %v1832_v8  ;;  %1635 = vset.pattern.permute.xlu0 %v1833_v9 }
  0x2c   :  { %130 = vperm.xlu1 %1633, %v1976_v3   ;;  %152 = vperm.xlu0 %1635, %v1976_v3  }
  0x30   :  { %1634 = vset.pattern.permute.xlu1 %v1834_v10  ;;  %1638 = vset.pattern.permute.xlu0 %v1835_v11 }
  0x31   :  { %141 = vperm.xlu1 %1634, %v1976_v3   ;;  %185 = vperm.xlu0 %1638, %v1976_v3  }
  0x35   :  { %1636 = vset.pattern.permute.xlu1 %v1836_v12  ;;  %1641 = vset.pattern.permute.xlu0 %v1837_v13  ;;  %v1878_v12 = vmov 40   ;;  %v1879_v13 = vmov 77  }
  0x36   :  { %163 = vperm.xlu1 %1636, %v1976_v3   ;;  %218 = vperm.xlu0 %1641, %v1976_v3  }
  0x3a   :  { %1637 = vset.pattern.permute.xlu1 %v1838_v14  ;;  %1644 = vset.pattern.permute.xlu0 %v1839_v15  ;;  %v114_v14 = vrot.slane %v2029_v55, %v2046_v4  ;;  %v125_v15 = vrot.slane %v2029_v55, %v2048_v5 }
  0x3b   :  { %174 = vperm.xlu1 %1637, %v1976_v3   ;;  %251 = vperm.xlu0 %1644, %v1976_v3  }
  0x3f   :  { %1639 = vset.pattern.permute.xlu1 %v1840_v16  ;;  %1647 = vset.pattern.permute.xlu0 %v1841_v17 }
  0x40   :  { %196 = vperm.xlu1 %1639, %v1976_v3   ;;  %284 = vperm.xlu0 %1647, %v1976_v3  }
  0x44   :  { %1640 = vset.pattern.permute.xlu1 %v1842_v18  ;;  %1650 = vset.pattern.permute.xlu0 %v1843_v19  ;;  %v2058_v18 = vsub.s32 6, %v68_v51 }
  0x45   :  { %207 = vperm.xlu1 %1640, %v1976_v3   ;;  %317 = vperm.xlu0 %1650, %v1976_v3  }
  0x49   :  { %1642 = vset.pattern.permute.xlu1 %v1844_v20  ;;  %1653 = vset.pattern.permute.xlu0 %v1845_v21 }
  0x4a   :  { %229 = vperm.xlu1 %1642, %v1976_v3   ;;  %350 = vperm.xlu0 %1653, %v1976_v3  }
  0x4e   :  { %1643 = vset.pattern.permute.xlu1 %v1846_v22  ;;  %1656 = vset.pattern.permute.xlu0 %v1847_v23 }
  0x4f   :  { %240 = vperm.xlu1 %1643, %v1976_v3   ;;  %383 = vperm.xlu0 %1656, %v1976_v3  }
  0x53   :  { %1645 = vset.pattern.permute.xlu1 %v1848_v24  ;;  %1659 = vset.pattern.permute.xlu0 %v1849_v25  ;;  %v1880_v24 = vmov 42  }
  0x54   :  { %262 = vperm.xlu1 %1645, %v1976_v3   ;;  %416 = vperm.xlu0 %1659, %v1976_v3  }
  0x58   :  { %1646 = vset.pattern.permute.xlu1 %v1850_v26  ;;  %1662 = vset.pattern.permute.xlu0 %v1851_v27  ;;  %v1881_v26 = vmov 80  }
  0x59   :  { %273 = vperm.xlu1 %1646, %v1976_v3   ;;  %449 = vperm.xlu0 %1662, %v1976_v3  }
  0x5d   :  { %1648 = vset.pattern.permute.xlu1 %v1852_v28  ;;  %1665 = vset.pattern.permute.xlu0 %v1853_v29  ;;  %v136_v29 = vrot.slane %v2029_v55, %v2058_v18 }
  0x5e   :  { %295 = vperm.xlu1 %1648, %v1976_v3   ;;  %482 = vperm.xlu0 %1665, %v1976_v3  }
  0x62   :  { %1649 = vset.pattern.permute.xlu1 %v1854_v30  ;;  %1668 = vset.pattern.permute.xlu0 %v1855_v31  ;;  %v2064_v31 = vsub.s32 7, %v68_v51 }
  0x63   :  { %306 = vperm.xlu1 %1649, %v1976_v3   ;;  %515 = vperm.xlu0 %1668, %v1976_v3  }
  0x67   :  { %1651 = vset.pattern.permute.xlu1 %v1856_v32  ;;  %1671 = vset.pattern.permute.xlu0 %v1857_v33  ;;  %v2066_v33 = vld [vmem:[#allocation6 + $0x8] sm:$0xff] }
  0x68   :  { %328 = vperm.xlu1 %1651, %v1976_v3   ;;  %548 = vperm.xlu0 %1671, %v1976_v3  }
  0x6c   :  { %1652 = vset.pattern.permute.xlu1 %v1858_v34  ;;  %1674 = vset.pattern.permute.xlu0 %v1859_v35 }
  0x6d   :  { %339 = vperm.xlu1 %1652, %v1976_v3   ;;  %581 = vperm.xlu0 %1674, %v1976_v3  }
  0x71   :  { %1654 = vset.pattern.permute.xlu1 %v1860_v36  ;;  %1677 = vset.pattern.permute.xlu0 %v1861_v37 }
  0x72   :  { %361 = vperm.xlu1 %1654, %v1976_v3   ;;  %614 = vperm.xlu0 %1677, %v1976_v3  }
  0x76   :  { %1655 = vset.pattern.permute.xlu1 %v1862_v38  ;;  %1680 = vset.pattern.permute.xlu0 %v1863_v39  ;;  %v1882_v38 = vmov 43   ;;  %v147_v39 = vrot.slane %v2029_v55, %v2064_v31 }
  0x77   :  { %372 = vperm.xlu1 %1655, %v1976_v3   ;;  %647 = vperm.xlu0 %1680, %v1976_v3  }
  0x7b   :  { %1657 = vset.pattern.permute.xlu1 %v1864_v40  ;;  %1683 = vset.pattern.permute.xlu0 %v1865_v41  ;;  %v158_v40 = vrot.slane %v2066_v33, %v2026_v52 }
  0x7c   :  { %394 = vperm.xlu1 %1657, %v1976_v3   ;;  %680 = vperm.xlu0 %1683, %v1976_v3  }
  0x80   :  { %1658 = vset.pattern.permute.xlu1 %v1866_v42  ;;  %1686 = vset.pattern.permute.xlu0 %v1867_v43 }
  0x81   :  { %405 = vperm.xlu1 %1658, %v1976_v3   ;;  %713 = vperm.xlu0 %1686, %v1976_v3  }
  0x85   :  { %1660 = vset.pattern.permute.xlu1 %v1868_v44  ;;  %1689 = vset.pattern.permute.xlu0 %v1869_v45  ;;  %v1883_v45 = vmov 83  }
  0x86   :  { %427 = vperm.xlu1 %1660, %v1976_v3   ;;  %746 = vperm.xlu0 %1689, %v1976_v3  }
  0x8a   :  { %1661 = vset.pattern.permute.xlu1 %v1870_v46  ;;  %1692 = vset.pattern.permute.xlu0 %v1871_v47  ;;  %v1884_v47 = vmov 45  }
  0x8b   :  { %438 = vperm.xlu1 %1661, %v1976_v3   ;;  %779 = vperm.xlu0 %1692, %v1976_v3  }
  0x8f   :  { %1663 = vset.pattern.permute.xlu1 %v1872_v49  ;;  %1695 = vset.pattern.permute.xlu0 %v1873_v50  ;;  %v169_v49 = vrot.slane %v2066_v33, %v2036_v58 }
  0x90   :  { %460 = vperm.xlu1 %1663, %v1976_v3   ;;  %812 = vperm.xlu0 %1695, %v1976_v3  }
  0x94   :  { %1664 = vset.pattern.permute.xlu1 %v1874_v53  ;;  %1698 = vset.pattern.permute.xlu0 %v1875_v54 }
  0x95   :  { %471 = vperm.xlu1 %1664, %v1976_v3   ;;  %845 = vperm.xlu0 %1698, %v1976_v3  }
  0x98   :  { %v87_v59 = vpop.permute.xlu1 %86  ;;  %v65_v60 = vpop.permute.xlu0 %64 }
  0x99   :  { %1666 = vset.pattern.permute.xlu1 %v1876_v62  ;;  %1701 = vset.pattern.permute.xlu0 %v1877_v63  ;;  %v71_v1 = vmul.f32 %v70_v57, %v65_v60  ;;  %v93_v9 = vmul.f32 %v92_v0, %v87_v59  ;;  %v1885_v59 = vmov 46   ;;  %v180_v60 = vrot.slane %v2066_v33, %v2032_v56 }
  0x9a   :  { %493 = vperm.xlu1 %1666, %v1976_v3   ;;  %878 = vperm.xlu0 %1701, %v1976_v3   ;;  %v191_v62 = vrot.slane %v2066_v33, %v2038_v61 }
  0x9b   :  { %v72_v10 = vadd.f32 1.0, %v71_v1  ;;  %v94_v19 = vadd.f32 1.0, %v93_v9 }
  0x9d   :  { %v98_v7 = vpop.permute.xlu1 %97  ;;  %v76_v8 = vpop.permute.xlu0 %75 }
  0x9e   :  { %v82_v11 = vmul.f32 %v81_v2, %v76_v8  ;;  %1667 = vset.pattern.permute.xlu1 %v1878_v12  ;;  %1704 = vset.pattern.permute.xlu0 %v1879_v13  ;;  %v104_v16 = vmul.f32 %v103_v6, %v98_v7  ;;  %v1886_v6 = vmov 86   ;;  %v1887_v8 = vmov 48  }
  0x9f   :  { %504 = vperm.xlu1 %1667, %v1976_v3   ;;  %911 = vperm.xlu0 %1704, %v1976_v3  }
  0xa0   :  { %v83_v17 = vadd.f32 1.0, %v82_v11  ;;  %v105_v27 = vadd.f32 1.0, %v104_v16 }
  0xa2   :  { %v84_v20 = vmul.f32 %v83_v17, %v72_v10  ;;  %v109_v21 = vpop.permute.xlu1 %108  ;;  %v120_v22 = vpop.permute.xlu0 %119  ;;  %v202_v10 = vrot.slane %v2066_v33, %v2046_v4  ;;  %v1888_v17 = vmov 49  }
  0xa3   :  { %v115_v23 = vmul.f32 %v114_v14, %v109_v21  ;;  %1669 = vset.pattern.permute.xlu1 %v1880_v24  ;;  %v126_v25 = vmul.f32 %v125_v15, %v120_v22  ;;  %1707 = vset.pattern.permute.xlu0 %v1881_v26 }
  0xa4   :  { %v95_v28 = vmul.f32 %v94_v19, %v84_v20  ;;  %526 = vperm.xlu1 %1669, %v1976_v3   ;;  %944 = vperm.xlu0 %1707, %v1976_v3   ;;  %v213_v19 = vrot.slane %v2066_v33, %v2048_v5  ;;  %v224_v20 = vrot.slane %v2066_v33, %v2058_v18 }
  0xa5   :  { %v116_v30 = vadd.f32 1.0, %v115_v23  ;;  %v127_v34 = vadd.f32 1.0, %v126_v25  ;;  %v1889_v25 = vmov 89  }
  0xa6   :  { %v106_v32 = vmul.f32 %v105_v27, %v95_v28  ;;  %v1890_v27 = vmov 51  }
  0xa7   :  { %v131_v35 = vpop.permute.xlu1 %130  ;;  %v153_v41 = vpop.permute.xlu0 %152 }
  0xa8   :  { %v117_v36 = vmul.f32 %v116_v30, %v106_v32  ;;  %v137_v37 = vmul.f32 %v136_v29, %v131_v35  ;;  %1670 = vset.pattern.permute.xlu1 %v1882_v38  ;;  %1710 = vset.pattern.permute.xlu0 %v1883_v45  ;;  %v159_v48 = vmul.f32 %v158_v40, %v153_v41  ;;  %v1892_v45 = vmov 92  }
  0xa9   :  { %537 = vperm.xlu1 %1670, %v1976_v3   ;;  %977 = vperm.xlu0 %1710, %v1976_v3   ;;  %v235_v29 = vrot.slane %v2066_v33, %v2064_v31 }
  0xaa   :  { %v128_v42 = vmul.f32 %v127_v34, %v117_v36  ;;  %v138_v43 = vadd.f32 1.0, %v137_v37  ;;  %v160_v54 = vadd.f32 1.0, %v159_v48  ;;  %v2095_v34 = vld [vmem:[#allocation6 + $0x10] sm:$0xff] }
  0xab   :  { %v246_v40 = vrot.slane %v2095_v34, %v2026_v52  ;;  %v257_v41 = vrot.slane %v2095_v34, %v2036_v58 }
  0xac   :  { %v142_v44 = vpop.permute.xlu1 %141  ;;  %v139_v50 = vmul.f32 %v138_v43, %v128_v42  ;;  %v186_v63 = vpop.permute.xlu0 %185 }
  0xad   :  { %v148_v46 = vmul.f32 %v147_v39, %v142_v44  ;;  %1672 = vset.pattern.permute.xlu1 %v1884_v47  ;;  %1713 = vset.pattern.permute.xlu0 %v1886_v6  ;;  %v192_v9 = vmul.f32 %v191_v62, %v186_v63  ;;  %v1891_v39 = vmov 52   ;;  %v1893_v47 = vmov 54  }
  0xae   :  { %559 = vperm.xlu1 %1672, %v1976_v3   ;;  %1010 = vperm.xlu0 %1713, %v1976_v3   ;;  %v290_v62 = vrot.slane %v2095_v34, %v2046_v4  ;;  %v1895_v6 = vmov 95  }
  0xaf   :  { %v149_v51 = vadd.f32 1.0, %v148_v46  ;;  %v193_v14 = vadd.f32 1.0, %v192_v9 }
  0xb1   :  { %v150_v53 = vmul.f32 %v149_v51, %v139_v50  ;;  %v164_v55 = vpop.permute.xlu1 %163  ;;  %v219_v21 = vpop.permute.xlu0 %218 }
  0xb2   :  { %v170_v57 = vmul.f32 %v169_v49, %v164_v55  ;;  %1673 = vset.pattern.permute.xlu1 %v1885_v59  ;;  %1716 = vset.pattern.permute.xlu0 %v1889_v25  ;;  %v225_v28 = vmul.f32 %v224_v20, %v219_v21  ;;  %v268_v49 = vrot.slane %v2095_v34, %v2032_v56  ;;  %v1894_v59 = vmov 55  }
  0xb3   :  { %570 = vperm.xlu1 %1673, %v1976_v3   ;;  %v161_v0 = vmul.f32 %v160_v54, %v150_v53  ;;  %1043 = vperm.xlu0 %1716, %v1976_v3   ;;  %v323_v20 = vrot.slane %v2095_v34, %v2064_v31 }
  0xb4   :  { %v171_v1 = vadd.f32 1.0, %v170_v57  ;;  %v226_v36 = vadd.f32 1.0, %v225_v28  ;;  %v1899_v28 = vmov 60  }
  0xb6   :  { %v175_v2 = vpop.permute.xlu1 %174  ;;  %v172_v11 = vmul.f32 %v171_v1, %v161_v0  ;;  %v252_v42 = vpop.permute.xlu0 %251 }
  0xb7   :  { %v181_v7 = vmul.f32 %v180_v60, %v175_v2  ;;  %1675 = vset.pattern.permute.xlu1 %v1887_v8  ;;  %1719 = vset.pattern.permute.xlu0 %v1892_v45  ;;  %v258_v48 = vmul.f32 %v257_v41, %v252_v42  ;;  %v279_v60 = vrot.slane %v2095_v34, %v2038_v61  ;;  %v1896_v8 = vmov 57  }
  0xb8   :  { %592 = vperm.xlu1 %1675, %v1976_v3   ;;  %1076 = vperm.xlu0 %1719, %v1976_v3   ;;  %v1901_v45 = vmov 101  }
  0xb9   :  { %v182_v12 = vadd.f32 1.0, %v181_v7  ;;  %v259_v54 = vadd.f32 1.0, %v258_v48 }
  0xbb   :  { %v183_v13 = vmul.f32 %v182_v12, %v172_v11  ;;  %v197_v15 = vpop.permute.xlu1 %196  ;;  %v285_v63 = vpop.permute.xlu0 %284 }
  0xbc   :  { %v203_v16 = vmul.f32 %v202_v10, %v197_v15  ;;  %1676 = vset.pattern.permute.xlu1 %v1888_v17  ;;  %1722 = vset.pattern.permute.xlu0 %v1895_v6  ;;  %v291_v9 = vmul.f32 %v290_v62, %v285_v63  ;;  %v301_v10 = vrot.slane %v2095_v34, %v2048_v5  ;;  %v1897_v17 = vmov 58  }
  0xbd   :  { %603 = vperm.xlu1 %1676, %v1976_v3   ;;  %v194_v22 = vmul.f32 %v193_v14, %v183_v13  ;;  %1109 = vperm.xlu0 %1722, %v1976_v3  }
  0xbe   :  { %v204_v23 = vadd.f32 1.0, %v203_v16  ;;  %v292_v14 = vadd.f32 1.0, %v291_v9  ;;  %v1905_v9 = vmov 66  }
  0xc0   :  { %v208_v24 = vpop.permute.xlu1 %207  ;;  %v205_v30 = vmul.f32 %v204_v23, %v194_v22  ;;  %v318_v21 = vpop.permute.xlu0 %317 }
  0xc1   :  { %v214_v26 = vmul.f32 %v213_v19, %v208_v24  ;;  %1678 = vset.pattern.permute.xlu1 %v1890_v27  ;;  %v312_v19 = vrot.slane %v2095_v34, %v2058_v18  ;;  %v2120_v24 = vld [vmem:[#allocation6 + $0x18] sm:$0xff] }
  0xc2   :  { %625 = vperm.xlu1 %1678, %v1976_v3   ;;  %v356_v41 = vrot.slane %v2120_v24, %v2032_v56  ;;  %v378_v63 = vrot.slane %v2120_v24, %v2046_v4 }
  0xc3   :  { %v215_v32 = vadd.f32 1.0, %v214_v26  ;;  %v1898_v26 = vmov 98  }
  0xc4   :  { %1725 = vset.pattern.permute.xlu0 %v1898_v26 }
  0xc5   :  { %v216_v35 = vmul.f32 %v215_v32, %v205_v30  ;;  %v230_v37 = vpop.permute.xlu1 %229  ;;  %1142 = vperm.xlu0 %1725, %v1976_v3   ;;  %v334_v30 = vrot.slane %v2120_v24, %v2026_v52  ;;  %v351_v42 = vpop.permute.xlu0 %350 }
  0xc6   :  { %v236_v38 = vmul.f32 %v235_v29, %v230_v37  ;;  %1679 = vset.pattern.permute.xlu1 %v1891_v39  ;;  %v324_v29 = vmul.f32 %v323_v20, %v318_v21  ;;  %v1900_v39 = vmov 61   ;;  %v357_v48 = vmul.f32 %v356_v41, %v351_v42 }
  0xc7   :  { %636 = vperm.xlu1 %1679, %v1976_v3   ;;  %v227_v33 = vmul.f32 %v226_v36, %v216_v35  ;;  %v1906_v20 = vmov 67  }
  0xc8   :  { %v237_v43 = vadd.f32 1.0, %v236_v38  ;;  %v325_v36 = vadd.f32 1.0, %v324_v29  ;;  %v1907_v29 = vmov 107  }
  0xc9   :  { %1728 = vset.pattern.permute.xlu0 %v1901_v45 }
  0xca   :  { %v241_v44 = vpop.permute.xlu1 %240  ;;  %v238_v50 = vmul.f32 %v237_v43, %v227_v33  ;;  %1175 = vperm.xlu0 %1728, %v1976_v3   ;;  %v384_v62 = vpop.permute.xlu0 %383 }
  0xcb   :  { %v247_v46 = vmul.f32 %v246_v40, %v241_v44  ;;  %1681 = vset.pattern.permute.xlu1 %v1893_v47  ;;  %v345_v40 = vrot.slane %v2120_v24, %v2036_v58  ;;  %v1902_v47 = vmov 63  }
  0xcc   :  { %658 = vperm.xlu1 %1681, %v1976_v3  }
  0xcd   :  { %v248_v51 = vadd.f32 1.0, %v247_v46 }
  0xcf   :  { %v249_v53 = vmul.f32 %v248_v51, %v238_v50  ;;  %v263_v55 = vpop.permute.xlu1 %262  ;;  %v417_v21 = vpop.permute.xlu0 %416 }
  0xd0   :  { %v269_v57 = vmul.f32 %v268_v49, %v263_v55  ;;  %1682 = vset.pattern.permute.xlu1 %v1894_v59  ;;  %v367_v49 = vrot.slane %v2120_v24, %v2038_v61 }
  0xd1   :  { %669 = vperm.xlu1 %1682, %v1976_v3   ;;  %v260_v0 = vmul.f32 %v259_v54, %v249_v53  ;;  %v358_v54 = vadd.f32 1.0, %v357_v48  ;;  %v1911_v48 = vmov 72  }
  0xd2   :  { %v270_v1 = vadd.f32 1.0, %v269_v57  ;;  %v389_v57 = vrot.slane %v2120_v24, %v2048_v5 }
  0xd4   :  { %v274_v2 = vpop.permute.xlu1 %273  ;;  %v271_v11 = vmul.f32 %v270_v1, %v260_v0 }
  0xd5   :  { %v280_v7 = vmul.f32 %v279_v60, %v274_v2  ;;  %1684 = vset.pattern.permute.xlu1 %v1896_v8  ;;  %v1903_v60 = vmov 64   ;;  %v390_v2 = vmul.f32 %v389_v57, %v384_v62 }
  0xd6   :  { %691 = vperm.xlu1 %1684, %v1976_v3  }
  0xd7   :  { %v281_v12 = vadd.f32 1.0, %v280_v7  ;;  %v1904_v7 = vmov 104  }
  0xd8   :  { %1731 = vset.pattern.permute.xlu0 %v1904_v7 }
  0xd9   :  { %v282_v13 = vmul.f32 %v281_v12, %v271_v11  ;;  %v296_v15 = vpop.permute.xlu1 %295  ;;  %1208 = vperm.xlu0 %1731, %v1976_v3   ;;  %v2144_v11 = vld [vmem:[#allocation6 + $0x20] sm:$0xff] }
  0xda   :  { %v302_v16 = vmul.f32 %v301_v10, %v296_v15  ;;  %1685 = vset.pattern.permute.xlu1 %v1897_v17  ;;  %v400_v10 = vrot.slane %v2120_v24, %v2058_v18  ;;  %v422_v17 = vrot.slane %v2144_v11, %v2026_v52  ;;  %v444_v41 = vrot.slane %v2144_v11, %v2032_v56 }
  0xdb   :  { %702 = vperm.xlu1 %1685, %v1976_v3   ;;  %v293_v22 = vmul.f32 %v292_v14, %v282_v13  ;;  %v391_v14 = vadd.f32 1.0, %v390_v2  ;;  %v455_v42 = vrot.slane %v2144_v11, %v2038_v61  ;;  %v488_v62 = vrot.slane %v2144_v11, %v2058_v18 }
  0xdc   :  { %v303_v23 = vadd.f32 1.0, %v302_v16  ;;  %v423_v26 = vmul.f32 %v422_v17, %v417_v21 }
  0xdd   :  { %1734 = vset.pattern.permute.xlu0 %v1907_v29  ;;  %v1917_v29 = vmov 78  }
  0xde   :  { %v307_v25 = vpop.permute.xlu1 %306  ;;  %v304_v32 = vmul.f32 %v303_v23, %v293_v22  ;;  %v411_v23 = vrot.slane %v2120_v24, %v2064_v31  ;;  %1241 = vperm.xlu0 %1734, %v1976_v3  }
  0xdf   :  { %v313_v27 = vmul.f32 %v312_v19, %v307_v25  ;;  %1687 = vset.pattern.permute.xlu1 %v1899_v28 }
  0xe0   :  { %724 = vperm.xlu1 %1687, %v1976_v3  }
  0xe1   :  { %v314_v34 = vadd.f32 1.0, %v313_v27 }
  0xe3   :  { %v315_v35 = vmul.f32 %v314_v34, %v304_v32  ;;  %v329_v37 = vpop.permute.xlu1 %328  ;;  %v1908_v32 = vmov 69   ;;  %v433_v34 = vrot.slane %v2144_v11, %v2036_v58 }
  0xe4   :  { %v335_v38 = vmul.f32 %v334_v30, %v329_v37  ;;  %1688 = vset.pattern.permute.xlu1 %v1900_v39  ;;  %v1909_v39 = vmov 70  }
  0xe5   :  { %735 = vperm.xlu1 %1688, %v1976_v3   ;;  %v326_v33 = vmul.f32 %v325_v36, %v315_v35  ;;  %v424_v36 = vadd.f32 1.0, %v423_v26 }
  0xe6   :  { %v336_v43 = vadd.f32 1.0, %v335_v38 }
  0xe8   :  { %v340_v44 = vpop.permute.xlu1 %339  ;;  %v337_v50 = vmul.f32 %v336_v43, %v326_v33  ;;  %v450_v43 = vpop.permute.xlu0 %449 }
  0xe9   :  { %v346_v46 = vmul.f32 %v345_v40, %v340_v44  ;;  %1690 = vset.pattern.permute.xlu1 %v1902_v47 }
  0xea   :  { %757 = vperm.xlu1 %1690, %v1976_v3  }
  0xeb   :  { %v347_v51 = vadd.f32 1.0, %v346_v46  ;;  %v1910_v46 = vmov 110  }
  0xec   :  { %1737 = vset.pattern.permute.xlu0 %v1910_v46 }
  0xed   :  { %v348_v53 = vmul.f32 %v347_v51, %v337_v50  ;;  %v362_v55 = vpop.permute.xlu1 %361  ;;  %1274 = vperm.xlu0 %1737, %v1976_v3   ;;  %v466_v50 = vrot.slane %v2144_v11, %v2046_v4 }
  0xee   :  { %v368_v59 = vmul.f32 %v367_v49, %v362_v55  ;;  %1691 = vset.pattern.permute.xlu1 %v1903_v60  ;;  %v456_v49 = vmul.f32 %v455_v42, %v450_v43  ;;  %v477_v60 = vrot.slane %v2144_v11, %v2048_v5 }
  0xef   :  { %768 = vperm.xlu1 %1691, %v1976_v3   ;;  %v359_v0 = vmul.f32 %v358_v54, %v348_v53 }
  0xf0   :  { %v369_v1 = vadd.f32 1.0, %v368_v59  ;;  %v457_v54 = vadd.f32 1.0, %v456_v49  ;;  %v1912_v59 = vmov 73  }
  0xf2   :  { %v373_v6 = vpop.permute.xlu1 %372  ;;  %v370_v12 = vmul.f32 %v369_v1, %v359_v0 }
  0xf3   :  { %v379_v8 = vmul.f32 %v378_v63, %v373_v6  ;;  %1693 = vset.pattern.permute.xlu1 %v1905_v9  ;;  %v483_v63 = vpop.permute.xlu0 %482  ;;  %v1913_v6 = vmov 113  }
  0xf4   :  { %790 = vperm.xlu1 %1693, %v1976_v3   ;;  %1740 = vset.pattern.permute.xlu0 %v1913_v6  ;;  %v489_v9 = vmul.f32 %v488_v62, %v483_v63 }
  0xf5   :  { %v380_v13 = vadd.f32 1.0, %v379_v8  ;;  %v1914_v8 = vmov 75   ;;  %1307 = vperm.xlu0 %1740, %v1976_v3  }
  0xf7   :  { %v381_v15 = vmul.f32 %v380_v13, %v370_v12  ;;  %v395_v16 = vpop.permute.xlu1 %394 }
  0xf8   :  { %v401_v19 = vmul.f32 %v400_v10, %v395_v16  ;;  %1694 = vset.pattern.permute.xlu1 %v1906_v20  ;;  %v499_v10 = vrot.slane %v2144_v11, %v2064_v31  ;;  %v490_v16 = vadd.f32 1.0, %v489_v9  ;;  %v1915_v20 = vmov 76  }
  0xf9   :  { %v392_v22 = vmul.f32 %v391_v14, %v381_v15  ;;  %801 = vperm.xlu1 %1694, %v1976_v3   ;;  %v2173_v14 = vld [vmem:[#allocation6 + $0x28] sm:$0xff]  ;;  %v1923_v9 = vmov 84  }
  0xfa   :  { %v402_v25 = vadd.f32 1.0, %v401_v19  ;;  %v510_v21 = vrot.slane %v2173_v14, %v2026_v52  ;;  %v565_v49 = vrot.slane %v2173_v14, %v2048_v5  ;;  %v587_v62 = vrot.slane %v2173_v14, %v2064_v31 }
  0xfc   :  { %v403_v27 = vmul.f32 %v402_v25, %v392_v22  ;;  %v406_v28 = vpop.permute.xlu1 %405  ;;  %v521_v22 = vrot.slane %v2173_v14, %v2036_v58 }
  0xfd   :  { %v412_v30 = vmul.f32 %v411_v23, %v406_v28  ;;  %1696 = vset.pattern.permute.xlu1 %v1908_v32  ;;  %v516_v23 = vpop.permute.xlu0 %515  ;;  %v532_v32 = vrot.slane %v2173_v14, %v2032_v56 }
  0xfe   :  { %823 = vperm.xlu1 %1696, %v1976_v3  }
  0xff   :  { %v413_v35 = vadd.f32 1.0, %v412_v30  ;;  %v522_v30 = vmul.f32 %v521_v22, %v516_v23 }
 0x101   :  { %v414_v37 = vmul.f32 %v413_v35, %v403_v27  ;;  %v428_v24 = vpop.permute.xlu1 %427  ;;  %v1916_v27 = vmov 116   ;;  %v549_v42 = vpop.permute.xlu0 %548 }
 0x102   :  { %v434_v38 = vmul.f32 %v433_v34, %v428_v24  ;;  %1697 = vset.pattern.permute.xlu1 %v1909_v39  ;;  %1743 = vset.pattern.permute.xlu0 %v1916_v27  ;;  %v1918_v39 = vmov 79   ;;  %v1925_v27 = vmov 125  }
 0x103   :  { %v425_v40 = vmul.f32 %v424_v36, %v414_v37  ;;  %834 = vperm.xlu1 %1697, %v1976_v3   ;;  %1340 = vperm.xlu0 %1743, %v1976_v3   ;;  %v523_v37 = vadd.f32 1.0, %v522_v30 }
 0x104   :  { %v435_v33 = vadd.f32 1.0, %v434_v38 }
 0x105   :  { %v582_v63 = vpop.permute.xlu0 %581 }
 0x106   :  { %v436_v44 = vmul.f32 %v435_v33, %v425_v40  ;;  %v439_v45 = vpop.permute.xlu1 %438  ;;  %v543_v40 = vrot.slane %v2173_v14, %v2038_v61 }
 0x107   :  { %v445_v47 = vmul.f32 %v444_v41, %v439_v45  ;;  %1699 = vset.pattern.permute.xlu1 %v1911_v48  ;;  %v554_v41 = vrot.slane %v2173_v14, %v2046_v4  ;;  %v1919_v45 = vmov 119  }
 0x108   :  { %856 = vperm.xlu1 %1699, %v1976_v3   ;;  %1746 = vset.pattern.permute.xlu0 %v1919_v45 }
 0x109   :  { %v446_v51 = vadd.f32 1.0, %v445_v47  ;;  %v1920_v47 = vmov 81   ;;  %v555_v48 = vmul.f32 %v554_v41, %v549_v42  ;;  %1373 = vperm.xlu0 %1746, %v1976_v3   ;;  %v615_v23 = vpop.permute.xlu0 %614 }
 0x10b   :  { %v447_v53 = vmul.f32 %v446_v51, %v436_v44  ;;  %v461_v55 = vpop.permute.xlu1 %460 }
 0x10c   :  { %v467_v57 = vmul.f32 %v466_v50, %v461_v55  ;;  %1700 = vset.pattern.permute.xlu1 %v1912_v59  ;;  %v1921_v59 = vmov 82  }
 0x10d   :  { %867 = vperm.xlu1 %1700, %v1976_v3   ;;  %v458_v0 = vmul.f32 %v457_v54, %v447_v53  ;;  %v556_v54 = vadd.f32 1.0, %v555_v48  ;;  %v648_v42 = vpop.permute.xlu0 %647 }
 0x10e   :  { %v468_v1 = vadd.f32 1.0, %v467_v57 }
 0x110   :  { %v472_v2 = vpop.permute.xlu1 %471  ;;  %v469_v12 = vmul.f32 %v468_v1, %v458_v0 }
 0x111   :  { %v478_v7 = vmul.f32 %v477_v60, %v472_v2  ;;  %1702 = vset.pattern.permute.xlu1 %v1914_v8  ;;  %v576_v60 = vrot.slane %v2173_v14, %v2058_v18  ;;  %v2198_v2 = vld [vmem:[#allocation6 + $0x30] sm:$0xff] }
 0x112   :  { %889 = vperm.xlu1 %1702, %v1976_v3   ;;  %v620_v22 = vrot.slane %v2198_v2, %v2032_v56  ;;  %v653_v41 = vrot.slane %v2198_v2, %v2048_v5 }
 0x113   :  { %v479_v13 = vadd.f32 1.0, %v478_v7  ;;  %v1922_v7 = vmov 122  }
 0x114   :  { %1749 = vset.pattern.permute.xlu0 %v1922_v7  ;;  %v621_v30 = vmul.f32 %v620_v22, %v615_v23  ;;  %v654_v48 = vmul.f32 %v653_v41, %v648_v42 }
 0x115   :  { %v480_v15 = vmul.f32 %v479_v13, %v469_v12  ;;  %v494_v17 = vpop.permute.xlu1 %493  ;;  %1406 = vperm.xlu0 %1749, %v1976_v3   ;;  %v598_v12 = vrot.slane %v2198_v2, %v2026_v52 }
 0x116   :  { %v500_v19 = vmul.f32 %v499_v10, %v494_v17  ;;  %1703 = vset.pattern.permute.xlu1 %v1915_v20  ;;  %v588_v10 = vmul.f32 %v587_v62, %v582_v63  ;;  %v1924_v20 = vmov 85   ;;  %v675_v62 = vrot.slane %v2198_v2, %v2064_v31 }
 0x117   :  { %900 = vperm.xlu1 %1703, %v1976_v3   ;;  %v491_v11 = vmul.f32 %v490_v16, %v480_v15 }
 0x118   :  { %v501_v25 = vadd.f32 1.0, %v500_v19  ;;  %v589_v16 = vadd.f32 1.0, %v588_v10 }
 0x119   :  { %1752 = vset.pattern.permute.xlu0 %v1925_v27  ;;  %v1933_v27 = vmov 96  }
 0x11a   :  { %v505_v26 = vpop.permute.xlu1 %504  ;;  %v502_v34 = vmul.f32 %v501_v25, %v491_v11  ;;  %1439 = vperm.xlu0 %1752, %v1976_v3  }
 0x11b   :  { %v511_v28 = vmul.f32 %v510_v21, %v505_v26  ;;  %1705 = vset.pattern.permute.xlu1 %v1917_v29  ;;  %v609_v21 = vrot.slane %v2198_v2, %v2036_v58  ;;  %v1926_v29 = vmov 87  }
 0x11c   :  { %922 = vperm.xlu1 %1705, %v1976_v3  }
 0x11d   :  { %v512_v35 = vadd.f32 1.0, %v511_v28 }
 0x11f   :  { %v513_v36 = vmul.f32 %v512_v35, %v502_v34  ;;  %v527_v24 = vpop.permute.xlu1 %526 }
 0x120   :  { %v533_v38 = vmul.f32 %v532_v32, %v527_v24  ;;  %1706 = vset.pattern.permute.xlu1 %v1918_v39  ;;  %v631_v32 = vrot.slane %v2198_v2, %v2038_v61  ;;  %v1927_v39 = vmov 88  }
 0x121   :  { %933 = vperm.xlu1 %1706, %v1976_v3   ;;  %v524_v33 = vmul.f32 %v523_v37, %v513_v36  ;;  %v622_v37 = vadd.f32 1.0, %v621_v30 }
 0x122   :  { %v534_v43 = vadd.f32 1.0, %v533_v38 }
 0x124   :  { %v538_v44 = vpop.permute.xlu1 %537  ;;  %v535_v50 = vmul.f32 %v534_v43, %v524_v33  ;;  %v1928_v33 = vmov 127  }
 0x125   :  { %v544_v46 = vmul.f32 %v543_v40, %v538_v44  ;;  %1708 = vset.pattern.permute.xlu1 %v1920_v47  ;;  %v642_v40 = vrot.slane %v2198_v2, %v2046_v4  ;;  %1755 = vset.pattern.permute.xlu0 %v1928_v33  ;;  %v1929_v47 = vmov 90  }
 0x126   :  { %955 = vperm.xlu1 %1708, %v1976_v3  }
 0x127   :  { %v545_v51 = vadd.f32 1.0, %v544_v46 }
 0x129   :  { %v546_v53 = vmul.f32 %v545_v51, %v535_v50  ;;  %v560_v55 = vpop.permute.xlu1 %559 }
 0x12a   :  { %v566_v57 = vmul.f32 %v565_v49, %v560_v55  ;;  %1709 = vset.pattern.permute.xlu1 %v1921_v59  ;;  %v664_v49 = vrot.slane %v2198_v2, %v2058_v18  ;;  %v655_v55 = vadd.f32 1.0, %v654_v48 }
 0x12b   :  { %966 = vperm.xlu1 %1709, %v1976_v3   ;;  %v557_v0 = vmul.f32 %v556_v54, %v546_v53  ;;  %v2222_v53 = vld [vmem:[#allocation6 + $0x38] sm:$0xff] }
 0x12c   :  { %v567_v1 = vadd.f32 1.0, %v566_v57  ;;  %v686_v63 = vrot.slane %v2222_v53, %v2026_v52 }
 0x12e   :  { %v571_v6 = vpop.permute.xlu1 %570  ;;  %v568_v13 = vmul.f32 %v567_v1, %v557_v0  ;;  %v681_v0 = vpop.permute.xlu0 %680 }
 0x12f   :  { %v577_v8 = vmul.f32 %v576_v60, %v571_v6  ;;  %1711 = vset.pattern.permute.xlu1 %v1923_v9  ;;  %v1930_v60 = vmov 91   ;;  %v1931_v9 = vmov 93   ;;  %v687_v10 = vmul.f32 %v686_v63, %v681_v0 }
 0x130   :  { %988 = vperm.xlu1 %1711, %v1976_v3  }
 0x131   :  { %v578_v14 = vadd.f32 1.0, %v577_v8  ;;  %v688_v2 = vadd.f32 1.0, %v687_v10 }
 0x132   :  { %v714_v22 = vpop.permute.xlu0 %713 }
 0x133   :  { %v579_v15 = vmul.f32 %v578_v14, %v568_v13  ;;  %v593_v17 = vpop.permute.xlu1 %592 }
 0x134   :  { %v599_v19 = vmul.f32 %v598_v12, %v593_v17  ;;  %1712 = vset.pattern.permute.xlu1 %v1924_v20  ;;  %v697_v12 = vrot.slane %v2222_v53, %v2036_v58  ;;  %v708_v20 = vrot.slane %v2222_v53, %v2032_v56 }
 0x135   :  { %999 = vperm.xlu1 %1712, %v1976_v3   ;;  %v590_v11 = vmul.f32 %v589_v16, %v579_v15 }
 0x136   :  { %v600_v25 = vadd.f32 1.0, %v599_v19  ;;  %v1932_v19 = vmov 94  }
 0x138   :  { %v604_v26 = vpop.permute.xlu1 %603  ;;  %v601_v34 = vmul.f32 %v600_v25, %v590_v11 }
 0x139   :  { %v610_v28 = vmul.f32 %v609_v21, %v604_v26  ;;  %1714 = vset.pattern.permute.xlu1 %v1926_v29  ;;  %v719_v21 = vrot.slane %v2222_v53, %v2038_v61  ;;  %v730_v29 = vrot.slane %v2222_v53, %v2046_v4 }
 0x13a   :  { %1021 = vperm.xlu1 %1714, %v1976_v3  }
 0x13b   :  { %v611_v35 = vadd.f32 1.0, %v610_v28  ;;  %v720_v28 = vmul.f32 %v719_v21, %v714_v22 }
 0x13d   :  { %v612_v36 = vmul.f32 %v611_v35, %v601_v34  ;;  %v626_v24 = vpop.permute.xlu1 %625  ;;  %v721_v35 = vadd.f32 1.0, %v720_v28 }
 0x13e   :  { %v632_v38 = vmul.f32 %v631_v32, %v626_v24  ;;  %1715 = vset.pattern.permute.xlu1 %v1927_v39  ;;  %v1934_v24 = vmov 97   ;;  %v752_v39 = vrot.slane %v2222_v53, %v2058_v18 }
 0x13f   :  { %1032 = vperm.xlu1 %1715, %v1976_v3   ;;  %v623_v43 = vmul.f32 %v622_v37, %v612_v36 }
 0x140   :  { %v633_v44 = vadd.f32 1.0, %v632_v38  ;;  %v741_v38 = vrot.slane %v2222_v53, %v2048_v5 }
 0x142   :  { %v637_v45 = vpop.permute.xlu1 %636  ;;  %v634_v50 = vmul.f32 %v633_v44, %v623_v43 }
 0x143   :  { %v643_v46 = vmul.f32 %v642_v40, %v637_v45  ;;  %1717 = vset.pattern.permute.xlu1 %v1929_v47  ;;  %v747_v40 = vpop.permute.xlu0 %746  ;;  %v1935_v45 = vmov 99   ;;  %v763_v47 = vrot.slane %v2222_v53, %v2064_v31 }
 0x144   :  { %1054 = vperm.xlu1 %1717, %v1976_v3  }
 0x145   :  { %v644_v51 = vadd.f32 1.0, %v643_v46  ;;  %v753_v46 = vmul.f32 %v752_v39, %v747_v40 }
 0x147   :  { %v645_v54 = vmul.f32 %v644_v51, %v634_v50  ;;  %v659_v57 = vpop.permute.xlu1 %658  ;;  %v53_v50 = vld [vmem:[#allocation6 + $0x40] sm:$0xff]  ;;  %v780_v63 = vpop.permute.xlu0 %779 }
 0x148   :  { %v665_v59 = vmul.f32 %v664_v49, %v659_v57  ;;  %1718 = vset.pattern.permute.xlu1 %v1930_v60  ;;  %v774_v60 = vrot.slane %v53_v50, %v2026_v52 }
 0x149   :  { %1065 = vperm.xlu1 %1718, %v1976_v3   ;;  %v656_v1 = vmul.f32 %v655_v55, %v645_v54  ;;  %v754_v54 = vadd.f32 1.0, %v753_v46 }
 0x14a   :  { %v666_v6 = vadd.f32 1.0, %v665_v59  ;;  %v1936_v59 = vmov 100  }
 0x14c   :  { %v670_v7 = vpop.permute.xlu1 %669  ;;  %v667_v13 = vmul.f32 %v666_v6, %v656_v1 }
 0x14d   :  { %v676_v8 = vmul.f32 %v675_v62, %v670_v7  ;;  %1720 = vset.pattern.permute.xlu1 %v1931_v9  ;;  %v785_v62 = vrot.slane %v53_v50, %v2036_v58  ;;  %v1937_v7 = vmov 102   ;;  %v796_v9 = vrot.slane %v53_v50, %v2032_v56 }
 0x14e   :  { %1087 = vperm.xlu1 %1720, %v1976_v3  }
 0x14f   :  { %v677_v14 = vadd.f32 1.0, %v676_v8  ;;  %v786_v8 = vmul.f32 %v785_v62, %v780_v63 }
 0x151   :  { %v678_v15 = vmul.f32 %v677_v14, %v667_v13  ;;  %v692_v16 = vpop.permute.xlu1 %691  ;;  %v787_v14 = vadd.f32 1.0, %v786_v8 }
 0x152   :  { %v698_v17 = vmul.f32 %v697_v12, %v692_v16  ;;  %1721 = vset.pattern.permute.xlu1 %v1932_v19  ;;  %v1938_v16 = vmov 103   ;;  %v818_v19 = vrot.slane %v53_v50, %v2046_v4 }
 0x153   :  { %1098 = vperm.xlu1 %1721, %v1976_v3   ;;  %v689_v23 = vmul.f32 %v688_v2, %v678_v15 }
 0x154   :  { %v699_v11 = vadd.f32 1.0, %v698_v17  ;;  %v807_v17 = vrot.slane %v53_v50, %v2038_v61 }
 0x156   :  { %v703_v25 = vpop.permute.xlu1 %702  ;;  %v700_v30 = vmul.f32 %v699_v11, %v689_v23 }
 0x157   :  { %v709_v26 = vmul.f32 %v708_v20, %v703_v25  ;;  %1723 = vset.pattern.permute.xlu1 %v1933_v27  ;;  %v813_v20 = vpop.permute.xlu0 %812  ;;  %v1939_v25 = vmov 105   ;;  %v829_v27 = vrot.slane %v53_v50, %v2048_v5 }
 0x158   :  { %1120 = vperm.xlu1 %1723, %v1976_v3  }
 0x159   :  { %v710_v32 = vadd.f32 1.0, %v709_v26  ;;  %v819_v26 = vmul.f32 %v818_v19, %v813_v20 }
 0x15b   :  { %v711_v34 = vmul.f32 %v710_v32, %v700_v30  ;;  %v725_v36 = vpop.permute.xlu1 %724  ;;  %v820_v32 = vadd.f32 1.0, %v819_v26 }
 0x15c   :  { %v731_v37 = vmul.f32 %v730_v29, %v725_v36  ;;  %1724 = vset.pattern.permute.xlu1 %v1934_v24  ;;  %v1940_v36 = vmov 106   ;;  %v851_v24 = vrot.slane %v53_v50, %v2064_v31 }
 0x15d   :  { %1131 = vperm.xlu1 %1724, %v1976_v3   ;;  %v722_v41 = vmul.f32 %v721_v35, %v711_v34 }
 0x15e   :  { %v732_v42 = vadd.f32 1.0, %v731_v37  ;;  %v840_v37 = vrot.slane %v53_v50, %v2058_v18 }
 0x160   :  { %v736_v43 = vpop.permute.xlu1 %735  ;;  %v733_v48 = vmul.f32 %v732_v42, %v722_v41  ;;  %v2261_v41 = vld [vmem:[#allocation6 + $0x48] sm:$0xff] }
 0x161   :  { %v742_v44 = vmul.f32 %v741_v38, %v736_v43  ;;  %1726 = vset.pattern.permute.xlu1 %v1935_v45  ;;  %v846_v38 = vpop.permute.xlu0 %845  ;;  %v862_v46 = vrot.slane %v2261_v41, %v2026_v52 }
 0x162   :  { %1153 = vperm.xlu1 %1726, %v1976_v3   ;;  %v852_v45 = vmul.f32 %v851_v24, %v846_v38 }
 0x163   :  { %v743_v49 = vadd.f32 1.0, %v742_v44  ;;  %v1941_v44 = vmov 108  }
 0x165   :  { %v744_v51 = vmul.f32 %v743_v49, %v733_v48  ;;  %v758_v55 = vpop.permute.xlu1 %757 }
 0x166   :  { %v764_v57 = vmul.f32 %v763_v47, %v758_v55  ;;  %1727 = vset.pattern.permute.xlu1 %v1936_v59  ;;  %v1942_v55 = vmov 109   ;;  %v884_v59 = vrot.slane %v2261_v41, %v2032_v56 }
 0x167   :  { %1164 = vperm.xlu1 %1727, %v1976_v3   ;;  %v755_v0 = vmul.f32 %v754_v54, %v744_v51  ;;  %v853_v51 = vadd.f32 1.0, %v852_v45 }
 0x168   :  { %v765_v1 = vadd.f32 1.0, %v764_v57  ;;  %v873_v57 = vrot.slane %v2261_v41, %v2036_v58 }
 0x16a   :  { %v769_v6 = vpop.permute.xlu1 %768  ;;  %v766_v10 = vmul.f32 %v765_v1, %v755_v0 }
 0x16b   :  { %v775_v53 = vmul.f32 %v774_v60, %v769_v6  ;;  %1729 = vset.pattern.permute.xlu1 %v1937_v7  ;;  %v879_v60 = vpop.permute.xlu0 %878  ;;  %v1943_v6 = vmov 111   ;;  %v895_v7 = vrot.slane %v2261_v41, %v2038_v61 }
 0x16c   :  { %1186 = vperm.xlu1 %1729, %v1976_v3  }
 0x16d   :  { %v776_v12 = vadd.f32 1.0, %v775_v53  ;;  %v885_v53 = vmul.f32 %v884_v59, %v879_v60 }
 0x16f   :  { %v777_v13 = vmul.f32 %v776_v12, %v766_v10  ;;  %v791_v15 = vpop.permute.xlu1 %790  ;;  %v886_v12 = vadd.f32 1.0, %v885_v53 }
 0x170   :  { %v797_v2 = vmul.f32 %v796_v9, %v791_v15  ;;  %1730 = vset.pattern.permute.xlu1 %v1938_v16  ;;  %v1944_v15 = vmov 112   ;;  %v917_v16 = vrot.slane %v2261_v41, %v2048_v5 }
 0x171   :  { %1197 = vperm.xlu1 %1730, %v1976_v3   ;;  %v788_v21 = vmul.f32 %v787_v14, %v777_v13 }
 0x172   :  { %v798_v22 = vadd.f32 1.0, %v797_v2  ;;  %v906_v2 = vrot.slane %v2261_v41, %v2046_v4 }
 0x174   :  { %v802_v23 = vpop.permute.xlu1 %801  ;;  %v799_v28 = vmul.f32 %v798_v22, %v788_v21 }
 0x175   :  { %v808_v11 = vmul.f32 %v807_v17, %v802_v23  ;;  %1732 = vset.pattern.permute.xlu1 %v1939_v25  ;;  %v912_v17 = vpop.permute.xlu0 %911  ;;  %v1945_v23 = vmov 114   ;;  %v928_v25 = vrot.slane %v2261_v41, %v2058_v18 }
 0x176   :  { %1219 = vperm.xlu1 %1732, %v1976_v3  }
 0x177   :  { %v809_v29 = vadd.f32 1.0, %v808_v11  ;;  %v918_v11 = vmul.f32 %v917_v16, %v912_v17 }
 0x179   :  { %v810_v30 = vmul.f32 %v809_v29, %v799_v28  ;;  %v824_v34 = vpop.permute.xlu1 %823  ;;  %v2282_v28 = vld [vmem:[#allocation6 + $0x50] sm:$0xff]  ;;  %v945_v24 = vpop.permute.xlu0 %944 }
 0x17a   :  { %v830_v35 = vmul.f32 %v829_v27, %v824_v34  ;;  %1733 = vset.pattern.permute.xlu1 %v1940_v36  ;;  %v939_v36 = vrot.slane %v2261_v41, %v2064_v31  ;;  %v961_v45 = vrot.slane %v2282_v28, %v2036_v58 }
 0x17b   :  { %1230 = vperm.xlu1 %1733, %v1976_v3   ;;  %v821_v39 = vmul.f32 %v820_v32, %v810_v30  ;;  %v919_v30 = vadd.f32 1.0, %v918_v11 }
 0x17c   :  { %v831_v40 = vadd.f32 1.0, %v830_v35  ;;  %v1946_v35 = vmov 115  }
 0x17e   :  { %v835_v42 = vpop.permute.xlu1 %834  ;;  %v832_v47 = vmul.f32 %v831_v40, %v821_v39 }
 0x17f   :  { %v841_v43 = vmul.f32 %v840_v37, %v835_v42  ;;  %1735 = vset.pattern.permute.xlu1 %v1941_v44  ;;  %v950_v37 = vrot.slane %v2282_v28, %v2026_v52 }
 0x180   :  { %1252 = vperm.xlu1 %1735, %v1976_v3  }
 0x181   :  { %v842_v48 = vadd.f32 1.0, %v841_v43  ;;  %v1947_v43 = vmov 117   ;;  %v951_v44 = vmul.f32 %v950_v37, %v945_v24 }
 0x183   :  { %v843_v49 = vmul.f32 %v842_v48, %v832_v47  ;;  %v857_v50 = vpop.permute.xlu1 %856  ;;  %v952_v41 = vadd.f32 1.0, %v951_v44 }
 0x184   :  { %v863_v54 = vmul.f32 %v862_v46, %v857_v50  ;;  %1736 = vset.pattern.permute.xlu1 %v1942_v55  ;;  %v1948_v50 = vmov 118   ;;  %v983_v55 = vrot.slane %v2282_v28, %v2038_v61 }
 0x185   :  { %1263 = vperm.xlu1 %1736, %v1976_v3   ;;  %v854_v62 = vmul.f32 %v853_v51, %v843_v49 }
 0x186   :  { %v864_v63 = vadd.f32 1.0, %v863_v54  ;;  %v972_v54 = vrot.slane %v2282_v28, %v2032_v56 }
 0x188   :  { %v868_v0 = vpop.permute.xlu1 %867  ;;  %v865_v8 = vmul.f32 %v864_v63, %v854_v62 }
 0x189   :  { %v874_v1 = vmul.f32 %v873_v57, %v868_v0  ;;  %1738 = vset.pattern.permute.xlu1 %v1943_v6  ;;  %v978_v57 = vpop.permute.xlu0 %977  ;;  %v1949_v0 = vmov 120   ;;  %v994_v6 = vrot.slane %v2282_v28, %v2046_v4 }
 0x18a   :  { %1285 = vperm.xlu1 %1738, %v1976_v3  }
 0x18b   :  { %v875_v9 = vadd.f32 1.0, %v874_v1  ;;  %v984_v1 = vmul.f32 %v983_v55, %v978_v57 }
 0x18d   :  { %v876_v10 = vmul.f32 %v875_v9, %v865_v8  ;;  %v890_v13 = vpop.permute.xlu1 %889  ;;  %v985_v9 = vadd.f32 1.0, %v984_v1 }
 0x18e   :  { %v896_v14 = vmul.f32 %v895_v7, %v890_v13  ;;  %1739 = vset.pattern.permute.xlu1 %v1944_v15  ;;  %v1950_v13 = vmov 121   ;;  %v1016_v15 = vrot.slane %v2282_v28, %v2058_v18 }
 0x18f   :  { %1296 = vperm.xlu1 %1739, %v1976_v3   ;;  %v887_v19 = vmul.f32 %v886_v12, %v876_v10 }
 0x190   :  { %v897_v20 = vadd.f32 1.0, %v896_v14  ;;  %v1005_v14 = vrot.slane %v2282_v28, %v2048_v5 }
 0x192   :  { %v901_v21 = vpop.permute.xlu1 %900  ;;  %v898_v26 = vmul.f32 %v897_v20, %v887_v19 }
 0x193   :  { %v907_v22 = vmul.f32 %v906_v2, %v901_v21  ;;  %1741 = vset.pattern.permute.xlu1 %v1945_v23  ;;  %v1011_v2 = vpop.permute.xlu0 %1010  ;;  %v1951_v21 = vmov 123   ;;  %v1027_v23 = vrot.slane %v2282_v28, %v2064_v31 }
 0x194   :  { %1318 = vperm.xlu1 %1741, %v1976_v3  }
 0x195   :  { %v908_v27 = vadd.f32 1.0, %v907_v22  ;;  %v1017_v22 = vmul.f32 %v1016_v15, %v1011_v2 }
 0x197   :  { %v909_v29 = vmul.f32 %v908_v27, %v898_v26  ;;  %v923_v32 = vpop.permute.xlu1 %922  ;;  %v56_v26 = vld [vmem:[#allocation6 + $0x58] sm:$0xff]  ;;  %v1044_v37 = vpop.permute.xlu0 %1043 }
 0x198   :  { %v929_v34 = vmul.f32 %v928_v25, %v923_v32  ;;  %1742 = vset.pattern.permute.xlu1 %v1946_v35  ;;  %v1038_v35 = vrot.slane %v56_v26, %v2026_v52 }
 0x199   :  { %1329 = vperm.xlu1 %1742, %v1976_v3   ;;  %v920_v38 = vmul.f32 %v919_v30, %v909_v29  ;;  %v1018_v29 = vadd.f32 1.0, %v1017_v22 }
 0x19a   :  { %v930_v39 = vadd.f32 1.0, %v929_v34  ;;  %v1952_v34 = vmov 124  }
 0x19c   :  { %v934_v40 = vpop.permute.xlu1 %933  ;;  %v931_v46 = vmul.f32 %v930_v39, %v920_v38 }
 0x19d   :  { %v940_v42 = vmul.f32 %v939_v36, %v934_v40  ;;  %1744 = vset.pattern.permute.xlu1 %v1947_v43  ;;  %v1049_v36 = vrot.slane %v56_v26, %v2036_v58  ;;  %v1953_v40 = vmov 126   ;;  %v1060_v43 = vrot.slane %v56_v26, %v2032_v56 }
 0x19e   :  { %1351 = vperm.xlu1 %1744, %v1976_v3  }
 0x19f   :  { %v941_v47 = vadd.f32 1.0, %v940_v42  ;;  %v1050_v42 = vmul.f32 %v1049_v36, %v1044_v37 }
 0x1a1   :  { %v942_v48 = vmul.f32 %v941_v47, %v931_v46  ;;  %v956_v49 = vpop.permute.xlu1 %955  ;;  %v1051_v47 = vadd.f32 1.0, %v1050_v42 }
 0x1a2   :  { %v962_v51 = vmul.f32 %v961_v45, %v956_v49  ;;  %1745 = vset.pattern.permute.xlu1 %v1948_v50  ;;  %v1071_v49 = vrot.slane %v56_v26, %v2038_v61  ;;  %v1077_v50 = vpop.permute.xlu0 %1076 }
 0x1a3   :  { %1362 = vperm.xlu1 %1745, %v1976_v3   ;;  %v953_v59 = vmul.f32 %v952_v41, %v942_v48 }
 0x1a4   :  { %v963_v60 = vadd.f32 1.0, %v962_v51  ;;  %v1082_v51 = vrot.slane %v56_v26, %v2046_v4 }
 0x1a6   :  { %v967_v62 = vpop.permute.xlu1 %966  ;;  %v964_v53 = vmul.f32 %v963_v60, %v953_v59  ;;  %v1083_v60 = vmul.f32 %v1082_v51, %v1077_v50  ;;  %v58_v51 = vld [vmem:[#allocation6 + $0x68] sm:$0xff] }
 0x1a7   :  { %v973_v63 = vmul.f32 %v972_v54, %v967_v62  ;;  %1747 = vset.pattern.permute.xlu1 %v1949_v0  ;;  %v1093_v62 = vrot.slane %v56_v26, %v2048_v5 }
 0x1a8   :  { %1384 = vperm.xlu1 %1747, %v1976_v3  }
 0x1a9   :  { %v974_v7 = vadd.f32 1.0, %v973_v63 }
 0x1ab   :  { %v975_v8 = vmul.f32 %v974_v7, %v964_v53  ;;  %v989_v10 = vpop.permute.xlu1 %988  ;;  %v1115_v7 = vrot.slane %v56_v26, %v2064_v31 }
 0x1ac   :  { %v995_v12 = vmul.f32 %v994_v6, %v989_v10  ;;  %1748 = vset.pattern.permute.xlu1 %v1950_v13  ;;  %v1084_v6 = vadd.f32 1.0, %v1083_v60  ;;  %v1214_v60 = vrot.slane %v58_v51, %v2026_v52 }
 0x1ad   :  { %1395 = vperm.xlu1 %1748, %v1976_v3   ;;  %v986_v16 = vmul.f32 %v985_v9, %v975_v8  ;;  %v1110_v8 = vpop.permute.xlu0 %1109 }
 0x1ae   :  { %v996_v17 = vadd.f32 1.0, %v995_v12  ;;  %v57_v12 = vld [vmem:[#allocation6 + $0x60] sm:$0xff]  ;;  %v1116_v15 = vmul.f32 %v1115_v7, %v1110_v8 }
 0x1af   :  { %v1126_v2 = vrot.slane %v57_v12, %v2026_v52 }
 0x1b0   :  { %v1000_v19 = vpop.permute.xlu1 %999  ;;  %v997_v11 = vmul.f32 %v996_v17, %v986_v16 }
 0x1b1   :  { %v1006_v20 = vmul.f32 %v1005_v14, %v1000_v19  ;;  %1750 = vset.pattern.permute.xlu1 %v1951_v21 }
 0x1b2   :  { %1417 = vperm.xlu1 %1750, %v1976_v3  }
 0x1b3   :  { %v1007_v25 = vadd.f32 1.0, %v1006_v20  ;;  %v1117_v20 = vadd.f32 1.0, %v1116_v15 }
 0x1b5   :  { %v1008_v27 = vmul.f32 %v1007_v25, %v997_v11  ;;  %v1022_v30 = vpop.permute.xlu1 %1021  ;;  %v1148_v11 = vrot.slane %v57_v12, %v2032_v56  ;;  %v1143_v25 = vpop.permute.xlu0 %1142 }
 0x1b6   :  { %v1028_v32 = vmul.f32 %v1027_v23, %v1022_v30  ;;  %1751 = vset.pattern.permute.xlu1 %v1952_v34  ;;  %v1137_v23 = vrot.slane %v57_v12, %v2036_v58  ;;  %v1159_v34 = vrot.slane %v57_v12, %v2038_v61 }
 0x1b7   :  { %1428 = vperm.xlu1 %1751, %v1976_v3   ;;  %v1019_v24 = vmul.f32 %v1018_v29, %v1008_v27 }
 0x1b8   :  { %v1029_v38 = vadd.f32 1.0, %v1028_v32  ;;  %v1149_v32 = vmul.f32 %v1148_v11, %v1143_v25 }
 0x1b9   :  { %v1176_v42 = vpop.permute.xlu0 %1175 }
 0x1ba   :  { %v1033_v39 = vpop.permute.xlu1 %1032  ;;  %v1030_v44 = vmul.f32 %v1029_v38, %v1019_v24  ;;  %v1150_v24 = vadd.f32 1.0, %v1149_v32 }
 0x1bb   :  { %v1039_v28 = vmul.f32 %v1038_v35, %v1033_v39  ;;  %1753 = vset.pattern.permute.xlu1 %v1953_v40  ;;  %v1181_v40 = vrot.slane %v57_v12, %v2048_v5 }
 0x1bc   :  { %1450 = vperm.xlu1 %1753, %v1976_v3  }
 0x1bd   :  { %v1040_v45 = vadd.f32 1.0, %v1039_v28  ;;  %v1170_v28 = vrot.slane %v57_v12, %v2046_v4 }
 0x1bf   :  { %v1041_v46 = vmul.f32 %v1040_v45, %v1030_v44  ;;  %v1055_v48 = vpop.permute.xlu1 %1054 }
 0x1c0   :  { %v1061_v41 = vmul.f32 %v1060_v43, %v1055_v48  ;;  %1754 = vset.pattern.permute.xlu1 %v1928_v33  ;;  %v1192_v48 = vrot.slane %v57_v12, %v2058_v18 }
 0x1c1   :  { %1461 = vperm.xlu1 %1754, %v1976_v3   ;;  %v1052_v54 = vmul.f32 %v1051_v47, %v1041_v46  ;;  %v1104_v3 = vrot.slane %v56_v26, %v2058_v18  ;;  %v1182_v47 = vmul.f32 %v1181_v40, %v1176_v42  ;;  %v59_v40 = vld [vmem:[#allocation6 + $0x70] sm:$0xff] }
 0x1c2   :  { %v1062_v55 = vadd.f32 1.0, %v1061_v41 }
 0x1c4   :  { %v1066_v57 = vpop.permute.xlu1 %1065  ;;  %v1063_v63 = vmul.f32 %v1062_v55, %v1052_v54  ;;  %v1183_v54 = vadd.f32 1.0, %v1182_v47  ;;  %v1313_v47 = vrot.slane %v59_v40, %v2036_v58 }
 0x1c5   :  { %v1072_v59 = vmul.f32 %v1071_v49, %v1066_v57 }
 0x1c7   :  { %v1073_v0 = vadd.f32 1.0, %v1072_v59  ;;  %v1203_v59 = vrot.slane %v57_v12, %v2064_v31  ;;  %v1247_v12 = vrot.slane %v58_v51, %v2038_v61 }
 0x1c9   :  { %v1074_v1 = vmul.f32 %v1073_v0, %v1063_v63  ;;  %v1088_v53 = vpop.permute.xlu1 %1087 }
 0x1ca   :  { %v1094_v33 = vmul.f32 %v1093_v62, %v1088_v53  ;;  %v1209_v62 = vpop.permute.xlu0 %1208 }
 0x1cb   :  { %v1085_v9 = vmul.f32 %v1084_v6, %v1074_v1  ;;  %v1215_v53 = vmul.f32 %v1214_v60, %v1209_v62 }
 0x1cc   :  { %v1095_v10 = vadd.f32 1.0, %v1094_v33  ;;  %v1225_v33 = vrot.slane %v58_v51, %v2036_v58 }
 0x1ce   :  { %v1099_v13 = vpop.permute.xlu1 %1098  ;;  %v1096_v16 = vmul.f32 %v1095_v10, %v1085_v9  ;;  %v1216_v9 = vadd.f32 1.0, %v1215_v53  ;;  %v1242_v15 = vpop.permute.xlu0 %1241 }
 0x1cf   :  { %v1105_v14 = vmul.f32 %v1104_v3, %v1099_v13 }
 0x1d1   :  { %v1106_v17 = vadd.f32 1.0, %v1105_v14  ;;  %v1236_v14 = vrot.slane %v58_v51, %v2032_v56 }
 0x1d2   :  { %v1275_v32 = vpop.permute.xlu0 %1274 }
 0x1d3   :  { %v1107_v19 = vmul.f32 %v1106_v17, %v1096_v16  ;;  %v1121_v21 = vpop.permute.xlu1 %1120 }
 0x1d4   :  { %v1127_v22 = vmul.f32 %v1126_v2, %v1121_v21  ;;  %v1258_v21 = vrot.slane %v58_v51, %v2046_v4 }
 0x1d5   :  { %v1118_v26 = vmul.f32 %v1117_v20, %v1107_v19  ;;  %v1248_v20 = vmul.f32 %v1247_v12, %v1242_v15 }
 0x1d6   :  { %v1128_v27 = vadd.f32 1.0, %v1127_v22 }
 0x1d7   :  { %v1249_v25 = vadd.f32 1.0, %v1248_v20 }
 0x1d8   :  { %v1132_v29 = vpop.permute.xlu1 %1131  ;;  %v1129_v35 = vmul.f32 %v1128_v27, %v1118_v26 }
 0x1d9   :  { %v1138_v30 = vmul.f32 %v1137_v23, %v1132_v29  ;;  %v1269_v29 = vrot.slane %v58_v51, %v2048_v5 }
 0x1db   :  { %v1139_v36 = vadd.f32 1.0, %v1138_v30  ;;  %v1280_v30 = vrot.slane %v58_v51, %v2058_v18 }
 0x1dd   :  { %v1140_v37 = vmul.f32 %v1139_v36, %v1129_v35  ;;  %v1154_v38 = vpop.permute.xlu1 %1153 }
 0x1de   :  { %v1160_v39 = vmul.f32 %v1159_v34, %v1154_v38  ;;  %v1291_v38 = vrot.slane %v58_v51, %v2064_v31 }
 0x1df   :  { %v1151_v43 = vmul.f32 %v1150_v24, %v1140_v37  ;;  %v1281_v24 = vmul.f32 %v1280_v30, %v1275_v32 }
 0x1e0   :  { %v1161_v44 = vadd.f32 1.0, %v1160_v39 }
 0x1e2   :  { %v1165_v45 = vpop.permute.xlu1 %1164  ;;  %v1162_v41 = vmul.f32 %v1161_v44, %v1151_v43  ;;  %v1282_v43 = vadd.f32 1.0, %v1281_v24 }
 0x1e3   :  { %v1171_v46 = vmul.f32 %v1170_v28, %v1165_v45 }
 0x1e5   :  { %v1172_v49 = vadd.f32 1.0, %v1171_v46  ;;  %v1302_v46 = vrot.slane %v59_v40, %v2026_v52 }
 0x1e7   :  { %v1173_v50 = vmul.f32 %v1172_v49, %v1162_v41  ;;  %v1187_v55 = vpop.permute.xlu1 %1186 }
 0x1e8   :  { %v1193_v57 = vmul.f32 %v1192_v48, %v1187_v55  ;;  %v1308_v48 = vpop.permute.xlu0 %1307 }
 0x1e9   :  { %v1184_v63 = vmul.f32 %v1183_v54, %v1173_v50  ;;  %v1314_v55 = vmul.f32 %v1313_v47, %v1308_v48 }
 0x1ea   :  { %v1194_v0 = vadd.f32 1.0, %v1193_v57  ;;  %v1324_v57 = vrot.slane %v59_v40, %v2032_v56 }
 0x1eb   :  { %v1315_v62 = vadd.f32 1.0, %v1314_v55 }
 0x1ec   :  { %v1198_v1 = vpop.permute.xlu1 %1197  ;;  %v1195_v3 = vmul.f32 %v1194_v0, %v1184_v63  ;;  %v1341_v53 = vpop.permute.xlu0 %1340 }
 0x1ed   :  { %v1204_v6 = vmul.f32 %v1203_v59, %v1198_v1  ;;  %v1335_v1 = vrot.slane %v59_v40, %v2038_v61 }
 0x1ef   :  { %v1205_v7 = vadd.f32 1.0, %v1204_v6  ;;  %v1346_v6 = vrot.slane %v59_v40, %v2046_v4 }
 0x1f0   :  { %v1374_v20 = vpop.permute.xlu0 %1373 }
 0x1f1   :  { %v1206_v8 = vmul.f32 %v1205_v7, %v1195_v3  ;;  %v1220_v10 = vpop.permute.xlu1 %1219 }
 0x1f2   :  { %v1226_v13 = vmul.f32 %v1225_v33, %v1220_v10  ;;  %v1357_v10 = vrot.slane %v59_v40, %v2048_v5 }
 0x1f3   :  { %v1217_v2 = vmul.f32 %v1216_v9, %v1206_v8  ;;  %v1347_v9 = vmul.f32 %v1346_v6, %v1341_v53 }
 0x1f4   :  { %v1227_v16 = vadd.f32 1.0, %v1226_v13 }
 0x1f5   :  { %v1348_v15 = vadd.f32 1.0, %v1347_v9 }
 0x1f6   :  { %v1231_v17 = vpop.permute.xlu1 %1230  ;;  %v1228_v22 = vmul.f32 %v1227_v16, %v1217_v2 }
 0x1f7   :  { %v1237_v19 = vmul.f32 %v1236_v14, %v1231_v17  ;;  %v1368_v17 = vrot.slane %v59_v40, %v2058_v18 }
 0x1f9   :  { %v1238_v23 = vadd.f32 1.0, %v1237_v19  ;;  %v1379_v19 = vrot.slane %v59_v40, %v2064_v31 }
 0x1fb   :  { %v1239_v11 = vmul.f32 %v1238_v23, %v1228_v22  ;;  %v1253_v26 = vpop.permute.xlu1 %1252  ;;  %v60_v23 = vld [vmem:[#allocation6 + $0x78] sm:$0xff] }
 0x1fc   :  { %v1259_v27 = vmul.f32 %v1258_v21, %v1253_v26  ;;  %v1380_v26 = vmul.f32 %v1379_v19, %v1374_v20  ;;  %v1412_v24 = vrot.slane %v60_v23, %v2032_v56  ;;  %v1467_v6 = vrot.slane %v60_v23, %v2064_v31 }
 0x1fd   :  { %v1250_v34 = vmul.f32 %v1249_v25, %v1239_v11 }
 0x1fe   :  { %v1260_v35 = vadd.f32 1.0, %v1259_v27  ;;  %v1390_v27 = vrot.slane %v60_v23, %v2026_v52 }
 0x200   :  { %v1264_v36 = vpop.permute.xlu1 %1263  ;;  %v1261_v39 = vmul.f32 %v1260_v35, %v1250_v34  ;;  %v1381_v34 = vadd.f32 1.0, %v1380_v26 }
 0x201   :  { %v1270_v37 = vmul.f32 %v1269_v29, %v1264_v36 }
 0x203   :  { %v1271_v28 = vadd.f32 1.0, %v1270_v37  ;;  %v1401_v37 = vrot.slane %v60_v23, %v2036_v58  ;;  %v1445_v58 = vrot.slane %v60_v23, %v2048_v5 }
 0x205   :  { %v1272_v42 = vmul.f32 %v1271_v28, %v1261_v39  ;;  %v1286_v44 = vpop.permute.xlu1 %1285 }
 0x206   :  { %v1292_v45 = vmul.f32 %v1291_v38, %v1286_v44  ;;  %v1407_v38 = vpop.permute.xlu0 %1406  ;;  %v1423_v44 = vrot.slane %v60_v23, %v2038_v61 }
 0x207   :  { %v1283_v41 = vmul.f32 %v1282_v43, %v1272_v42  ;;  %v1413_v43 = vmul.f32 %v1412_v24, %v1407_v38 }
 0x208   :  { %v1293_v49 = vadd.f32 1.0, %v1292_v45 }
 0x209   :  { %v1414_v47 = vadd.f32 1.0, %v1413_v43 }
 0x20a   :  { %v1297_v50 = vpop.permute.xlu1 %1296  ;;  %v1294_v51 = vmul.f32 %v1293_v49, %v1283_v41  ;;  %v1434_v49 = vrot.slane %v60_v23, %v2046_v4 }
 0x20b   :  { %v1303_v54 = vmul.f32 %v1302_v46, %v1297_v50  ;;  %v1440_v50 = vpop.permute.xlu0 %1439 }
 0x20d   :  { %v1304_v59 = vadd.f32 1.0, %v1303_v54 }
 0x20f   :  { %v1305_v60 = vmul.f32 %v1304_v59, %v1294_v51  ;;  %v1319_v63 = vpop.permute.xlu1 %1318  ;;  %v1446_v51 = vmul.f32 %v1445_v58, %v1440_v50  ;;  %v1456_v59 = vrot.slane %v60_v23, %v2058_v18 }
 0x210   :  { %v1325_v0 = vmul.f32 %v1324_v57, %v1319_v63 }
 0x211   :  { %v1316_v33 = vmul.f32 %v1315_v62, %v1305_v60  ;;  %v1447_v63 = vadd.f32 1.0, %v1446_v51 }
 0x212   :  { %v1326_v3 = vadd.f32 1.0, %v1325_v0 }
 0x214   :  { %v1330_v7 = vpop.permute.xlu1 %1329  ;;  %v1327_v13 = vmul.f32 %v1326_v3, %v1316_v33 }
 0x215   :  { %v1336_v8 = vmul.f32 %v1335_v1, %v1330_v7 }
 0x217   :  { %v1337_v14 = vadd.f32 1.0, %v1336_v8 }
 0x219   :  { %v1338_v12 = vmul.f32 %v1337_v14, %v1327_v13  ;;  %v1352_v2 = vpop.permute.xlu1 %1351 }
 0x21a   :  { %v1358_v16 = vmul.f32 %v1357_v10, %v1352_v2 }
 0x21b   :  { %v1349_v21 = vmul.f32 %v1348_v15, %v1338_v12 }
 0x21c   :  { %v1359_v22 = vadd.f32 1.0, %v1358_v16 }
 0x21e   :  { %v1363_v11 = vpop.permute.xlu1 %1362  ;;  %v1360_v29 = vmul.f32 %v1359_v22, %v1349_v21 }
 0x21f   :  { %v1369_v25 = vmul.f32 %v1368_v17, %v1363_v11 }
 0x221   :  { %v1370_v30 = vadd.f32 1.0, %v1369_v25 }
 0x223   :  { %v1371_v32 = vmul.f32 %v1370_v30, %v1360_v29  ;;  %v1385_v35 = vpop.permute.xlu1 %1384 }
 0x224   :  { %v1391_v36 = vmul.f32 %v1390_v27, %v1385_v35 }
 0x225   :  { %v1382_v39 = vmul.f32 %v1381_v34, %v1371_v32 }
 0x226   :  { %v1392_v28 = vadd.f32 1.0, %v1391_v36 }
 0x228   :  { %v1396_v40 = vpop.permute.xlu1 %1395  ;;  %v1393_v45 = vmul.f32 %v1392_v28, %v1382_v39 }
 0x229   :  { %v1402_v42 = vmul.f32 %v1401_v37, %v1396_v40 }
 0x22b   :  { %v1403_v52 = vadd.f32 1.0, %v1402_v42 }
 0x22d   :  { %v1404_v46 = vmul.f32 %v1403_v52, %v1393_v45  ;;  %v1418_v48 = vpop.permute.xlu1 %1417 }
 0x22e   :  { %v1424_v41 = vmul.f32 %v1423_v44, %v1418_v48 }
 0x22f   :  { %v1415_v56 = vmul.f32 %v1414_v47, %v1404_v46 }
 0x230   :  { %v1425_v54 = vadd.f32 1.0, %v1424_v41 }
 0x232   :  { %v1429_v55 = vpop.permute.xlu1 %1428  ;;  %v1426_v60 = vmul.f32 %v1425_v54, %v1415_v56 }
 0x233   :  { %v1435_v57 = vmul.f32 %v1434_v49, %v1429_v55 }
 0x235   :  { %v1436_v61 = vadd.f32 1.0, %v1435_v57 }
 0x237   :  { %v1437_v62 = vmul.f32 %v1436_v61, %v1426_v60  ;;  %v1451_v0 = vpop.permute.xlu1 %1450 }
 0x238   :  { %v1457_v1 = vmul.f32 %v1456_v59, %v1451_v0 }
 0x239   :  { %v1448_v53 = vmul.f32 %v1447_v63, %v1437_v62 }
 0x23a   :  { %v1458_v4 = vadd.f32 1.0, %v1457_v1 }
 0x23c   :  { %v1462_v33 = vpop.permute.xlu1 %1461  ;;  %v1459_v3 = vmul.f32 %v1458_v4, %v1448_v53 }
 0x23d   :  { %v1468_v5 = vmul.f32 %v1467_v6, %v1462_v33 }
 0x23f   :  { %v1469_v7 = vadd.f32 1.0, %v1468_v5 }
 0x241   :  { %v1470_v8 = vmul.f32 %v1469_v7, %v1459_v3 }
 0x243   :  { %1476 = vst [vmem:[#allocation8] sm:$0xff] %v1470_v8 }
 0x244   :  { %1807 = shalt.err (!%p1804_p0)
}
 0x245   :  { %1486 = dma.vmem_to_hbm [thread:$0]  %s1484_s1, 128, %s2357_s2, [#allocation5]  }
 0x246   :  { %1820 = dma.done.wait [#allocation5], 128  }
 0x247   :  { %1821 = vsyncadd [#allocation5], 4294967168 }
 0x248   :  { %1490 = vsyncpa [#allocation4], 1 }
 0x249   :  { %1491 = vsyncpa [#allocation7], 1 }
 0x24a   :  { %1492 = vsyncpa [#allocation5], 1 }

</bundles_post_ra>
